<compile_context>
chip_gen: v6e
topology: v6e:2x2x1
jax: 0.10.0
libtpu: 0.0.40
codegen_flags: <defaults>
</compile_context>

<pallas_src>
import functools

import jax
import jax.numpy as jnp
from jax.experimental import pallas as pl
from jax.experimental.pallas import tpu as pltpu


# ---------------------------------------------------------------------------
# Fused matmul + (scale,shift) + LeakyReLU [+ mean over output dim] kernel.
# ---------------------------------------------------------------------------
def _fused_matmul_kernel(x_ref, w_ref, scale_ref, shift_ref, o_ref, acc_ref,
                         *, alpha, reduce_mean):
    k = pl.program_id(1)
    nk = pl.num_programs(1)

    @pl.when(k == 0)
    def _():
        acc_ref[...] = jnp.zeros_like(acc_ref)

    acc_ref[...] += jnp.dot(x_ref[...], w_ref[...],
                            preferred_element_type=jnp.float32)

    @pl.when(k == nk - 1)
    def _():
        y = acc_ref[...] * scale_ref[...] + shift_ref[...]
        if alpha is not None:                      # LeakyReLU epilogue
            y = jnp.where(y >= 0, y, alpha * y)
        if reduce_mean:                            # Lambda(mean(dim=1))
            y = jnp.mean(y, axis=-1, keepdims=True)
        o_ref[...] = y.astype(o_ref.dtype)


def _pick_tile(dim, cap, multiple):
    """Largest tile <= cap that divides dim and is a multiple of `multiple`;
    full dim if dim <= cap or no such divisor exists."""
    if dim <= cap:
        return dim
    t = (cap // multiple) * multiple
    while t >= multiple:
        if dim % t == 0:
            return t
        t -= multiple
    return dim


def _fused_matmul(x, w, scale, shift, *, alpha=None, reduce_mean=False):
    """y = epilogue(x @ w) with per-output-channel scale/shift, optional
    LeakyReLU(alpha) and optional mean over the output dim.

    x: (M, K) f32, w: (K, N) f32, scale/shift: (N,) f32.
    Returns (M, N) or (M, 1) if reduce_mean.
    """
    M, K = x.shape
    K2, N = w.shape
    assert K == K2, (K, K2)

    # Tile sizes: biggest blocks that fit a conservative VMEM budget and keep
    # (8,128)-aligned (or full-extent) block shapes.
    tm = _pick_tile(M, 512, 8)
    tk = _pick_tile(K, 2048, 128)
    grid = (M // tm, K // tk)

    n_out = 1 if reduce_mean else N
    scale2 = scale.reshape(1, N).astype(jnp.float32)
    shift2 = shift.reshape(1, N).astype(jnp.float32)

    kernel = functools.partial(_fused_matmul_kernel,
                               alpha=alpha, reduce_mean=reduce_mean)

    return pl.pallas_call(
        kernel,
        out_shape=jax.ShapeDtypeStruct((M, n_out), x.dtype),
        grid_spec=pltpu.PrefetchScalarGridSpec(
            num_scalar_prefetch=0,
            grid=grid,
            in_specs=[
                pl.BlockSpec((tm, tk), lambda i, k: (i, k)),   # activations
                pl.BlockSpec((tk, N), lambda i, k: (k, 0)),    # weights
                pl.BlockSpec((1, N), lambda i, k: (0, 0)),     # scale
                pl.BlockSpec((1, N), lambda i, k: (0, 0)),     # shift
            ],
            out_specs=pl.BlockSpec((tm, n_out), lambda i, k: (i, 0)),
            scratch_shapes=[pltpu.VMEM((tm, N), jnp.float32)],
        ),
        compiler_params=pltpu.CompilerParams(
            dimension_semantics=("parallel", "arbitrary"),
        ),
    )(x, w, scale2, shift2)


# ---------------------------------------------------------------------------
# Layout glue (no FLOPs): im2col, weight reshapes, BatchNorm folding.
# ---------------------------------------------------------------------------
def _im2col_nhwc(x, kh, kw, stride, pad):
    """x: (N, H, W, C) -> patches (N*Ho*Wo, kh*kw*C), plus (Ho, Wo).
    Patch column ordering is (i, j, c) row-major."""
    N, H, W, C = x.shape
    xp = jnp.pad(x, ((0, 0), (pad, pad), (pad, pad), (0, 0)))
    Ho = (H + 2 * pad - kh) // stride + 1
    Wo = (W + 2 * pad - kw) // stride + 1
    cols = []
    for i in range(kh):
        for j in range(kw):
            cols.append(xp[:, i:i + stride * Ho:stride,
                           j:j + stride * Wo:stride, :])
    p = jnp.concatenate(cols, axis=-1)            # (N, Ho, Wo, kh*kw*C)
    return p.reshape(N * Ho * Wo, kh * kw * C), Ho, Wo


def _conv_w_to_mat(w):
    """PyTorch conv weight (O, I, kh, kw) -> (kh*kw*I, O) matching im2col."""
    O, I, kh, kw = w.shape
    return jnp.transpose(w, (2, 3, 1, 0)).reshape(kh * kw * I, O)


def _fold_bias_bn(bias, gamma=None, beta=None, mean=None, var=None, eps=1e-5):
    """Fold conv bias (+ optional eval-mode BatchNorm) into (scale, shift)."""
    if gamma is None:
        return jnp.ones_like(bias), bias
    g = gamma * jax.lax.rsqrt(var + eps)
    return g, (bias - mean) * g + beta


# ---------------------------------------------------------------------------
# Full FastDiscriminator forward.
# ---------------------------------------------------------------------------
def fast_discriminator_forward(x, params):
    """x: (N, 1, 28, 28) NCHW float32  ->  (N,) float32."""
    N = x.shape[0]
    h = jnp.transpose(x, (0, 2, 3, 1))            # NHWC activations

    # Conv2d(1, 32, 4, 2, 1) + LeakyReLU(0.2)
    p, Ho, Wo = _im2col_nhwc(h, 4, 4, 2, 1)
    scale, shift = _fold_bias_bn(params["b1"])
    h = _fused_matmul(p, _conv_w_to_mat(params["w1"]), scale, shift, alpha=0.2)
    h = h.reshape(N, Ho, Wo, 32)

    # Conv2d(32, 64, 4, 2, 1) + BatchNorm2d(64) + LeakyReLU(0.2)
    p, Ho, Wo = _im2col_nhwc(h, 4, 4, 2, 1)
    scale, shift = _fold_bias_bn(params["b2"], params["g2"], params["beta2"],
                                 params["m2"], params["v2"])
    h = _fused_matmul(p, _conv_w_to_mat(params["w2"]), scale, shift, alpha=0.2)
    h = h.reshape(N, Ho, Wo, 64)

    # Conv2d(64, 128, 4, 2, 5) + BatchNorm2d(128) + LeakyReLU(0.2)
    p, Ho, Wo = _im2col_nhwc(h, 4, 4, 2, 5)
    scale, shift = _fold_bias_bn(params["b3"], params["g3"], params["beta3"],
                                 params["m3"], params["v3"])
    h = _fused_matmul(p, _conv_w_to_mat(params["w3"]), scale, shift, alpha=0.2)
    # h: (N*7*7, 128), rows ordered (n, ho, wo)

    # Lambda(view(-1, 7*7*128)) + Linear(6272, hidden) + Lambda(mean(dim=1)).
    # The PyTorch flatten is channel-major (NCHW); instead of transposing the
    # activation we permute the Linear weight's K axis once (parameter side),
    # so the activation flatten below is a free metadata reshape.
    h = h.reshape(N, Ho * Wo * 128)
    wl = params["wl"]                              # (hidden, 6272), k = c*49+s
    hidden = wl.shape[0]
    wl_perm = (wl.reshape(hidden, 128, Ho * Wo)
                 .transpose(0, 2, 1)
                 .reshape(hidden, Ho * Wo * 128))  # k' = s*128 + c
    scale, shift = _fold_bias_bn(params["bl"])
    y = _fused_matmul(h, wl_perm.T, scale, shift, alpha=None, reduce_mean=True)
    return y.reshape(N)


# ---------------------------------------------------------------------------
# Pure-JAX reference (mirrors the PyTorch module, eval-mode BatchNorm).
# ---------------------------------------------------------------------------
def reference_forward(x, p):
    def conv(h, w, b, stride, pad):
        y = jax.lax.conv_general_dilated(
            h, w, (stride, stride), ((pad, pad), (pad, pad)),
            dimension_numbers=("NCHW", "OIHW", "NCHW"),
            precision=jax.lax.Precision.HIGHEST)
        return y + b.reshape(1, -1, 1, 1)

    def leaky(h):
        return jnp.where(h >= 0, h, 0.2 * h)

    def bn(h, g, beta, m, v, eps=1e-5):
        c = lambda a: a.reshape(1, -1, 1, 1)
        return (h - c(m)) * jax.lax.rsqrt(c(v) + eps) * c(g) + c(beta)

    h = leaky(conv(x, p["w1"], p["b1"], 2, 1))
    h = leaky(bn(conv(h, p["w2"], p["b2"], 2, 1),
                 p["g2"], p["beta2"], p["m2"], p["v2"]))
    h = leaky(bn(conv(h, p["w3"], p["b3"], 2, 5),
                 p["g3"], p["beta3"], p["m3"], p["v3"]))
    h = h.reshape(-1, 7 * 7 * 128)
    h = jnp.matmul(h, p["wl"].T, precision=jax.lax.Precision.HIGHEST) + p["bl"]
    return jnp.mean(h, axis=1)


if __name__ == "__main__":
    hidden_dim = 32
    key = jax.random.PRNGKey(0)
    ks = jax.random.split(key, 20)

    def n(k, shape, s=0.1):
        return jax.random.normal(k, shape, jnp.float32) * s

    params = {
        "w1": n(ks[0], (32, 1, 4, 4)),    "b1": n(ks[1], (32,)),
        "w2": n(ks[2], (64, 32, 4, 4)),   "b2": n(ks[3], (64,)),
        "g2": 1.0 + n(ks[4], (64,)),      "beta2": n(ks[5], (64,)),
        "m2": n(ks[6], (64,)),
        "v2": jax.random.uniform(ks[7], (64,), jnp.float32, 0.5, 1.5),
        "w3": n(ks[8], (128, 64, 4, 4)),  "b3": n(ks[9], (128,)),
        "g3": 1.0 + n(ks[10], (128,)),    "beta3": n(ks[11], (128,)),
        "m3": n(ks[12], (128,)),
        "v3": jax.random.uniform(ks[13], (128,), jnp.float32, 0.5, 1.5),
        "wl": n(ks[14], (hidden_dim, 7 * 7 * 128), 0.02),
        "bl": n(ks[15], (hidden_dim,)),
    }
    # MNIST-shaped input (the flatten hard-codes 7*7*128, so spatial must be 28).
    x = jax.random.normal(ks[16], (2, 1, 28, 28), jnp.float32)

    y = jax.jit(fast_discriminator_forward)(x, params)
    jax.block_until_ready(y)

    y_ref = reference_forward(x, params)
    assert y.shape == (2,), y.shape
    assert y.dtype == y_ref.dtype, (y.dtype, y_ref.dtype)
    assert jnp.allclose(y, y_ref, rtol=2e-2, atol=2e-2), (y, y_ref)

    print("KERNEL_OK")
</pallas_src>

<mosaic_0001>
module attributes {stable_mosaic.version = 11 : i64} {
  func.func @_fused_matmul_kernel(%arg0: i32, %arg1: i32, %arg2: memref<392x16xf32, #tpu.memory_space<vmem>>, %arg3: memref<16x32xf32, #tpu.memory_space<vmem>>, %arg4: memref<1x32xf32, #tpu.memory_space<vmem>>, %arg5: memref<1x32xf32, #tpu.memory_space<vmem>>, %arg6: memref<392x32xf32, #tpu.memory_space<vmem>>, %arg7: memref<392x32xf32, #tpu.memory_space<vmem>>) attributes {dimension_semantics = [#tpu.dimension_semantics<parallel>, #tpu.dimension_semantics<arbitrary>], iteration_bounds = array<i64: 1, 1>, scalar_prefetch = 0 : i64, scratch_operands = 1 : i64, tpu.core_type = #tpu.core_type<tc>, window_params = [{transform_indices = @transform_0, window_bounds = array<i64: 392, 16>}, {transform_indices = @transform_1, window_bounds = array<i64: 16, 32>}, {pipeline_mode = #tpu.pipeline_mode<synchronous>, transform_indices = @transform_2, window_bounds = array<i64: 1, 32>}, {pipeline_mode = #tpu.pipeline_mode<synchronous>, transform_indices = @transform_3, window_bounds = array<i64: 1, 32>}, {transform_indices = @transform_4, window_bounds = array<i64: 392, 32>}]} {
    %c0_i32 = arith.constant 0 : i32
    %0 = arith.cmpi eq, %arg1, %c0_i32 : i32
    %1 = arith.extui %0 : i1 to i32
    %c0_i32_0 = arith.constant 0 : i32
    %2 = arith.cmpi ne, %1, %c0_i32_0 : i32
    scf.if %2 {
      %cst_10 = arith.constant 0.000000e+00 : f32
      %12 = vector.broadcast %cst_10 : f32 to vector<392x32xf32>
      %c0_11 = arith.constant 0 : index
      %c0_12 = arith.constant 0 : index
      %13 = vector.load %arg7[%c0_11, %c0_12] : memref<392x32xf32, #tpu.memory_space<vmem>>, vector<392x32xf32>
      tpu.vector_store %arg7[%c0_11, %c0_12], %12 {strides = array<i32>} : memref<392x32xf32, #tpu.memory_space<vmem>>, vector<392x32xf32>,
    } else {
    }
    %c0 = arith.constant 0 : index
    %c0_1 = arith.constant 0 : index
    %3 = vector.load %arg7[%c0, %c0_1] : memref<392x32xf32, #tpu.memory_space<vmem>>, vector<392x32xf32>
    %c0_2 = arith.constant 0 : index
    %c0_3 = arith.constant 0 : index
    %4 = vector.load %arg2[%c0_2, %c0_3] : memref<392x16xf32, #tpu.memory_space<vmem>>, vector<392x16xf32>
    %c0_4 = arith.constant 0 : index
    %c0_5 = arith.constant 0 : index
    %5 = vector.load %arg3[%c0_4, %c0_5] : memref<16x32xf32, #tpu.memory_space<vmem>>, vector<16x32xf32>
    %cst = arith.constant dense<0.000000e+00> : vector<392x32xf32>
    %6 = tpu.matmul %4, %5, %cst {dimension_numbers = #tpu.dot_dimension_numbers<[1], [0], [0], [1], [0, 0, 1, 1], [], []>} : vector<392x16xf32>, vector<16x32xf32>, vector<392x32xf32> -> vector<392x32xf32>
    %7 = arith.addf %3, %6 : vector<392x32xf32>
    %c0_6 = arith.constant 0 : index
    %c0_7 = arith.constant 0 : index
    %8 = vector.load %arg7[%c0_6, %c0_7] : memref<392x32xf32, #tpu.memory_space<vmem>>, vector<392x32xf32>
    tpu.vector_store %arg7[%c0_6, %c0_7], %7 {strides = array<i32>} : memref<392x32xf32, #tpu.memory_space<vmem>>, vector<392x32xf32>,
    %c0_i32_8 = arith.constant 0 : i32
    %9 = arith.cmpi eq, %arg1, %c0_i32_8 : i32
    %10 = arith.extui %9 : i1 to i32
    %c0_i32_9 = arith.constant 0 : i32
    %11 = arith.cmpi ne, %10, %c0_i32_9 : i32
    scf.if %11 {
      %c0_10 = arith.constant 0 : index
      %c0_11 = arith.constant 0 : index
      %12 = vector.load %arg7[%c0_10, %c0_11] : memref<392x32xf32, #tpu.memory_space<vmem>>, vector<392x32xf32>
      %c0_12 = arith.constant 0 : index
      %c0_13 = arith.constant 0 : index
      %13 = vector.load %arg4[%c0_12, %c0_13] : memref<1x32xf32, #tpu.memory_space<vmem>>, vector<1x32xf32>
      %14 = vector.broadcast %13 : vector<1x32xf32> to vector<392x32xf32>
      %15 = arith.mulf %12, %14 : vector<392x32xf32>
      %c0_14 = arith.constant 0 : index
      %c0_15 = arith.constant 0 : index
      %16 = vector.load %arg5[%c0_14, %c0_15] : memref<1x32xf32, #tpu.memory_space<vmem>>, vector<1x32xf32>
      %17 = vector.broadcast %16 : vector<1x32xf32> to vector<392x32xf32>
      %18 = arith.addf %15, %17 : vector<392x32xf32>
      %cst_16 = arith.constant 0.000000e+00 : f32
      %19 = vector.broadcast %cst_16 : f32 to vector<392x32xf32>
      %20 = arith.cmpf oge, %18, %19 : vector<392x32xf32>
      %cst_17 = arith.constant 2.000000e-01 : f32
      %21 = vector.broadcast %cst_17 : f32 to vector<392x32xf32>
      %22 = arith.mulf %21, %18 : vector<392x32xf32>
      %23 = arith.select %20, %18, %22 : vector<392x32xi1>, vector<392x32xf32>
      %c0_18 = arith.constant 0 : index
      %c0_19 = arith.constant 0 : index
      %24 = vector.load %arg6[%c0_18, %c0_19] : memref<392x32xf32, #tpu.memory_space<vmem>>, vector<392x32xf32>
      tpu.vector_store %arg6[%c0_18, %c0_19], %23 {strides = array<i32>} : memref<392x32xf32, #tpu.memory_space<vmem>>, vector<392x32xf32>,
    } else {
    }
    return
  }
  func.func @transform_0(%arg0: i32, %arg1: i32) -> (i32, i32) {
    %c0_i32 = arith.constant 0 : i32
    return %arg0, %arg1 : i32, i32
  }
  func.func @transform_1(%arg0: i32, %arg1: i32) -> (i32, i32) {
    %c0_i32 = arith.constant 0 : i32
    %c0_i32_0 = arith.constant 0 : i32
    return %arg1, %c0_i32 : i32, i32
  }
  func.func @transform_2(%arg0: i32, %arg1: i32) -> (i32, i32) {
    %c0_i32 = arith.constant 0 : i32
    %c0_i32_0 = arith.constant 0 : i32
    %c0_i32_1 = arith.constant 0 : i32
    return %c0_i32, %c0_i32_0 : i32, i32
  }
  func.func @transform_3(%arg0: i32, %arg1: i32) -> (i32, i32) {
    %c0_i32 = arith.constant 0 : i32
    %c0_i32_0 = arith.constant 0 : i32
    %c0_i32_1 = arith.constant 0 : i32
    return %c0_i32, %c0_i32_0 : i32, i32
  }
  func.func @transform_4(%arg0: i32, %arg1: i32) -> (i32, i32) {
    %c0_i32 = arith.constant 0 : i32
    %c0_i32_0 = arith.constant 0 : i32
    return %arg0, %c0_i32 : i32, i32
  }
}

module attributes {stable_mosaic.version = 11 : i64} {
  func.func @_fused_matmul_kernel(%arg0: i32, %arg1: i32, %arg2: memref<98x512xf32, #tpu.memory_space<vmem>>, %arg3: memref<512x64xf32, #tpu.memory_space<vmem>>, %arg4: memref<1x64xf32, #tpu.memory_space<vmem>>, %arg5: memref<1x64xf32, #tpu.memory_space<vmem>>, %arg6: memref<98x64xf32, #tpu.memory_space<vmem>>, %arg7: memref<98x64xf32, #tpu.memory_space<vmem>>) attributes {dimension_semantics = [#tpu.dimension_semantics<parallel>, #tpu.dimension_semantics<arbitrary>], iteration_bounds = array<i64: 1, 1>, scalar_prefetch = 0 : i64, scratch_operands = 1 : i64, tpu.core_type = #tpu.core_type<tc>, window_params = [{transform_indices = @transform_0, window_bounds = array<i64: 98, 512>}, {transform_indices = @transform_1, window_bounds = array<i64: 512, 64>}, {pipeline_mode = #tpu.pipeline_mode<synchronous>, transform_indices = @transform_2, window_bounds = array<i64: 1, 64>}, {pipeline_mode = #tpu.pipeline_mode<synchronous>, transform_indices = @transform_3, window_bounds = array<i64: 1, 64>}, {transform_indices = @transform_4, window_bounds = array<i64: 98, 64>}]} {
    %c0_i32 = arith.constant 0 : i32
    %0 = arith.cmpi eq, %arg1, %c0_i32 : i32
    %1 = arith.extui %0 : i1 to i32
    %c0_i32_0 = arith.constant 0 : i32
    %2 = arith.cmpi ne, %1, %c0_i32_0 : i32
    scf.if %2 {
      %cst_10 = arith.constant 0.000000e+00 : f32
      %12 = vector.broadcast %cst_10 : f32 to vector<98x64xf32>
      %c0_11 = arith.constant 0 : index
      %c0_12 = arith.constant 0 : index
      %13 = vector.load %arg7[%c0_11, %c0_12] : memref<98x64xf32, #tpu.memory_space<vmem>>, vector<98x64xf32>
      tpu.vector_store %arg7[%c0_11, %c0_12], %12 {strides = array<i32>} : memref<98x64xf32, #tpu.memory_space<vmem>>, vector<98x64xf32>,
    } else {
    }
    %c0 = arith.constant 0 : index
    %c0_1 = arith.constant 0 : index
    %3 = vector.load %arg7[%c0, %c0_1] : memref<98x64xf32, #tpu.memory_space<vmem>>, vector<98x64xf32>
    %c0_2 = arith.constant 0 : index
    %c0_3 = arith.constant 0 : index
    %4 = vector.load %arg2[%c0_2, %c0_3] : memref<98x512xf32, #tpu.memory_space<vmem>>, vector<98x512xf32>
    %c0_4 = arith.constant 0 : index
    %c0_5 = arith.constant 0 : index
    %5 = vector.load %arg3[%c0_4, %c0_5] : memref<512x64xf32, #tpu.memory_space<vmem>>, vector<512x64xf32>
    %cst = arith.constant dense<0.000000e+00> : vector<98x64xf32>
    %6 = tpu.matmul %4, %5, %cst {dimension_numbers = #tpu.dot_dimension_numbers<[1], [0], [0], [1], [0, 0, 1, 1], [], []>} : vector<98x512xf32>, vector<512x64xf32>, vector<98x64xf32> -> vector<98x64xf32>
    %7 = arith.addf %3, %6 : vector<98x64xf32>
    %c0_6 = arith.constant 0 : index
    %c0_7 = arith.constant 0 : index
    %8 = vector.load %arg7[%c0_6, %c0_7] : memref<98x64xf32, #tpu.memory_space<vmem>>, vector<98x64xf32>
    tpu.vector_store %arg7[%c0_6, %c0_7], %7 {strides = array<i32>} : memref<98x64xf32, #tpu.memory_space<vmem>>, vector<98x64xf32>,
    %c0_i32_8 = arith.constant 0 : i32
    %9 = arith.cmpi eq, %arg1, %c0_i32_8 : i32
    %10 = arith.extui %9 : i1 to i32
    %c0_i32_9 = arith.constant 0 : i32
    %11 = arith.cmpi ne, %10, %c0_i32_9 : i32
    scf.if %11 {
      %c0_10 = arith.constant 0 : index
      %c0_11 = arith.constant 0 : index
      %12 = vector.load %arg7[%c0_10, %c0_11] : memref<98x64xf32, #tpu.memory_space<vmem>>, vector<98x64xf32>
      %c0_12 = arith.constant 0 : index
      %c0_13 = arith.constant 0 : index
      %13 = vector.load %arg4[%c0_12, %c0_13] : memref<1x64xf32, #tpu.memory_space<vmem>>, vector<1x64xf32>
      %14 = vector.broadcast %13 : vector<1x64xf32> to vector<98x64xf32>
      %15 = arith.mulf %12, %14 : vector<98x64xf32>
      %c0_14 = arith.constant 0 : index
      %c0_15 = arith.constant 0 : index
      %16 = vector.load %arg5[%c0_14, %c0_15] : memref<1x64xf32, #tpu.memory_space<vmem>>, vector<1x64xf32>
      %17 = vector.broadcast %16 : vector<1x64xf32> to vector<98x64xf32>
      %18 = arith.addf %15, %17 : vector<98x64xf32>
      %cst_16 = arith.constant 0.000000e+00 : f32
      %19 = vector.broadcast %cst_16 : f32 to vector<98x64xf32>
      %20 = arith.cmpf oge, %18, %19 : vector<98x64xf32>
      %cst_17 = arith.constant 2.000000e-01 : f32
      %21 = vector.broadcast %cst_17 : f32 to vector<98x64xf32>
      %22 = arith.mulf %21, %18 : vector<98x64xf32>
      %23 = arith.select %20, %18, %22 : vector<98x64xi1>, vector<98x64xf32>
      %c0_18 = arith.constant 0 : index
      %c0_19 = arith.constant 0 : index
      %24 = vector.load %arg6[%c0_18, %c0_19] : memref<98x64xf32, #tpu.memory_space<vmem>>, vector<98x64xf32>
      tpu.vector_store %arg6[%c0_18, %c0_19], %23 {strides = array<i32>} : memref<98x64xf32, #tpu.memory_space<vmem>>, vector<98x64xf32>,
    } else {
    }
    return
  }
  func.func @transform_0(%arg0: i32, %arg1: i32) -> (i32, i32) {
    %c0_i32 = arith.constant 0 : i32
    return %arg0, %arg1 : i32, i32
  }
  func.func @transform_1(%arg0: i32, %arg1: i32) -> (i32, i32) {
    %c0_i32 = arith.constant 0 : i32
    %c0_i32_0 = arith.constant 0 : i32
    return %arg1, %c0_i32 : i32, i32
  }
  func.func @transform_2(%arg0: i32, %arg1: i32) -> (i32, i32) {
    %c0_i32 = arith.constant 0 : i32
    %c0_i32_0 = arith.constant 0 : i32
    %c0_i32_1 = arith.constant 0 : i32
    return %c0_i32, %c0_i32_0 : i32, i32
  }
  func.func @transform_3(%arg0: i32, %arg1: i32) -> (i32, i32) {
    %c0_i32 = arith.constant 0 : i32
    %c0_i32_0 = arith.constant 0 : i32
    %c0_i32_1 = arith.constant 0 : i32
    return %c0_i32, %c0_i32_0 : i32, i32
  }
  func.func @transform_4(%arg0: i32, %arg1: i32) -> (i32, i32) {
    %c0_i32 = arith.constant 0 : i32
    %c0_i32_0 = arith.constant 0 : i32
    return %arg0, %c0_i32 : i32, i32
  }
}

module attributes {stable_mosaic.version = 11 : i64} {
  func.func @_fused_matmul_kernel(%arg0: i32, %arg1: i32, %arg2: memref<98x1024xf32, #tpu.memory_space<vmem>>, %arg3: memref<1024x128xf32, #tpu.memory_space<vmem>>, %arg4: memref<1x128xf32, #tpu.memory_space<vmem>>, %arg5: memref<1x128xf32, #tpu.memory_space<vmem>>, %arg6: memref<98x128xf32, #tpu.memory_space<vmem>>, %arg7: memref<98x128xf32, #tpu.memory_space<vmem>>) attributes {dimension_semantics = [#tpu.dimension_semantics<parallel>, #tpu.dimension_semantics<arbitrary>], iteration_bounds = array<i64: 1, 1>, scalar_prefetch = 0 : i64, scratch_operands = 1 : i64, tpu.core_type = #tpu.core_type<tc>, window_params = [{transform_indices = @transform_0, window_bounds = array<i64: 98, 1024>}, {transform_indices = @transform_1, window_bounds = array<i64: 1024, 128>}, {pipeline_mode = #tpu.pipeline_mode<synchronous>, transform_indices = @transform_2, window_bounds = array<i64: 1, 128>}, {pipeline_mode = #tpu.pipeline_mode<synchronous>, transform_indices = @transform_3, window_bounds = array<i64: 1, 128>}, {transform_indices = @transform_4, window_bounds = array<i64: 98, 128>}]} {
    %c0_i32 = arith.constant 0 : i32
    %0 = arith.cmpi eq, %arg1, %c0_i32 : i32
    %1 = arith.extui %0 : i1 to i32
    %c0_i32_0 = arith.constant 0 : i32
    %2 = arith.cmpi ne, %1, %c0_i32_0 : i32
    scf.if %2 {
      %cst_10 = arith.constant 0.000000e+00 : f32
      %12 = vector.broadcast %cst_10 : f32 to vector<98x128xf32>
      %c0_11 = arith.constant 0 : index
      %c0_12 = arith.constant 0 : index
      %13 = vector.load %arg7[%c0_11, %c0_12] : memref<98x128xf32, #tpu.memory_space<vmem>>, vector<98x128xf32>
      tpu.vector_store %arg7[%c0_11, %c0_12], %12 {strides = array<i32>} : memref<98x128xf32, #tpu.memory_space<vmem>>, vector<98x128xf32>,
    } else {
    }
    %c0 = arith.constant 0 : index
    %c0_1 = arith.constant 0 : index
    %3 = vector.load %arg7[%c0, %c0_1] : memref<98x128xf32, #tpu.memory_space<vmem>>, vector<98x128xf32>
    %c0_2 = arith.constant 0 : index
    %c0_3 = arith.constant 0 : index
    %4 = vector.load %arg2[%c0_2, %c0_3] : memref<98x1024xf32, #tpu.memory_space<vmem>>, vector<98x1024xf32>
    %c0_4 = arith.constant 0 : index
    %c0_5 = arith.constant 0 : index
    %5 = vector.load %arg3[%c0_4, %c0_5] : memref<1024x128xf32, #tpu.memory_space<vmem>>, vector<1024x128xf32>
    %cst = arith.constant dense<0.000000e+00> : vector<98x128xf32>
    %6 = tpu.matmul %4, %5, %cst {dimension_numbers = #tpu.dot_dimension_numbers<[1], [0], [0], [1], [0, 0, 1, 1], [], []>} : vector<98x1024xf32>, vector<1024x128xf32>, vector<98x128xf32> -> vector<98x128xf32>
    %7 = arith.addf %3, %6 : vector<98x128xf32>
    %c0_6 = arith.constant 0 : index
    %c0_7 = arith.constant 0 : index
    %8 = vector.load %arg7[%c0_6, %c0_7] : memref<98x128xf32, #tpu.memory_space<vmem>>, vector<98x128xf32>
    tpu.vector_store %arg7[%c0_6, %c0_7], %7 {strides = array<i32>} : memref<98x128xf32, #tpu.memory_space<vmem>>, vector<98x128xf32>,
    %c0_i32_8 = arith.constant 0 : i32
    %9 = arith.cmpi eq, %arg1, %c0_i32_8 : i32
    %10 = arith.extui %9 : i1 to i32
    %c0_i32_9 = arith.constant 0 : i32
    %11 = arith.cmpi ne, %10, %c0_i32_9 : i32
    scf.if %11 {
      %c0_10 = arith.constant 0 : index
      %c0_11 = arith.constant 0 : index
      %12 = vector.load %arg7[%c0_10, %c0_11] : memref<98x128xf32, #tpu.memory_space<vmem>>, vector<98x128xf32>
      %c0_12 = arith.constant 0 : index
      %c0_13 = arith.constant 0 : index
      %13 = vector.load %arg4[%c0_12, %c0_13] : memref<1x128xf32, #tpu.memory_space<vmem>>, vector<1x128xf32>
      %14 = vector.broadcast %13 : vector<1x128xf32> to vector<98x128xf32>
      %15 = arith.mulf %12, %14 : vector<98x128xf32>
      %c0_14 = arith.constant 0 : index
      %c0_15 = arith.constant 0 : index
      %16 = vector.load %arg5[%c0_14, %c0_15] : memref<1x128xf32, #tpu.memory_space<vmem>>, vector<1x128xf32>
      %17 = vector.broadcast %16 : vector<1x128xf32> to vector<98x128xf32>
      %18 = arith.addf %15, %17 : vector<98x128xf32>
      %cst_16 = arith.constant 0.000000e+00 : f32
      %19 = vector.broadcast %cst_16 : f32 to vector<98x128xf32>
      %20 = arith.cmpf oge, %18, %19 : vector<98x128xf32>
      %cst_17 = arith.constant 2.000000e-01 : f32
      %21 = vector.broadcast %cst_17 : f32 to vector<98x128xf32>
      %22 = arith.mulf %21, %18 : vector<98x128xf32>
      %23 = arith.select %20, %18, %22 : vector<98x128xi1>, vector<98x128xf32>
      %c0_18 = arith.constant 0 : index
      %c0_19 = arith.constant 0 : index
      %24 = vector.load %arg6[%c0_18, %c0_19] : memref<98x128xf32, #tpu.memory_space<vmem>>, vector<98x128xf32>
      tpu.vector_store %arg6[%c0_18, %c0_19], %23 {strides = array<i32>} : memref<98x128xf32, #tpu.memory_space<vmem>>, vector<98x128xf32>,
    } else {
    }
    return
  }
  func.func @transform_0(%arg0: i32, %arg1: i32) -> (i32, i32) {
    %c0_i32 = arith.constant 0 : i32
    return %arg0, %arg1 : i32, i32
  }
  func.func @transform_1(%arg0: i32, %arg1: i32) -> (i32, i32) {
    %c0_i32 = arith.constant 0 : i32
    %c0_i32_0 = arith.constant 0 : i32
    return %arg1, %c0_i32 : i32, i32
  }
  func.func @transform_2(%arg0: i32, %arg1: i32) -> (i32, i32) {
    %c0_i32 = arith.constant 0 : i32
    %c0_i32_0 = arith.constant 0 : i32
    %c0_i32_1 = arith.constant 0 : i32
    return %c0_i32, %c0_i32_0 : i32, i32
  }
  func.func @transform_3(%arg0: i32, %arg1: i32) -> (i32, i32) {
    %c0_i32 = arith.constant 0 : i32
    %c0_i32_0 = arith.constant 0 : i32
    %c0_i32_1 = arith.constant 0 : i32
    return %c0_i32, %c0_i32_0 : i32, i32
  }
  func.func @transform_4(%arg0: i32, %arg1: i32) -> (i32, i32) {
    %c0_i32 = arith.constant 0 : i32
    %c0_i32_0 = arith.constant 0 : i32
    return %arg0, %c0_i32 : i32, i32
  }
}

module attributes {stable_mosaic.version = 11 : i64} {
  func.func @_fused_matmul_kernel(%arg0: i32, %arg1: i32, %arg2: memref<2x896xf32, #tpu.memory_space<vmem>>, %arg3: memref<896x32xf32, #tpu.memory_space<vmem>>, %arg4: memref<1x32xf32, #tpu.memory_space<vmem>>, %arg5: memref<1x32xf32, #tpu.memory_space<vmem>>, %arg6: memref<2x1xf32, #tpu.memory_space<vmem>>, %arg7: memref<2x32xf32, #tpu.memory_space<vmem>>) attributes {dimension_semantics = [#tpu.dimension_semantics<parallel>, #tpu.dimension_semantics<arbitrary>], iteration_bounds = array<i64: 1, 7>, scalar_prefetch = 0 : i64, scratch_operands = 1 : i64, tpu.core_type = #tpu.core_type<tc>, window_params = [{transform_indices = @transform_0, window_bounds = array<i64: 2, 896>}, {transform_indices = @transform_1, window_bounds = array<i64: 896, 32>}, {pipeline_mode = #tpu.pipeline_mode<synchronous>, transform_indices = @transform_2, window_bounds = array<i64: 1, 32>}, {pipeline_mode = #tpu.pipeline_mode<synchronous>, transform_indices = @transform_3, window_bounds = array<i64: 1, 32>}, {transform_indices = @transform_4, window_bounds = array<i64: 2, 1>}]} {
    %c0_i32 = arith.constant 0 : i32
    %0 = arith.cmpi eq, %arg1, %c0_i32 : i32
    %1 = arith.extui %0 : i1 to i32
    %c0_i32_0 = arith.constant 0 : i32
    %2 = arith.cmpi ne, %1, %c0_i32_0 : i32
    scf.if %2 {
      %cst_9 = arith.constant 0.000000e+00 : f32
      %12 = vector.broadcast %cst_9 : f32 to vector<2x32xf32>
      %c0_10 = arith.constant 0 : index
      %c0_11 = arith.constant 0 : index
      %13 = vector.load %arg7[%c0_10, %c0_11] : memref<2x32xf32, #tpu.memory_space<vmem>>, vector<2x32xf32>
      tpu.vector_store %arg7[%c0_10, %c0_11], %12 {strides = array<i32>} : memref<2x32xf32, #tpu.memory_space<vmem>>, vector<2x32xf32>,
    } else {
    }
    %c0 = arith.constant 0 : index
    %c0_1 = arith.constant 0 : index
    %3 = vector.load %arg7[%c0, %c0_1] : memref<2x32xf32, #tpu.memory_space<vmem>>, vector<2x32xf32>
    %c0_2 = arith.constant 0 : index
    %c0_3 = arith.constant 0 : index
    %4 = vector.load %arg2[%c0_2, %c0_3] : memref<2x896xf32, #tpu.memory_space<vmem>>, vector<2x896xf32>
    %c0_4 = arith.constant 0 : index
    %c0_5 = arith.constant 0 : index
    %5 = vector.load %arg3[%c0_4, %c0_5] : memref<896x32xf32, #tpu.memory_space<vmem>>, vector<896x32xf32>
    %cst = arith.constant dense<0.000000e+00> : vector<2x32xf32>
    %6 = tpu.matmul %4, %5, %cst {dimension_numbers = #tpu.dot_dimension_numbers<[1], [0], [0], [1], [0, 0, 1, 1], [], []>} : vector<2x896xf32>, vector<896x32xf32>, vector<2x32xf32> -> vector<2x32xf32>
    %7 = arith.addf %3, %6 : vector<2x32xf32>
    %c0_6 = arith.constant 0 : index
    %c0_7 = arith.constant 0 : index
    %8 = vector.load %arg7[%c0_6, %c0_7] : memref<2x32xf32, #tpu.memory_space<vmem>>, vector<2x32xf32>
    tpu.vector_store %arg7[%c0_6, %c0_7], %7 {strides = array<i32>} : memref<2x32xf32, #tpu.memory_space<vmem>>, vector<2x32xf32>,
    %c6_i32 = arith.constant 6 : i32
    %9 = arith.cmpi eq, %arg1, %c6_i32 : i32
    %10 = arith.extui %9 : i1 to i32
    %c0_i32_8 = arith.constant 0 : i32
    %11 = arith.cmpi ne, %10, %c0_i32_8 : i32
    scf.if %11 {
      %c0_9 = arith.constant 0 : index
      %c0_10 = arith.constant 0 : index
      %12 = vector.load %arg7[%c0_9, %c0_10] : memref<2x32xf32, #tpu.memory_space<vmem>>, vector<2x32xf32>
      %c0_11 = arith.constant 0 : index
      %c0_12 = arith.constant 0 : index
      %13 = vector.load %arg4[%c0_11, %c0_12] : memref<1x32xf32, #tpu.memory_space<vmem>>, vector<1x32xf32>
      %14 = vector.broadcast %13 : vector<1x32xf32> to vector<2x32xf32>
      %15 = arith.mulf %12, %14 : vector<2x32xf32>
      %c0_13 = arith.constant 0 : index
      %c0_14 = arith.constant 0 : index
      %16 = vector.load %arg5[%c0_13, %c0_14] : memref<1x32xf32, #tpu.memory_space<vmem>>, vector<1x32xf32>
      %17 = vector.broadcast %16 : vector<1x32xf32> to vector<2x32xf32>
      %18 = arith.addf %15, %17 : vector<2x32xf32>
      %cst_15 = arith.constant dense<0.000000e+00> : vector<2xf32>
      %19 = vector.multi_reduction <add>, %18, %cst_15 [1] : vector<2x32xf32> to vector<2xf32>
      %20 = vector.shape_cast %19 : vector<2xf32> to vector<2x1xf32>
      %cst_16 = arith.constant 3.200000e+01 : f32
      %21 = vector.broadcast %cst_16 : f32 to vector<2x1xf32>
      %22 = arith.divf %20, %21 : vector<2x1xf32>
      %c0_17 = arith.constant 0 : index
      %c0_18 = arith.constant 0 : index
      %23 = vector.load %arg6[%c0_17, %c0_18] : memref<2x1xf32, #tpu.memory_space<vmem>>, vector<2x1xf32>
      tpu.vector_store %arg6[%c0_17, %c0_18], %22 {strides = array<i32>} : memref<2x1xf32, #tpu.memory_space<vmem>>, vector<2x1xf32>,
    } else {
    }
    return
  }
  func.func @transform_0(%arg0: i32, %arg1: i32) -> (i32, i32) {
    %c0_i32 = arith.constant 0 : i32
    return %arg0, %arg1 : i32, i32
  }
  func.func @transform_1(%arg0: i32, %arg1: i32) -> (i32, i32) {
    %c0_i32 = arith.constant 0 : i32
    %c0_i32_0 = arith.constant 0 : i32
    return %arg1, %c0_i32 : i32, i32
  }
  func.func @transform_2(%arg0: i32, %arg1: i32) -> (i32, i32) {
    %c0_i32 = arith.constant 0 : i32
    %c0_i32_0 = arith.constant 0 : i32
    %c0_i32_1 = arith.constant 0 : i32
    return %c0_i32, %c0_i32_0 : i32, i32
  }
  func.func @transform_3(%arg0: i32, %arg1: i32) -> (i32, i32) {
    %c0_i32 = arith.constant 0 : i32
    %c0_i32_0 = arith.constant 0 : i32
    %c0_i32_1 = arith.constant 0 : i32
    return %c0_i32, %c0_i32_0 : i32, i32
  }
  func.func @transform_4(%arg0: i32, %arg1: i32) -> (i32, i32) {
    %c0_i32 = arith.constant 0 : i32
    %c0_i32_0 = arith.constant 0 : i32
    return %arg0, %c0_i32 : i32, i32
  }
}

</mosaic_0001>

<bundles_post_ra>
// kernel: fast_discriminator_forward.4
= control target key start
LH: loop header
LB: loop body
LE: loop exit
PB: predicated region body
PF: predicated region fallthrough
CT: control target
= control target key end

     0   :  { %9 = vsyncpa [#allocation4], 0  ;;  %s2201_s0 = inlined_call_operand.vmem [shape: f32[392,16], index: 0, kind: input, shape index: {}]   ;;  %s2202_s1 = inlined_call_operand.hbm [shape: f32[16,32], index: 1, kind: input, shape index: {}]   ;;  %s2203_s2 = inlined_call_operand.vmem [shape: f32[1,32], index: 2, kind: input, shape index: {}]   ;;  %s2204_s3 = inlined_call_operand.hbm [shape: f32[1,32], index: 3, kind: input, shape index: {}]   ;;  %s2205_s4 = inlined_call_operand.vmem [shape: f32[392,32], index: 4, kind: output, shape index: {}]  }
   0x1   :  { %10 = vsyncpa [#allocation6], 0  ;;  %s1429_s15 = smov [#allocation3]  }
   0x2   :  { %s18_s16 = sshll.u32 %s1429_s15, 4  ;;  %s19_s16 = int_to_ptr.vmem [resolvable:$true] %s18_s16 }
   0x3   :  { %s1393_s17 = scalar_lea.vmem %s19_s16, 256  ;;  %p1398_p1 = scmp.lt.s32.totalorder %s19_s16, %s19_s16 }
   0x4   :  { %p1394_p0 = scmp.ne.s32.totalorder %s19_s16, %s1393_s17  ;;  %p1399_p2 = scmp.lt.s32.totalorder %s1393_s17, %s1393_s17 }
   0x6   :  { %p1400_p3 = por %p1399_p2, %p1398_p1 }
   0x8   :  { %p1401_p4 = pnand %p1400_p3, %p1394_p0 }
   0xa   :  { %1404 = shalt.err (!%p1401_p4)
}
   0xb   :  { %s1430_s18 = smov 128   ;;  %s1431_s19 = smov 8  }
   0xc   :  { %24 = dma.hbm_to_vmem [thread:$0]  %s2202_s1, 256, %s19_s16, [#allocation4], %s1430_s18, %s1430_s18, %s1431_s19  }
   0xd   :  { %s1432_s22 = smov [#allocation5]  }
   0xe   :  { %s33_s23 = sshll.u32 %s1432_s22, 4  ;;  %s34_s23 = int_to_ptr.vmem [resolvable:$true] %s33_s23 }
   0xf   :  { %s1413_s24 = scalar_lea.vmem %s34_s23, 16  ;;  %s1417_s25 = scalar_lea.vmem %s34_s23, 32 }
  0x10   :  { %p1414_p5 = scmp.ne.s32.totalorder %s34_s23, %s1413_s24  ;;  %p1418_p6 = scmp.lt.s32.totalorder %s34_s23, %s34_s23 }
  0x11   :  { %p1419_p7 = scmp.lt.s32.totalorder %s1417_s25, %s1413_s24 }
  0x13   :  { %p1420_p8 = por %p1419_p7, %p1418_p6 }
  0x15   :  { %p1421_p9 = pnand %p1420_p8, %p1414_p5 }
  0x17   :  { %1424 = shalt.err (!%p1421_p9)
}
  0x18   :  { %36 = dma.hbm_to_vmem [thread:$0]  %s2204_s3, 16, %s34_s23, [#allocation6]  }
  0x19   :  { %1425 = dma.done.wait [#allocation4], 256  }
  0x1a   :  { %1426 = vsyncadd [#allocation4], 4294967040 }
  0x1b   :  { %1427 = dma.done.wait [#allocation6], 16  }
  0x1c   :  { %1428 = vsyncadd [#allocation6], 4294967280  ;;  %vm47_vm0 = vcmask 261120   ;;  %v1433_v0 = vmov 0.0   ;;  %vm1434_vm1 = vmmov 0   ;;  %v196_v1 = vld [vmem:[#allocation3 + $0x8] sm:$0xff] }
  0x1d   :  { %1222 = vmatprep.subr.mxu0 %v1433_v0  ;;  %1373 = vmatprep.subr.mxu1 %v1433_v0  ;;  %48 = vst.msk [vmem:[#allocation2] sm:$0xff] %vm47_vm0, %v1433_v0  ;;  %49 = vst.msk [vmem:[#allocation2 + $0x8] sm:$0xff] %vm47_vm0, %v1433_v0  ;;  %v195_v2 = vld [vmem:[#allocation3] sm:$0xff]  ;;  %v146_v3 = vld [vmem:[%s2201_s0] sm:$0xff]  ;;  %vm197_vm2 = vcmask 130048  }
  0x1e   :  { %50 = vst.msk [vmem:[#allocation2 + $0x10] sm:$0xff] %vm47_vm0, %v1433_v0  ;;  %51 = vst.msk [vmem:[#allocation2 + $0x18] sm:$0xff] %vm47_vm0, %v1433_v0  ;;  %1226 = vmatprep.mubr.msk.f32.mxu0 %vm1434_vm1, %v1433_v0  ;;  %1301 = vmatprep.mubr.msk.f32.mxu1 %vm1434_vm1, %v1433_v0  ;;  %v171_v4 = vld [vmem:[%s2201_s0 + $0xc8] sm:$0xff]  ;;  %v172_v6 = vld [vmem:[%s2201_s0 + $0xd0] sm:$0xff] }
  0x1f   :  { %52 = vst.msk [vmem:[#allocation2 + $0x20] sm:$0xff] %vm47_vm0, %v1433_v0  ;;  %53 = vst.msk [vmem:[#allocation2 + $0x28] sm:$0xff] %vm47_vm0, %v1433_v0  ;;  %1223 = vmatpush3.msra.mxu0 %v196_v1  ;;  %1375 = vmatpush3.msra.mxu1 %v196_v1  ;;  %v147_v5 = vld [vmem:[%s2201_s0 + $0x8] sm:$0xff]  ;;  %v148_v7 = vld [vmem:[%s2201_s0 + $0x10] sm:$0xff] }
  0x20   :  { %54 = vst.msk [vmem:[#allocation2 + $0x30] sm:$0xff] %vm47_vm0, %v1433_v0  ;;  %55 = vst.msk [vmem:[#allocation2 + $0x38] sm:$0xff] %vm47_vm0, %v1433_v0  ;;  %1224 = vmatprep.subr.mxu0 %v1433_v0  ;;  %1374 = vmatprep.subr.mxu1 %v1433_v0  ;;  %v173_v8 = vld [vmem:[%s2201_s0 + $0xd8] sm:$0xff]  ;;  %v174_v10 = vld [vmem:[%s2201_s0 + $0xe0] sm:$0xff] }
  0x21   :  { %56 = vst.msk [vmem:[#allocation2 + $0x40] sm:$0xff] %vm47_vm0, %v1433_v0  ;;  %57 = vst.msk [vmem:[#allocation2 + $0x48] sm:$0xff] %vm47_vm0, %v1433_v0  ;;  %1225 = vmatpush3.msra.mxu0 %v195_v2  ;;  %1376 = vmatpush3.msra.mxu1 %v195_v2  ;;  %v149_v9 = vld [vmem:[%s2201_s0 + $0x18] sm:$0xff]  ;;  %v150_v11 = vld [vmem:[%s2201_s0 + $0x20] sm:$0xff] }
  0x22   :  { %58 = vst.msk [vmem:[#allocation2 + $0x50] sm:$0xff] %vm47_vm0, %v1433_v0  ;;  %59 = vst.msk [vmem:[#allocation2 + $0x58] sm:$0xff] %vm47_vm0, %v1433_v0  ;;  %1227 = vmatmul.mubr.msk.f32.vlgmr.msra.gmra.mxu0 %vm197_vm2, %v146_v3  ;;  %1302 = vmatmul.mubr.msk.f32.vlgmr.msra.gmra.mxu1 %vm197_vm2, %v171_v4  ;;  %v175_v12 = vld [vmem:[%s2201_s0 + $0xe8] sm:$0xff]  ;;  %v176_v14 = vld [vmem:[%s2201_s0 + $0xf0] sm:$0xff] }
  0x23   :  { %60 = vst.msk [vmem:[#allocation2 + $0x60] sm:$0xff] %vm47_vm0, %v1433_v0  ;;  %61 = vst.msk [vmem:[#allocation2 + $0x68] sm:$0xff] %vm47_vm0, %v1433_v0  ;;  %1229 = vmatprep.mubr.msk.f32.mxu0 %vm1434_vm1, %v1433_v0  ;;  %1304 = vmatprep.mubr.msk.f32.mxu1 %vm1434_vm1, %v1433_v0  ;;  %v151_v13 = vld [vmem:[%s2201_s0 + $0x28] sm:$0xff]  ;;  %v152_v15 = vld [vmem:[%s2201_s0 + $0x30] sm:$0xff] }
  0x24   :  { %62 = vst.msk [vmem:[#allocation2 + $0x70] sm:$0xff] %vm47_vm0, %v1433_v0  ;;  %63 = vst.msk [vmem:[#allocation2 + $0x78] sm:$0xff] %vm47_vm0, %v1433_v0  ;;  %v177_v16 = vld [vmem:[%s2201_s0 + $0xf8] sm:$0xff]  ;;  %v178_v18 = vld [vmem:[%s2201_s0 + $0x100] sm:$0xff] }
  0x25   :  { %64 = vst.msk [vmem:[#allocation2 + $0x80] sm:$0xff] %vm47_vm0, %v1433_v0  ;;  %65 = vst.msk [vmem:[#allocation2 + $0x88] sm:$0xff] %vm47_vm0, %v1433_v0  ;;  %v153_v17 = vld [vmem:[%s2201_s0 + $0x38] sm:$0xff]  ;;  %v154_v19 = vld [vmem:[%s2201_s0 + $0x40] sm:$0xff] }
  0x26   :  { %66 = vst.msk [vmem:[#allocation2 + $0x90] sm:$0xff] %vm47_vm0, %v1433_v0  ;;  %67 = vst.msk [vmem:[#allocation2 + $0x98] sm:$0xff] %vm47_vm0, %v1433_v0  ;;  %1230 = vmatmul.mubr.msk.f32.gmra.mxu0 %vm197_vm2, %v147_v5  ;;  %1305 = vmatmul.mubr.msk.f32.gmra.mxu1 %vm197_vm2, %v172_v6  ;;  %v179_v20 = vld [vmem:[%s2201_s0 + $0x108] sm:$0xff]  ;;  %v180_v22 = vld [vmem:[%s2201_s0 + $0x110] sm:$0xff] }
  0x27   :  { %68 = vst.msk [vmem:[#allocation2 + $0xa0] sm:$0xff] %vm47_vm0, %v1433_v0  ;;  %69 = vst.msk [vmem:[#allocation2 + $0xa8] sm:$0xff] %vm47_vm0, %v1433_v0  ;;  %1232 = vmatprep.mubr.msk.f32.mxu0 %vm1434_vm1, %v1433_v0  ;;  %1307 = vmatprep.mubr.msk.f32.mxu1 %vm1434_vm1, %v1433_v0  ;;  %v155_v21 = vld [vmem:[%s2201_s0 + $0x48] sm:$0xff]  ;;  %v156_v23 = vld [vmem:[%s2201_s0 + $0x50] sm:$0xff] }
  0x28   :  { %70 = vst.msk [vmem:[#allocation2 + $0xb0] sm:$0xff] %vm47_vm0, %v1433_v0  ;;  %71 = vst.msk [vmem:[#allocation2 + $0xb8] sm:$0xff] %vm47_vm0, %v1433_v0  ;;  %v181_v24 = vld [vmem:[%s2201_s0 + $0x118] sm:$0xff]  ;;  %v182_v26 = vld [vmem:[%s2201_s0 + $0x120] sm:$0xff] }
  0x29   :  { %72 = vst.msk [vmem:[#allocation2 + $0xc0] sm:$0xff] %vm47_vm0, %v1433_v0  ;;  %73 = vst.msk [vmem:[#allocation2 + $0xc8] sm:$0xff] %vm47_vm0, %v1433_v0  ;;  %v157_v25 = vld [vmem:[%s2201_s0 + $0x58] sm:$0xff]  ;;  %v158_v27 = vld [vmem:[%s2201_s0 + $0x60] sm:$0xff] }
  0x2a   :  { %74 = vst.msk [vmem:[#allocation2 + $0xd0] sm:$0xff] %vm47_vm0, %v1433_v0  ;;  %75 = vst.msk [vmem:[#allocation2 + $0xd8] sm:$0xff] %vm47_vm0, %v1433_v0  ;;  %1233 = vmatmul.mubr.msk.f32.gmra.mxu0 %vm197_vm2, %v148_v7  ;;  %1308 = vmatmul.mubr.msk.f32.gmra.mxu1 %vm197_vm2, %v173_v8  ;;  %v183_v28 = vld [vmem:[%s2201_s0 + $0x128] sm:$0xff]  ;;  %v184_v30 = vld [vmem:[%s2201_s0 + $0x130] sm:$0xff] }
  0x2b   :  { %76 = vst.msk [vmem:[#allocation2 + $0xe0] sm:$0xff] %vm47_vm0, %v1433_v0  ;;  %77 = vst.msk [vmem:[#allocation2 + $0xe8] sm:$0xff] %vm47_vm0, %v1433_v0  ;;  %1235 = vmatprep.mubr.msk.f32.mxu0 %vm1434_vm1, %v1433_v0  ;;  %1310 = vmatprep.mubr.msk.f32.mxu1 %vm1434_vm1, %v1433_v0  ;;  %v159_v29 = vld [vmem:[%s2201_s0 + $0x68] sm:$0xff]  ;;  %v160_v31 = vld [vmem:[%s2201_s0 + $0x70] sm:$0xff] }
  0x2c   :  { %78 = vst.msk [vmem:[#allocation2 + $0xf0] sm:$0xff] %vm47_vm0, %v1433_v0  ;;  %79 = vst.msk [vmem:[#allocation2 + $0xf8] sm:$0xff] %vm47_vm0, %v1433_v0  ;;  %v185_v32 = vld [vmem:[%s2201_s0 + $0x138] sm:$0xff]  ;;  %v186_v34 = vld [vmem:[%s2201_s0 + $0x140] sm:$0xff] }
  0x2d   :  { %80 = vst.msk [vmem:[#allocation2 + $0x100] sm:$0xff] %vm47_vm0, %v1433_v0  ;;  %81 = vst.msk [vmem:[#allocation2 + $0x108] sm:$0xff] %vm47_vm0, %v1433_v0  ;;  %v161_v33 = vld [vmem:[%s2201_s0 + $0x78] sm:$0xff]  ;;  %v162_v35 = vld [vmem:[%s2201_s0 + $0x80] sm:$0xff] }
  0x2e   :  { %82 = vst.msk [vmem:[#allocation2 + $0x110] sm:$0xff] %vm47_vm0, %v1433_v0  ;;  %83 = vst.msk [vmem:[#allocation2 + $0x118] sm:$0xff] %vm47_vm0, %v1433_v0  ;;  %1236 = vmatmul.mubr.msk.f32.gmra.mxu0 %vm197_vm2, %v149_v9  ;;  %1311 = vmatmul.mubr.msk.f32.gmra.mxu1 %vm197_vm2, %v174_v10  ;;  %v187_v36 = vld [vmem:[%s2201_s0 + $0x148] sm:$0xff]  ;;  %v188_v38 = vld [vmem:[%s2201_s0 + $0x150] sm:$0xff] }
  0x2f   :  { %84 = vst.msk [vmem:[#allocation2 + $0x120] sm:$0xff] %vm47_vm0, %v1433_v0  ;;  %85 = vst.msk [vmem:[#allocation2 + $0x128] sm:$0xff] %vm47_vm0, %v1433_v0  ;;  %1238 = vmatprep.mubr.msk.f32.mxu0 %vm1434_vm1, %v1433_v0  ;;  %1313 = vmatprep.mubr.msk.f32.mxu1 %vm1434_vm1, %v1433_v0  ;;  %v163_v37 = vld [vmem:[%s2201_s0 + $0x88] sm:$0xff]  ;;  %v164_v39 = vld [vmem:[%s2201_s0 + $0x90] sm:$0xff] }
  0x30   :  { %86 = vst.msk [vmem:[#allocation2 + $0x130] sm:$0xff] %vm47_vm0, %v1433_v0  ;;  %87 = vst.msk [vmem:[#allocation2 + $0x138] sm:$0xff] %vm47_vm0, %v1433_v0  ;;  %v189_v40 = vld [vmem:[%s2201_s0 + $0x158] sm:$0xff]  ;;  %v190_v42 = vld [vmem:[%s2201_s0 + $0x160] sm:$0xff] }
  0x31   :  { %88 = vst.msk [vmem:[#allocation2 + $0x140] sm:$0xff] %vm47_vm0, %v1433_v0  ;;  %89 = vst.msk [vmem:[#allocation2 + $0x148] sm:$0xff] %vm47_vm0, %v1433_v0  ;;  %v165_v41 = vld [vmem:[%s2201_s0 + $0x98] sm:$0xff]  ;;  %v166_v43 = vld [vmem:[%s2201_s0 + $0xa0] sm:$0xff] }
  0x32   :  { %90 = vst.msk [vmem:[#allocation2 + $0x150] sm:$0xff] %vm47_vm0, %v1433_v0  ;;  %91 = vst.msk [vmem:[#allocation2 + $0x158] sm:$0xff] %vm47_vm0, %v1433_v0  ;;  %1239 = vmatmul.mubr.msk.f32.gmra.mxu0 %vm197_vm2, %v150_v11  ;;  %1314 = vmatmul.mubr.msk.f32.gmra.mxu1 %vm197_vm2, %v175_v12  ;;  %v191_v44 = vld [vmem:[%s2201_s0 + $0x168] sm:$0xff]  ;;  %v192_v46 = vld [vmem:[%s2201_s0 + $0x170] sm:$0xff] }
  0x33   :  { %92 = vst.msk [vmem:[#allocation2 + $0x160] sm:$0xff] %vm47_vm0, %v1433_v0  ;;  %93 = vst.msk [vmem:[#allocation2 + $0x168] sm:$0xff] %vm47_vm0, %v1433_v0  ;;  %1241 = vmatprep.mubr.msk.f32.mxu0 %vm1434_vm1, %v1433_v0  ;;  %1316 = vmatprep.mubr.msk.f32.mxu1 %vm1434_vm1, %v1433_v0  ;;  %v167_v45 = vld [vmem:[%s2201_s0 + $0xa8] sm:$0xff]  ;;  %v168_v47 = vld [vmem:[%s2201_s0 + $0xb0] sm:$0xff] }
  0x34   :  { %94 = vst.msk [vmem:[#allocation2 + $0x170] sm:$0xff] %vm47_vm0, %v1433_v0  ;;  %95 = vst.msk [vmem:[#allocation2 + $0x178] sm:$0xff] %vm47_vm0, %v1433_v0  ;;  %v193_v48 = vld [vmem:[%s2201_s0 + $0x178] sm:$0xff]  ;;  %v194_v50 = vld [vmem:[%s2201_s0 + $0x180] sm:$0xff] }
  0x35   :  { %96 = vst.msk [vmem:[#allocation2 + $0x180] sm:$0xff] %vm47_vm0, %v1433_v0  ;;  %v169_v49 = vld [vmem:[%s2201_s0 + $0xb8] sm:$0xff]  ;;  %v170_v51 = vld [vmem:[%s2201_s0 + $0xc0] sm:$0xff]  ;;  %v122_v53 = vld [vmem:[#allocation2 + $0xc8] sm:$0xff] }
  0x36   :  { %1242 = vmatmul.mubr.msk.f32.gmra.mxu0 %vm197_vm2, %v151_v13  ;;  %1317 = vmatmul.mubr.msk.f32.gmra.mxu1 %vm197_vm2, %v176_v14  ;;  %v97_v52 = vld [vmem:[#allocation2] sm:$0xff]  ;;  %v98_v59 = vld [vmem:[#allocation2 + $0x8] sm:$0xff]  ;;  %v123_v61 = vld [vmem:[#allocation2 + $0xd0] sm:$0xff] }
  0x37   :  { %1244 = vmatprep.mubr.msk.f32.mxu0 %vm1434_vm1, %v1433_v0  ;;  %1319 = vmatprep.mubr.msk.f32.mxu1 %vm1434_vm1, %v1433_v0  ;;  %v99_v3 = vld [vmem:[#allocation2 + $0x10] sm:$0xff]  ;;  %v124_v5 = vld [vmem:[#allocation2 + $0xd8] sm:$0xff]  ;;  %v1869_v6 = vld [vmem:[%s2203_s2] ss:$0 sm:$0xff] }
  0x38   :  { %v1871_v9 = vld [vmem:[#allocation5] ss:$0 sm:$0xff] }
  0x39   :  { %v100_v12 = vld [vmem:[#allocation2 + $0x18] sm:$0xff] }
  0x3a   :  { %1245 = vmatmul.mubr.msk.f32.gmra.mxu0 %vm197_vm2, %v152_v15  ;;  %1320 = vmatmul.mubr.msk.f32.gmra.mxu1 %vm197_vm2, %v177_v16 }
  0x3b   :  { %1247 = vmatprep.mubr.msk.f32.mxu0 %vm1434_vm1, %v1433_v0  ;;  %1322 = vmatprep.mubr.msk.f32.mxu1 %vm1434_vm1, %v1433_v0 }
  0x3e   :  { %1248 = vmatmul.mubr.msk.f32.gmra.mxu0 %vm197_vm2, %v153_v17  ;;  %1323 = vmatmul.mubr.msk.f32.gmra.mxu1 %vm197_vm2, %v178_v18  ;;  %v125_v17 = vld [vmem:[#allocation2 + $0xe0] sm:$0xff] }
  0x3f   :  { %1250 = vmatprep.mubr.msk.f32.mxu0 %vm1434_vm1, %v1433_v0  ;;  %1325 = vmatprep.mubr.msk.f32.mxu1 %vm1434_vm1, %v1433_v0 }
  0x42   :  { %1251 = vmatmul.mubr.msk.f32.gmra.mxu0 %vm197_vm2, %v154_v19  ;;  %1326 = vmatmul.mubr.msk.f32.gmra.mxu1 %vm197_vm2, %v179_v20 }
  0x43   :  { %1253 = vmatprep.mubr.msk.f32.mxu0 %vm1434_vm1, %v1433_v0  ;;  %1328 = vmatprep.mubr.msk.f32.mxu1 %vm1434_vm1, %v1433_v0 }
  0x46   :  { %1254 = vmatmul.mubr.msk.f32.gmra.mxu0 %vm197_vm2, %v155_v21  ;;  %1329 = vmatmul.mubr.msk.f32.gmra.mxu1 %vm197_vm2, %v180_v22 }
  0x47   :  { %1256 = vmatprep.mubr.msk.f32.mxu0 %vm1434_vm1, %v1433_v0  ;;  %1331 = vmatprep.mubr.msk.f32.mxu1 %vm1434_vm1, %v1433_v0 }
  0x4a   :  { %1257 = vmatmul.mubr.msk.f32.gmra.mxu0 %vm197_vm2, %v156_v23  ;;  %1332 = vmatmul.mubr.msk.f32.gmra.mxu1 %vm197_vm2, %v181_v24 }
  0x4b   :  { %1259 = vmatprep.mubr.msk.f32.mxu0 %vm1434_vm1, %v1433_v0  ;;  %1334 = vmatprep.mubr.msk.f32.mxu1 %vm1434_vm1, %v1433_v0 }
  0x4e   :  { %1260 = vmatmul.mubr.msk.f32.gmra.mxu0 %vm197_vm2, %v157_v25  ;;  %1335 = vmatmul.mubr.msk.f32.gmra.mxu1 %vm197_vm2, %v182_v26  ;;  %v101_v26 = vld [vmem:[#allocation2 + $0x20] sm:$0xff] }
  0x4f   :  { %1262 = vmatprep.mubr.msk.f32.mxu0 %vm1434_vm1, %v1433_v0  ;;  %1337 = vmatprep.mubr.msk.f32.mxu1 %vm1434_vm1, %v1433_v0 }
  0x52   :  { %1263 = vmatmul.mubr.msk.f32.gmra.mxu0 %vm197_vm2, %v158_v27  ;;  %1338 = vmatmul.mubr.msk.f32.gmra.mxu1 %vm197_vm2, %v183_v28 }
  0x53   :  { %1265 = vmatprep.mubr.msk.f32.mxu0 %vm1434_vm1, %v1433_v0  ;;  %1340 = vmatprep.mubr.msk.f32.mxu1 %vm1434_vm1, %v1433_v0 }
  0x56   :  { %1266 = vmatmul.mubr.msk.f32.gmra.mxu0 %vm197_vm2, %v159_v29  ;;  %1341 = vmatmul.mubr.msk.f32.gmra.mxu1 %vm197_vm2, %v184_v30 }
  0x57   :  { %1268 = vmatprep.mubr.msk.f32.mxu0 %vm1434_vm1, %v1433_v0  ;;  %1343 = vmatprep.mubr.msk.f32.mxu1 %vm1434_vm1, %v1433_v0 }
  0x5a   :  { %1269 = vmatmul.mubr.msk.f32.gmra.mxu0 %vm197_vm2, %v160_v31  ;;  %1344 = vmatmul.mubr.msk.f32.gmra.mxu1 %vm197_vm2, %v185_v32  ;;  %v126_v31 = vld [vmem:[#allocation2 + $0xe8] sm:$0xff] }
  0x5b   :  { %1271 = vmatprep.mubr.msk.f32.mxu0 %vm1434_vm1, %v1433_v0  ;;  %1346 = vmatprep.mubr.msk.f32.mxu1 %vm1434_vm1, %v1433_v0 }
  0x5e   :  { %1272 = vmatmul.mubr.msk.f32.gmra.mxu0 %vm197_vm2, %v161_v33  ;;  %1347 = vmatmul.mubr.msk.f32.gmra.mxu1 %vm197_vm2, %v186_v34 }
  0x5f   :  { %1274 = vmatprep.mubr.msk.f32.mxu0 %vm1434_vm1, %v1433_v0  ;;  %1349 = vmatprep.mubr.msk.f32.mxu1 %vm1434_vm1, %v1433_v0 }
  0x62   :  { %1275 = vmatmul.mubr.msk.f32.gmra.mxu0 %vm197_vm2, %v162_v35  ;;  %1350 = vmatmul.mubr.msk.f32.gmra.mxu1 %vm197_vm2, %v187_v36 }
  0x63   :  { %1277 = vmatprep.mubr.msk.f32.mxu0 %vm1434_vm1, %v1433_v0  ;;  %1352 = vmatprep.mubr.msk.f32.mxu1 %vm1434_vm1, %v1433_v0 }
  0x66   :  { %1278 = vmatmul.mubr.msk.f32.gmra.mxu0 %vm197_vm2, %v163_v37  ;;  %1353 = vmatmul.mubr.msk.f32.gmra.mxu1 %vm197_vm2, %v188_v38 }
  0x67   :  { %1280 = vmatprep.mubr.msk.f32.mxu0 %vm1434_vm1, %v1433_v0  ;;  %1355 = vmatprep.mubr.msk.f32.mxu1 %vm1434_vm1, %v1433_v0 }
  0x6a   :  { %1281 = vmatmul.mubr.msk.f32.gmra.mxu0 %vm197_vm2, %v164_v39  ;;  %1356 = vmatmul.mubr.msk.f32.gmra.mxu1 %vm197_vm2, %v189_v40 }
  0x6b   :  { %1283 = vmatprep.mubr.msk.f32.mxu0 %vm1434_vm1, %v1433_v0  ;;  %1358 = vmatprep.mubr.msk.f32.mxu1 %vm1434_vm1, %v1433_v0 }
  0x6e   :  { %1284 = vmatmul.mubr.msk.f32.gmra.mxu0 %vm197_vm2, %v165_v41  ;;  %1359 = vmatmul.mubr.msk.f32.gmra.mxu1 %vm197_vm2, %v190_v42  ;;  %v102_v42 = vld [vmem:[#allocation2 + $0x28] sm:$0xff] }
  0x6f   :  { %1286 = vmatprep.mubr.msk.f32.mxu0 %vm1434_vm1, %v1433_v0  ;;  %1361 = vmatprep.mubr.msk.f32.mxu1 %vm1434_vm1, %v1433_v0 }
  0x72   :  { %1287 = vmatmul.mubr.msk.f32.gmra.mxu0 %vm197_vm2, %v166_v43  ;;  %1362 = vmatmul.mubr.msk.f32.gmra.mxu1 %vm197_vm2, %v191_v44 }
  0x73   :  { %1289 = vmatprep.mubr.msk.f32.mxu0 %vm1434_vm1, %v1433_v0  ;;  %1364 = vmatprep.mubr.msk.f32.mxu1 %vm1434_vm1, %v1433_v0 }
  0x76   :  { %1290 = vmatmul.mubr.msk.f32.gmra.mxu0 %vm197_vm2, %v167_v45  ;;  %1365 = vmatmul.mubr.msk.f32.gmra.mxu1 %vm197_vm2, %v192_v46 }
  0x77   :  { %1292 = vmatprep.mubr.msk.f32.mxu0 %vm1434_vm1, %v1433_v0  ;;  %1367 = vmatprep.mubr.msk.f32.mxu1 %vm1434_vm1, %v1433_v0 }
  0x7a   :  { %1293 = vmatmul.mubr.msk.f32.gmra.mxu0 %vm197_vm2, %v168_v47  ;;  %1368 = vmatmul.mubr.msk.f32.gmra.mxu1 %vm197_vm2, %v193_v48 }
  0x7b   :  { %1295 = vmatprep.mubr.msk.f32.mxu0 %vm1434_vm1, %v1433_v0  ;;  %1370 = vmatprep.mubr.msk.f32.mxu1 %vm1434_vm1, %v1433_v0 }
  0x7e   :  { %1296 = vmatmul.mubr.msk.f32.gmra.mxu0 %vm197_vm2, %v169_v49  ;;  %1371 = vmatmul.mubr.msk.f32.gmra.mxu1 %vm197_vm2, %v194_v50  ;;  %v127_v49 = vld [vmem:[#allocation2 + $0xf0] sm:$0xff] }
  0x7f   :  { %1298 = vmatprep.mubr.msk.f32.mxu0 %vm1434_vm1, %v1433_v0 }
  0x82   :  { %1299 = vmatmul.mubr.msk.f32.gmra.mxu0 %vm197_vm2, %v170_v51 }
  0xe2   :  { %v411_v54 = vpop.f32.mrf.mxu0  ;;  %v536_v55 = vpop.f32.mrf.mxu1 }
  0xe3   :  { %v655_v56 = vadd.f32 %v411_v54, %v97_v52  ;;  %v680_v57 = vadd.f32 %v536_v55, %v122_v53 }
  0xe4   :  { %v1228_v58 = vpop.f32.mrf.mxu0  ;;  %v1303_v60 = vpop.f32.mrf.mxu1 }
  0xe5   :  { %705 = vst.msk [vmem:[#allocation2] sm:$0xff] %vm47_vm0, %v655_v56  ;;  %730 = vst.msk [vmem:[#allocation2 + $0xc8] sm:$0xff] %vm47_vm0, %v680_v57  ;;  %v103_v60 = vld [vmem:[#allocation2 + $0x30] sm:$0xff] }
  0xe6   :  { %v416_v62 = vpop.f32.mrf.mxu0  ;;  %v541_v63 = vpop.f32.mrf.mxu1 }
  0xe7   :  { %v656_v0 = vadd.f32 %v416_v62, %v98_v59  ;;  %v681_v1 = vadd.f32 %v541_v63, %v123_v61 }
  0xe8   :  { %v1231_v2 = vpop.f32.mrf.mxu0  ;;  %v1306_v4 = vpop.f32.mrf.mxu1 }
  0xe9   :  { %706 = vst.msk [vmem:[#allocation2 + $0x8] sm:$0xff] %vm47_vm0, %v656_v0  ;;  %731 = vst.msk [vmem:[#allocation2 + $0xd0] sm:$0xff] %vm47_vm0, %v681_v1 }
  0xea   :  { %v421_v7 = vpop.f32.mrf.mxu0  ;;  %v546_v8 = vpop.f32.mrf.mxu1 }
  0xeb   :  { %v657_v10 = vadd.f32 %v421_v7, %v99_v3  ;;  %v682_v11 = vadd.f32 %v546_v8, %v124_v5  ;;  %v128_v3 = vld [vmem:[#allocation2 + $0xf8] sm:$0xff] }
  0xec   :  { %v757_v13 = vld [vmem:[#allocation2] sm:$0xff]  ;;  %v782_v14 = vld [vmem:[#allocation2 + $0xc8] sm:$0xff]  ;;  %v1234_v15 = vpop.f32.mrf.mxu0  ;;  %v1309_v16 = vpop.f32.mrf.mxu1 }
  0xed   :  { %v813_v18 = vmul.f32 %v1869_v6, %v757_v13  ;;  %v838_v19 = vmul.f32 %v1869_v6, %v782_v14  ;;  %707 = vst.msk [vmem:[#allocation2 + $0x10] sm:$0xff] %vm47_vm0, %v657_v10  ;;  %732 = vst.msk [vmem:[#allocation2 + $0xd8] sm:$0xff] %vm47_vm0, %v682_v11  ;;  %v104_v16 = vld [vmem:[#allocation2 + $0x38] sm:$0xff] }
  0xee   :  { %v426_v20 = vpop.f32.mrf.mxu0  ;;  %v551_v21 = vpop.f32.mrf.mxu1 }
  0xef   :  { %v869_v22 = vadd.f32 %v1871_v9, %v813_v18  ;;  %v894_v23 = vadd.f32 %v1871_v9, %v838_v19  ;;  %v658_v24 = vadd.f32 %v426_v20, %v100_v12  ;;  %v683_v25 = vadd.f32 %v551_v21, %v125_v17 }
  0xf0   :  { %v758_v27 = vld [vmem:[#allocation2 + $0x8] sm:$0xff]  ;;  %v783_v28 = vld [vmem:[#allocation2 + $0xd0] sm:$0xff]  ;;  %v1237_v29 = vpop.f32.mrf.mxu0  ;;  %v1312_v30 = vpop.f32.mrf.mxu1 }
  0xf1   :  { %vm918_vm3 = vcmp.ge.f32.partialorder %v869_v22, 0.0  ;;  %v967_v32 = vmul.f32 0.2, %v869_v22  ;;  %vm943_vm4 = vcmp.ge.f32.partialorder %v894_v23, 0.0  ;;  %v992_v33 = vmul.f32 0.2, %v894_v23 }
  0xf2   :  { %708 = vst.msk [vmem:[#allocation2 + $0x18] sm:$0xff] %vm47_vm0, %v658_v24  ;;  %733 = vst.msk [vmem:[#allocation2 + $0xe0] sm:$0xff] %vm47_vm0, %v683_v25  ;;  %v814_v34 = vmul.f32 %v1869_v6, %v758_v27  ;;  %v839_v35 = vmul.f32 %v1869_v6, %v783_v28  ;;  %v431_v36 = vpop.f32.mrf.mxu0  ;;  %v556_v37 = vpop.f32.mrf.mxu1 }
  0xf3   :  { %v1016_v38 = vsel %vm918_vm3, %v869_v22, %v967_v32  ;;  %v1041_v39 = vsel %vm943_vm4, %v894_v23, %v992_v33  ;;  %v659_v40 = vadd.f32 %v431_v36, %v101_v26  ;;  %v684_v41 = vadd.f32 %v556_v37, %v126_v31  ;;  %v129_v23 = vld [vmem:[#allocation2 + $0x100] sm:$0xff] }
  0xf4   :  { %1065 = vst.msk [vmem:[%s2205_s4] sm:$0xff] %vm47_vm0, %v1016_v38  ;;  %1090 = vst.msk [vmem:[%s2205_s4 + $0xc8] sm:$0xff] %vm47_vm0, %v1041_v39  ;;  %v870_v43 = vadd.f32 %v1871_v9, %v814_v34  ;;  %v895_v44 = vadd.f32 %v1871_v9, %v839_v35  ;;  %v759_v45 = vld [vmem:[#allocation2 + $0x10] sm:$0xff]  ;;  %v784_v46 = vld [vmem:[#allocation2 + $0xd8] sm:$0xff]  ;;  %v1240_v47 = vpop.f32.mrf.mxu0  ;;  %v1315_v48 = vpop.f32.mrf.mxu1 }
  0xf5   :  { %v815_v50 = vmul.f32 %v1869_v6, %v759_v45  ;;  %v840_v51 = vmul.f32 %v1869_v6, %v784_v46  ;;  %709 = vst.msk [vmem:[#allocation2 + $0x20] sm:$0xff] %vm47_vm0, %v659_v40  ;;  %734 = vst.msk [vmem:[#allocation2 + $0xe8] sm:$0xff] %vm47_vm0, %v684_v41  ;;  %v105_v34 = vld [vmem:[#allocation2 + $0x40] sm:$0xff]  ;;  %v130_v41 = vld [vmem:[#allocation2 + $0x108] sm:$0xff] }
  0xf6   :  { %vm919_vm5 = vcmp.ge.f32.partialorder %v870_v43, 0.0  ;;  %v968_v52 = vmul.f32 0.2, %v870_v43  ;;  %vm944_vm6 = vcmp.ge.f32.partialorder %v895_v44, 0.0  ;;  %v993_v53 = vmul.f32 0.2, %v895_v44  ;;  %v436_v54 = vpop.f32.mrf.mxu0  ;;  %v561_v55 = vpop.f32.mrf.mxu1 }
  0xf7   :  { %v871_v56 = vadd.f32 %v1871_v9, %v815_v50  ;;  %v896_v57 = vadd.f32 %v1871_v9, %v840_v51  ;;  %v660_v58 = vadd.f32 %v436_v54, %v102_v42  ;;  %v685_v59 = vadd.f32 %v561_v55, %v127_v49 }
  0xf8   :  { %v1017_v61 = vsel %vm919_vm5, %v870_v43, %v968_v52  ;;  %v1042_v62 = vsel %vm944_vm6, %v895_v44, %v993_v53  ;;  %v1243_v1 = vpop.f32.mrf.mxu0  ;;  %v1318_v2 = vpop.f32.mrf.mxu1  ;;  %v106_v52 = vld [vmem:[#allocation2 + $0x48] sm:$0xff] }
  0xf9   :  { %v760_v63 = vld [vmem:[#allocation2 + $0x18] sm:$0xff]  ;;  %v785_v0 = vld [vmem:[#allocation2 + $0xe0] sm:$0xff]  ;;  %1066 = vst.msk [vmem:[%s2205_s4 + $0x8] sm:$0xff] %vm47_vm0, %v1017_v61  ;;  %1091 = vst.msk [vmem:[%s2205_s4 + $0xd0] sm:$0xff] %vm47_vm0, %v1042_v62  ;;  %vm920_vm7 = vcmp.ge.f32.partialorder %v871_v56, 0.0  ;;  %vm945_vm8 = vcmp.ge.f32.partialorder %v896_v57, 0.0 }
  0xfa   :  { %v969_v4 = vmul.f32 0.2, %v871_v56  ;;  %v994_v5 = vmul.f32 0.2, %v896_v57  ;;  %710 = vst.msk [vmem:[#allocation2 + $0x28] sm:$0xff] %vm47_vm0, %v660_v58  ;;  %735 = vst.msk [vmem:[#allocation2 + $0xf0] sm:$0xff] %vm47_vm0, %v685_v59  ;;  %v816_v7 = vmul.f32 %v1869_v6, %v760_v63  ;;  %v841_v8 = vmul.f32 %v1869_v6, %v785_v0  ;;  %v441_v10 = vpop.f32.mrf.mxu0  ;;  %v566_v11 = vpop.f32.mrf.mxu1 }
  0xfb   :  { %v661_v14 = vadd.f32 %v441_v10, %v103_v60  ;;  %v686_v15 = vadd.f32 %v566_v11, %v128_v3  ;;  %v131_v59 = vld [vmem:[#allocation2 + $0x110] sm:$0xff] }
  0xfc   :  { %v1018_v12 = vsel %vm920_vm7, %v871_v56, %v969_v4  ;;  %v1043_v13 = vsel %vm945_vm8, %v896_v57, %v994_v5  ;;  %v872_v17 = vadd.f32 %v1871_v9, %v816_v7  ;;  %v897_v18 = vadd.f32 %v1871_v9, %v841_v8  ;;  %v761_v19 = vld [vmem:[#allocation2 + $0x20] sm:$0xff]  ;;  %v786_v20 = vld [vmem:[#allocation2 + $0xe8] sm:$0xff]  ;;  %v1246_v21 = vpop.f32.mrf.mxu0  ;;  %v1321_v22 = vpop.f32.mrf.mxu1  ;;  %v107_v7 = vld [vmem:[#allocation2 + $0x50] sm:$0xff] }
  0xfd   :  { %1067 = vst.msk [vmem:[%s2205_s4 + $0x10] sm:$0xff] %vm47_vm0, %v1018_v12  ;;  %1092 = vst.msk [vmem:[%s2205_s4 + $0xd8] sm:$0xff] %vm47_vm0, %v1043_v13  ;;  %v817_v24 = vmul.f32 %v1869_v6, %v761_v19  ;;  %v842_v25 = vmul.f32 %v1869_v6, %v786_v20 }
  0xfe   :  { %711 = vst.msk [vmem:[#allocation2 + $0x30] sm:$0xff] %vm47_vm0, %v661_v14  ;;  %736 = vst.msk [vmem:[#allocation2 + $0xf8] sm:$0xff] %vm47_vm0, %v686_v15  ;;  %vm921_vm9 = vcmp.ge.f32.partialorder %v872_v17, 0.0  ;;  %v970_v26 = vmul.f32 0.2, %v872_v17  ;;  %vm946_vm10 = vcmp.ge.f32.partialorder %v897_v18, 0.0  ;;  %v446_v28 = vpop.f32.mrf.mxu0  ;;  %v571_v29 = vpop.f32.mrf.mxu1 }
  0xff   :  { %v995_v27 = vmul.f32 0.2, %v897_v18  ;;  %v873_v30 = vadd.f32 %v1871_v9, %v817_v24  ;;  %v898_v31 = vadd.f32 %v1871_v9, %v842_v25  ;;  %v662_v32 = vadd.f32 %v446_v28, %v104_v16  ;;  %v132_v15 = vld [vmem:[#allocation2 + $0x118] sm:$0xff] }
 0x100   :  { %v687_v33 = vadd.f32 %v571_v29, %v129_v23  ;;  %v1019_v35 = vsel %vm921_vm9, %v872_v17, %v970_v26  ;;  %v1249_v39 = vpop.f32.mrf.mxu0  ;;  %v1324_v40 = vpop.f32.mrf.mxu1  ;;  %v108_v26 = vld [vmem:[#allocation2 + $0x58] sm:$0xff] }
 0x101   :  { %v1044_v36 = vsel %vm946_vm10, %v897_v18, %v995_v27  ;;  %v762_v37 = vld [vmem:[#allocation2 + $0x28] sm:$0xff]  ;;  %v787_v38 = vld [vmem:[#allocation2 + $0xf0] sm:$0xff]  ;;  %1068 = vst.msk [vmem:[%s2205_s4 + $0x18] sm:$0xff] %vm47_vm0, %v1019_v35  ;;  %vm922_vm11 = vcmp.ge.f32.partialorder %v873_v30, 0.0  ;;  %v971_v42 = vmul.f32 0.2, %v873_v30 }
 0x102   :  { %1093 = vst.msk [vmem:[%s2205_s4 + $0xe0] sm:$0xff] %vm47_vm0, %v1044_v36  ;;  %vm947_vm12 = vcmp.ge.f32.partialorder %v898_v31, 0.0  ;;  %v996_v43 = vmul.f32 0.2, %v898_v31  ;;  %712 = vst.msk [vmem:[#allocation2 + $0x38] sm:$0xff] %vm47_vm0, %v662_v32  ;;  %v818_v44 = vmul.f32 %v1869_v6, %v762_v37  ;;  %v843_v45 = vmul.f32 %v1869_v6, %v787_v38  ;;  %v451_v46 = vpop.f32.mrf.mxu0  ;;  %v576_v47 = vpop.f32.mrf.mxu1 }
 0x103   :  { %737 = vst.msk [vmem:[#allocation2 + $0x100] sm:$0xff] %vm47_vm0, %v687_v33  ;;  %v1020_v48 = vsel %vm922_vm11, %v873_v30, %v971_v42  ;;  %v663_v50 = vadd.f32 %v451_v46, %v105_v34  ;;  %v688_v51 = vadd.f32 %v576_v47, %v130_v41  ;;  %v133_v33 = vld [vmem:[#allocation2 + $0x120] sm:$0xff] }
 0x104   :  { %v1045_v49 = vsel %vm947_vm12, %v898_v31, %v996_v43  ;;  %1069 = vst.msk [vmem:[%s2205_s4 + $0x20] sm:$0xff] %vm47_vm0, %v1020_v48  ;;  %v874_v53 = vadd.f32 %v1871_v9, %v818_v44  ;;  %v899_v54 = vadd.f32 %v1871_v9, %v843_v45  ;;  %v1252_v57 = vpop.f32.mrf.mxu0  ;;  %v1327_v58 = vpop.f32.mrf.mxu1  ;;  %v109_v44 = vld [vmem:[#allocation2 + $0x60] sm:$0xff] }
 0x105   :  { %1094 = vst.msk [vmem:[%s2205_s4 + $0xe8] sm:$0xff] %vm47_vm0, %v1045_v49  ;;  %v763_v55 = vld [vmem:[#allocation2 + $0x30] sm:$0xff]  ;;  %v788_v56 = vld [vmem:[#allocation2 + $0xf8] sm:$0xff]  ;;  %713 = vst.msk [vmem:[#allocation2 + $0x40] sm:$0xff] %vm47_vm0, %v663_v50 }
 0x106   :  { %v819_v60 = vmul.f32 %v1869_v6, %v763_v55  ;;  %v844_v61 = vmul.f32 %v1869_v6, %v788_v56  ;;  %738 = vst.msk [vmem:[#allocation2 + $0x108] sm:$0xff] %vm47_vm0, %v688_v51  ;;  %vm923_vm13 = vcmp.ge.f32.partialorder %v874_v53, 0.0  ;;  %v972_v62 = vmul.f32 0.2, %v874_v53  ;;  %v456_v0 = vpop.f32.mrf.mxu0  ;;  %v581_v1 = vpop.f32.mrf.mxu1  ;;  %v134_v51 = vld [vmem:[#allocation2 + $0x128] sm:$0xff] }
 0x107   :  { %vm948_vm14 = vcmp.ge.f32.partialorder %v899_v54, 0.0  ;;  %v997_v63 = vmul.f32 0.2, %v899_v54  ;;  %v664_v4 = vadd.f32 %v456_v0, %v106_v52  ;;  %v689_v5 = vadd.f32 %v581_v1, %v131_v59 }
 0x108   :  { %v875_v2 = vadd.f32 %v1871_v9, %v819_v60  ;;  %v900_v3 = vadd.f32 %v1871_v9, %v844_v61  ;;  %v1021_v8 = vsel %vm923_vm13, %v874_v53, %v972_v62  ;;  %v1255_v13 = vpop.f32.mrf.mxu0  ;;  %v1330_v14 = vpop.f32.mrf.mxu1  ;;  %v110_v62 = vld [vmem:[#allocation2 + $0x68] sm:$0xff] }
 0x109   :  { %v1046_v10 = vsel %vm948_vm14, %v899_v54, %v997_v63  ;;  %v764_v11 = vld [vmem:[#allocation2 + $0x38] sm:$0xff]  ;;  %1070 = vst.msk [vmem:[%s2205_s4 + $0x28] sm:$0xff] %vm47_vm0, %v1021_v8  ;;  %714 = vst.msk [vmem:[#allocation2 + $0x48] sm:$0xff] %vm47_vm0, %v664_v4 }
 0x10a   :  { %v789_v12 = vld [vmem:[#allocation2 + $0x100] sm:$0xff]  ;;  %1095 = vst.msk [vmem:[%s2205_s4 + $0xf0] sm:$0xff] %vm47_vm0, %v1046_v10  ;;  %vm924_vm15 = vcmp.ge.f32.partialorder %v875_v2, 0.0  ;;  %v973_v16 = vmul.f32 0.2, %v875_v2  ;;  %vm949_vm1 = vcmp.ge.f32.partialorder %v900_v3, 0.0  ;;  %v820_v18 = vmul.f32 %v1869_v6, %v764_v11  ;;  %v461_v20 = vpop.f32.mrf.mxu0  ;;  %v586_v21 = vpop.f32.mrf.mxu1 }
 0x10b   :  { %v998_v17 = vmul.f32 0.2, %v900_v3  ;;  %739 = vst.msk [vmem:[#allocation2 + $0x110] sm:$0xff] %vm47_vm0, %v689_v5  ;;  %v845_v19 = vmul.f32 %v1869_v6, %v789_v12  ;;  %v665_v24 = vadd.f32 %v461_v20, %v107_v7  ;;  %v690_v25 = vadd.f32 %v586_v21, %v132_v15  ;;  %v135_v5 = vld [vmem:[#allocation2 + $0x130] sm:$0xff] }
 0x10c   :  { %v1022_v22 = vsel %vm924_vm15, %v875_v2, %v973_v16  ;;  %v876_v27 = vadd.f32 %v1871_v9, %v820_v18  ;;  %v765_v29 = vld [vmem:[#allocation2 + $0x40] sm:$0xff]  ;;  %v1258_v31 = vpop.f32.mrf.mxu0  ;;  %v1333_v32 = vpop.f32.mrf.mxu1  ;;  %v111_v18 = vld [vmem:[#allocation2 + $0x70] sm:$0xff] }
 0x10d   :  { %v1047_v23 = vsel %vm949_vm1, %v900_v3, %v998_v17  ;;  %1071 = vst.msk [vmem:[%s2205_s4 + $0x30] sm:$0xff] %vm47_vm0, %v1022_v22  ;;  %v901_v28 = vadd.f32 %v1871_v9, %v845_v19  ;;  %v790_v30 = vld [vmem:[#allocation2 + $0x108] sm:$0xff]  ;;  %v821_v34 = vmul.f32 %v1869_v6, %v765_v29  ;;  %715 = vst.msk [vmem:[#allocation2 + $0x50] sm:$0xff] %vm47_vm0, %v665_v24 }
 0x10e   :  { %1096 = vst.msk [vmem:[%s2205_s4 + $0xf8] sm:$0xff] %vm47_vm0, %v1047_v23  ;;  %v846_v35 = vmul.f32 %v1869_v6, %v790_v30  ;;  %740 = vst.msk [vmem:[#allocation2 + $0x118] sm:$0xff] %vm47_vm0, %v690_v25  ;;  %vm925_vm2 = vcmp.ge.f32.partialorder %v876_v27, 0.0  ;;  %v974_v36 = vmul.f32 0.2, %v876_v27  ;;  %v466_v38 = vpop.f32.mrf.mxu0  ;;  %v591_v39 = vpop.f32.mrf.mxu1  ;;  %v136_v25 = vld [vmem:[#allocation2 + $0x138] sm:$0xff] }
 0x10f   :  { %vm950_vm3 = vcmp.ge.f32.partialorder %v901_v28, 0.0  ;;  %v999_v37 = vmul.f32 0.2, %v901_v28  ;;  %v877_v40 = vadd.f32 %v1871_v9, %v821_v34  ;;  %v666_v42 = vadd.f32 %v466_v38, %v108_v26 }
 0x110   :  { %v902_v41 = vadd.f32 %v1871_v9, %v846_v35  ;;  %v691_v43 = vadd.f32 %v591_v39, %v133_v33  ;;  %v1023_v45 = vsel %vm925_vm2, %v876_v27, %v974_v36  ;;  %v766_v47 = vld [vmem:[#allocation2 + $0x48] sm:$0xff]  ;;  %v1261_v49 = vpop.f32.mrf.mxu0  ;;  %v1336_v50 = vpop.f32.mrf.mxu1  ;;  %v112_v36 = vld [vmem:[#allocation2 + $0x78] sm:$0xff] }
 0x111   :  { %v1048_v46 = vsel %vm950_vm3, %v901_v28, %v999_v37  ;;  %1072 = vst.msk [vmem:[%s2205_s4 + $0x38] sm:$0xff] %vm47_vm0, %v1023_v45  ;;  %vm926_vm4 = vcmp.ge.f32.partialorder %v877_v40, 0.0  ;;  %v975_v52 = vmul.f32 0.2, %v877_v40  ;;  %716 = vst.msk [vmem:[#allocation2 + $0x58] sm:$0xff] %vm47_vm0, %v666_v42  ;;  %v822_v54 = vmul.f32 %v1869_v6, %v766_v47 }
 0x112   :  { %v791_v48 = vld [vmem:[#allocation2 + $0x110] sm:$0xff]  ;;  %1097 = vst.msk [vmem:[%s2205_s4 + $0x100] sm:$0xff] %vm47_vm0, %v1048_v46  ;;  %vm951_vm5 = vcmp.ge.f32.partialorder %v902_v41, 0.0  ;;  %v1000_v53 = vmul.f32 0.2, %v902_v41  ;;  %741 = vst.msk [vmem:[#allocation2 + $0x120] sm:$0xff] %vm47_vm0, %v691_v43  ;;  %v471_v56 = vpop.f32.mrf.mxu0  ;;  %v596_v57 = vpop.f32.mrf.mxu1 }
 0x113   :  { %v847_v55 = vmul.f32 %v1869_v6, %v791_v48  ;;  %v1024_v58 = vsel %vm926_vm4, %v877_v40, %v975_v52  ;;  %v667_v60 = vadd.f32 %v471_v56, %v109_v44  ;;  %v692_v61 = vadd.f32 %v596_v57, %v134_v51  ;;  %v137_v43 = vld [vmem:[#allocation2 + $0x140] sm:$0xff] }
 0x114   :  { %v1049_v59 = vsel %vm951_vm5, %v902_v41, %v1000_v53  ;;  %1073 = vst.msk [vmem:[%s2205_s4 + $0x40] sm:$0xff] %vm47_vm0, %v1024_v58  ;;  %v878_v63 = vadd.f32 %v1871_v9, %v822_v54  ;;  %v767_v1 = vld [vmem:[#allocation2 + $0x50] sm:$0xff]  ;;  %v1264_v3 = vpop.f32.mrf.mxu0  ;;  %v1339_v4 = vpop.f32.mrf.mxu1  ;;  %v113_v54 = vld [vmem:[#allocation2 + $0x80] sm:$0xff] }
 0x115   :  { %1098 = vst.msk [vmem:[%s2205_s4 + $0x108] sm:$0xff] %vm47_vm0, %v1049_v59  ;;  %v903_v0 = vadd.f32 %v1871_v9, %v847_v55  ;;  %v792_v2 = vld [vmem:[#allocation2 + $0x118] sm:$0xff]  ;;  %v823_v7 = vmul.f32 %v1869_v6, %v767_v1  ;;  %717 = vst.msk [vmem:[#allocation2 + $0x60] sm:$0xff] %vm47_vm0, %v667_v60 }
 0x116   :  { %v848_v8 = vmul.f32 %v1869_v6, %v792_v2  ;;  %742 = vst.msk [vmem:[#allocation2 + $0x128] sm:$0xff] %vm47_vm0, %v692_v61  ;;  %vm927_vm6 = vcmp.ge.f32.partialorder %v878_v63, 0.0  ;;  %v976_v10 = vmul.f32 0.2, %v878_v63  ;;  %v476_v12 = vpop.f32.mrf.mxu0  ;;  %v601_v13 = vpop.f32.mrf.mxu1  ;;  %v138_v61 = vld [vmem:[#allocation2 + $0x148] sm:$0xff] }
 0x117   :  { %vm952_vm7 = vcmp.ge.f32.partialorder %v903_v0, 0.0  ;;  %v1001_v11 = vmul.f32 0.2, %v903_v0  ;;  %v879_v14 = vadd.f32 %v1871_v9, %v823_v7  ;;  %v668_v16 = vadd.f32 %v476_v12, %v110_v62 }
 0x118   :  { %v904_v15 = vadd.f32 %v1871_v9, %v848_v8  ;;  %v693_v17 = vadd.f32 %v601_v13, %v135_v5  ;;  %v1025_v19 = vsel %vm927_vm6, %v878_v63, %v976_v10  ;;  %v768_v21 = vld [vmem:[#allocation2 + $0x58] sm:$0xff]  ;;  %v1267_v23 = vpop.f32.mrf.mxu0  ;;  %v1342_v24 = vpop.f32.mrf.mxu1  ;;  %v114_v10 = vld [vmem:[#allocation2 + $0x88] sm:$0xff] }
 0x119   :  { %v1050_v20 = vsel %vm952_vm7, %v903_v0, %v1001_v11  ;;  %v793_v22 = vld [vmem:[#allocation2 + $0x120] sm:$0xff]  ;;  %1074 = vst.msk [vmem:[%s2205_s4 + $0x48] sm:$0xff] %vm47_vm0, %v1025_v19  ;;  %vm928_vm8 = vcmp.ge.f32.partialorder %v879_v14, 0.0  ;;  %v977_v26 = vmul.f32 0.2, %v879_v14  ;;  %718 = vst.msk [vmem:[#allocation2 + $0x68] sm:$0xff] %vm47_vm0, %v668_v16  ;;  %v824_v28 = vmul.f32 %v1869_v6, %v768_v21 }
 0x11a   :  { %1099 = vst.msk [vmem:[%s2205_s4 + $0x110] sm:$0xff] %vm47_vm0, %v1050_v20  ;;  %vm953_vm9 = vcmp.ge.f32.partialorder %v904_v15, 0.0  ;;  %v1002_v27 = vmul.f32 0.2, %v904_v15  ;;  %743 = vst.msk [vmem:[#allocation2 + $0x130] sm:$0xff] %vm47_vm0, %v693_v17  ;;  %v849_v29 = vmul.f32 %v1869_v6, %v793_v22  ;;  %v481_v30 = vpop.f32.mrf.mxu0  ;;  %v606_v31 = vpop.f32.mrf.mxu1  ;;  %v139_v17 = vld [vmem:[#allocation2 + $0x150] sm:$0xff] }
 0x11b   :  { %v1026_v32 = vsel %vm928_vm8, %v879_v14, %v977_v26  ;;  %v669_v34 = vadd.f32 %v481_v30, %v111_v18  ;;  %v694_v35 = vadd.f32 %v606_v31, %v136_v25  ;;  %v880_v37 = vadd.f32 %v1871_v9, %v824_v28  ;;  %v115_v28 = vld [vmem:[#allocation2 + $0x90] sm:$0xff] }
 0x11c   :  { %v1051_v33 = vsel %vm953_vm9, %v904_v15, %v1002_v27  ;;  %1075 = vst.msk [vmem:[%s2205_s4 + $0x50] sm:$0xff] %vm47_vm0, %v1026_v32  ;;  %v905_v38 = vadd.f32 %v1871_v9, %v849_v29  ;;  %v769_v39 = vld [vmem:[#allocation2 + $0x60] sm:$0xff]  ;;  %v1270_v41 = vpop.f32.mrf.mxu0  ;;  %v1345_v42 = vpop.f32.mrf.mxu1 }
 0x11d   :  { %1100 = vst.msk [vmem:[%s2205_s4 + $0x118] sm:$0xff] %vm47_vm0, %v1051_v33  ;;  %v794_v40 = vld [vmem:[#allocation2 + $0x128] sm:$0xff]  ;;  %v825_v44 = vmul.f32 %v1869_v6, %v769_v39  ;;  %719 = vst.msk [vmem:[#allocation2 + $0x70] sm:$0xff] %vm47_vm0, %v669_v34  ;;  %vm929_vm10 = vcmp.ge.f32.partialorder %v880_v37, 0.0  ;;  %v978_v46 = vmul.f32 0.2, %v880_v37 }
 0x11e   :  { %v850_v45 = vmul.f32 %v1869_v6, %v794_v40  ;;  %744 = vst.msk [vmem:[#allocation2 + $0x138] sm:$0xff] %vm47_vm0, %v694_v35  ;;  %vm954_vm11 = vcmp.ge.f32.partialorder %v905_v38, 0.0  ;;  %v1003_v47 = vmul.f32 0.2, %v905_v38  ;;  %v486_v48 = vpop.f32.mrf.mxu0  ;;  %v611_v49 = vpop.f32.mrf.mxu1  ;;  %v140_v35 = vld [vmem:[#allocation2 + $0x158] sm:$0xff] }
 0x11f   :  { %v881_v50 = vadd.f32 %v1871_v9, %v825_v44  ;;  %v670_v52 = vadd.f32 %v486_v48, %v112_v36  ;;  %v695_v53 = vadd.f32 %v611_v49, %v137_v43  ;;  %v1027_v55 = vsel %vm929_vm10, %v880_v37, %v978_v46  ;;  %v116_v46 = vld [vmem:[#allocation2 + $0x98] sm:$0xff] }
 0x120   :  { %v906_v51 = vadd.f32 %v1871_v9, %v850_v45  ;;  %v1052_v56 = vsel %vm954_vm11, %v905_v38, %v1003_v47  ;;  %v770_v57 = vld [vmem:[#allocation2 + $0x68] sm:$0xff]  ;;  %v1273_v59 = vpop.f32.mrf.mxu0  ;;  %v1348_v60 = vpop.f32.mrf.mxu1  ;;  %1076 = vst.msk [vmem:[%s2205_s4 + $0x58] sm:$0xff] %vm47_vm0, %v1027_v55 }
 0x121   :  { %v795_v58 = vld [vmem:[#allocation2 + $0x130] sm:$0xff]  ;;  %1101 = vst.msk [vmem:[%s2205_s4 + $0x120] sm:$0xff] %vm47_vm0, %v1052_v56  ;;  %vm930_vm12 = vcmp.ge.f32.partialorder %v881_v50, 0.0  ;;  %v979_v62 = vmul.f32 0.2, %v881_v50  ;;  %720 = vst.msk [vmem:[#allocation2 + $0x78] sm:$0xff] %vm47_vm0, %v670_v52  ;;  %v826_v0 = vmul.f32 %v1869_v6, %v770_v57 }
 0x122   :  { %vm955_vm13 = vcmp.ge.f32.partialorder %v906_v51, 0.0  ;;  %v1004_v63 = vmul.f32 0.2, %v906_v51  ;;  %745 = vst.msk [vmem:[#allocation2 + $0x140] sm:$0xff] %vm47_vm0, %v695_v53  ;;  %v851_v1 = vmul.f32 %v1869_v6, %v795_v58  ;;  %v491_v2 = vpop.f32.mrf.mxu0  ;;  %v616_v3 = vpop.f32.mrf.mxu1  ;;  %v141_v53 = vld [vmem:[#allocation2 + $0x160] sm:$0xff] }
 0x123   :  { %v1028_v4 = vsel %vm930_vm12, %v881_v50, %v979_v62  ;;  %v671_v7 = vadd.f32 %v491_v2, %v113_v54  ;;  %v696_v8 = vadd.f32 %v616_v3, %v138_v61  ;;  %v882_v11 = vadd.f32 %v1871_v9, %v826_v0  ;;  %v117_v0 = vld [vmem:[#allocation2 + $0xa0] sm:$0xff] }
 0x124   :  { %v1053_v5 = vsel %vm955_vm13, %v906_v51, %v1004_v63  ;;  %1077 = vst.msk [vmem:[%s2205_s4 + $0x60] sm:$0xff] %vm47_vm0, %v1028_v4  ;;  %v907_v12 = vadd.f32 %v1871_v9, %v851_v1  ;;  %v771_v13 = vld [vmem:[#allocation2 + $0x70] sm:$0xff]  ;;  %v1276_v15 = vpop.f32.mrf.mxu0  ;;  %v1351_v16 = vpop.f32.mrf.mxu1 }
 0x125   :  { %1102 = vst.msk [vmem:[%s2205_s4 + $0x128] sm:$0xff] %vm47_vm0, %v1053_v5  ;;  %v796_v14 = vld [vmem:[#allocation2 + $0x138] sm:$0xff]  ;;  %v827_v18 = vmul.f32 %v1869_v6, %v771_v13  ;;  %721 = vst.msk [vmem:[#allocation2 + $0x80] sm:$0xff] %vm47_vm0, %v671_v7  ;;  %vm931_vm14 = vcmp.ge.f32.partialorder %v882_v11, 0.0  ;;  %v980_v20 = vmul.f32 0.2, %v882_v11 }
 0x126   :  { %v852_v19 = vmul.f32 %v1869_v6, %v796_v14  ;;  %746 = vst.msk [vmem:[#allocation2 + $0x148] sm:$0xff] %vm47_vm0, %v696_v8  ;;  %vm956_vm15 = vcmp.ge.f32.partialorder %v907_v12, 0.0  ;;  %v1005_v21 = vmul.f32 0.2, %v907_v12  ;;  %v496_v22 = vpop.f32.mrf.mxu0  ;;  %v621_v23 = vpop.f32.mrf.mxu1  ;;  %v142_v8 = vld [vmem:[#allocation2 + $0x168] sm:$0xff] }
 0x127   :  { %v883_v24 = vadd.f32 %v1871_v9, %v827_v18  ;;  %v672_v26 = vadd.f32 %v496_v22, %v114_v10  ;;  %v697_v27 = vadd.f32 %v621_v23, %v139_v17  ;;  %v1029_v29 = vsel %vm931_vm14, %v882_v11, %v980_v20  ;;  %v118_v20 = vld [vmem:[#allocation2 + $0xa8] sm:$0xff] }
 0x128   :  { %v908_v25 = vadd.f32 %v1871_v9, %v852_v19  ;;  %v1054_v30 = vsel %vm956_vm15, %v907_v12, %v1005_v21  ;;  %v772_v31 = vld [vmem:[#allocation2 + $0x78] sm:$0xff]  ;;  %v1279_v33 = vpop.f32.mrf.mxu0  ;;  %v1354_v34 = vpop.f32.mrf.mxu1  ;;  %1078 = vst.msk [vmem:[%s2205_s4 + $0x68] sm:$0xff] %vm47_vm0, %v1029_v29 }
 0x129   :  { %v797_v32 = vld [vmem:[#allocation2 + $0x140] sm:$0xff]  ;;  %1103 = vst.msk [vmem:[%s2205_s4 + $0x130] sm:$0xff] %vm47_vm0, %v1054_v30  ;;  %vm932_vm1 = vcmp.ge.f32.partialorder %v883_v24, 0.0  ;;  %v981_v36 = vmul.f32 0.2, %v883_v24  ;;  %722 = vst.msk [vmem:[#allocation2 + $0x88] sm:$0xff] %vm47_vm0, %v672_v26  ;;  %v828_v38 = vmul.f32 %v1869_v6, %v772_v31 }
 0x12a   :  { %vm957_vm2 = vcmp.ge.f32.partialorder %v908_v25, 0.0  ;;  %v1006_v37 = vmul.f32 0.2, %v908_v25  ;;  %747 = vst.msk [vmem:[#allocation2 + $0x150] sm:$0xff] %vm47_vm0, %v697_v27  ;;  %v853_v39 = vmul.f32 %v1869_v6, %v797_v32  ;;  %v501_v40 = vpop.f32.mrf.mxu0  ;;  %v626_v41 = vpop.f32.mrf.mxu1  ;;  %v143_v27 = vld [vmem:[#allocation2 + $0x170] sm:$0xff] }
 0x12b   :  { %v1030_v42 = vsel %vm932_vm1, %v883_v24, %v981_v36  ;;  %v673_v44 = vadd.f32 %v501_v40, %v115_v28  ;;  %v698_v45 = vadd.f32 %v626_v41, %v140_v35  ;;  %v884_v47 = vadd.f32 %v1871_v9, %v828_v38  ;;  %v119_v38 = vld [vmem:[#allocation2 + $0xb0] sm:$0xff] }
 0x12c   :  { %v1055_v43 = vsel %vm957_vm2, %v908_v25, %v1006_v37  ;;  %1079 = vst.msk [vmem:[%s2205_s4 + $0x70] sm:$0xff] %vm47_vm0, %v1030_v42  ;;  %v909_v48 = vadd.f32 %v1871_v9, %v853_v39  ;;  %v773_v49 = vld [vmem:[#allocation2 + $0x80] sm:$0xff]  ;;  %v1282_v51 = vpop.f32.mrf.mxu0  ;;  %v1357_v52 = vpop.f32.mrf.mxu1 }
 0x12d   :  { %1104 = vst.msk [vmem:[%s2205_s4 + $0x138] sm:$0xff] %vm47_vm0, %v1055_v43  ;;  %v798_v50 = vld [vmem:[#allocation2 + $0x148] sm:$0xff]  ;;  %v829_v54 = vmul.f32 %v1869_v6, %v773_v49  ;;  %723 = vst.msk [vmem:[#allocation2 + $0x90] sm:$0xff] %vm47_vm0, %v673_v44  ;;  %vm933_vm3 = vcmp.ge.f32.partialorder %v884_v47, 0.0  ;;  %v982_v56 = vmul.f32 0.2, %v884_v47 }
 0x12e   :  { %v854_v55 = vmul.f32 %v1869_v6, %v798_v50  ;;  %748 = vst.msk [vmem:[#allocation2 + $0x158] sm:$0xff] %vm47_vm0, %v698_v45  ;;  %vm958_vm4 = vcmp.ge.f32.partialorder %v909_v48, 0.0  ;;  %v1007_v57 = vmul.f32 0.2, %v909_v48  ;;  %v506_v58 = vpop.f32.mrf.mxu0  ;;  %v631_v59 = vpop.f32.mrf.mxu1  ;;  %v144_v45 = vld [vmem:[#allocation2 + $0x178] sm:$0xff] }
 0x12f   :  { %v885_v60 = vadd.f32 %v1871_v9, %v829_v54  ;;  %v674_v62 = vadd.f32 %v506_v58, %v116_v46  ;;  %v699_v63 = vadd.f32 %v631_v59, %v141_v53  ;;  %v1031_v1 = vsel %vm933_vm3, %v884_v47, %v982_v56  ;;  %v120_v56 = vld [vmem:[#allocation2 + $0xb8] sm:$0xff] }
 0x130   :  { %v910_v61 = vadd.f32 %v1871_v9, %v854_v55  ;;  %v1056_v2 = vsel %vm958_vm4, %v909_v48, %v1007_v57  ;;  %v774_v3 = vld [vmem:[#allocation2 + $0x88] sm:$0xff]  ;;  %v1285_v5 = vpop.f32.mrf.mxu0  ;;  %v1360_v7 = vpop.f32.mrf.mxu1  ;;  %1080 = vst.msk [vmem:[%s2205_s4 + $0x78] sm:$0xff] %vm47_vm0, %v1031_v1 }
 0x131   :  { %v799_v4 = vld [vmem:[#allocation2 + $0x150] sm:$0xff]  ;;  %1105 = vst.msk [vmem:[%s2205_s4 + $0x140] sm:$0xff] %vm47_vm0, %v1056_v2  ;;  %vm934_vm5 = vcmp.ge.f32.partialorder %v885_v60, 0.0  ;;  %v983_v10 = vmul.f32 0.2, %v885_v60  ;;  %724 = vst.msk [vmem:[#allocation2 + $0x98] sm:$0xff] %vm47_vm0, %v674_v62  ;;  %v830_v12 = vmul.f32 %v1869_v6, %v774_v3 }
 0x132   :  { %vm959_vm6 = vcmp.ge.f32.partialorder %v910_v61, 0.0  ;;  %v1008_v11 = vmul.f32 0.2, %v910_v61  ;;  %749 = vst.msk [vmem:[#allocation2 + $0x160] sm:$0xff] %vm47_vm0, %v699_v63  ;;  %v855_v13 = vmul.f32 %v1869_v6, %v799_v4  ;;  %v511_v14 = vpop.f32.mrf.mxu0  ;;  %v636_v15 = vpop.f32.mrf.mxu1  ;;  %v145_v63 = vld [vmem:[#allocation2 + $0x180] sm:$0xff] }
 0x133   :  { %v1032_v16 = vsel %vm934_vm5, %v885_v60, %v983_v10  ;;  %v675_v18 = vadd.f32 %v511_v14, %v117_v0  ;;  %v700_v19 = vadd.f32 %v636_v15, %v142_v8  ;;  %v886_v21 = vadd.f32 %v1871_v9, %v830_v12 }
 0x134   :  { %v1057_v17 = vsel %vm959_vm6, %v910_v61, %v1008_v11  ;;  %1081 = vst.msk [vmem:[%s2205_s4 + $0x80] sm:$0xff] %vm47_vm0, %v1032_v16  ;;  %v911_v22 = vadd.f32 %v1871_v9, %v855_v13  ;;  %v775_v23 = vld [vmem:[#allocation2 + $0x90] sm:$0xff]  ;;  %v1288_v25 = vpop.f32.mrf.mxu0  ;;  %v1363_v26 = vpop.f32.mrf.mxu1  ;;  %v121_v16 = vld [vmem:[#allocation2 + $0xc0] sm:$0xff] }
 0x135   :  { %1106 = vst.msk [vmem:[%s2205_s4 + $0x148] sm:$0xff] %vm47_vm0, %v1057_v17  ;;  %v800_v24 = vld [vmem:[#allocation2 + $0x158] sm:$0xff]  ;;  %v831_v28 = vmul.f32 %v1869_v6, %v775_v23  ;;  %725 = vst.msk [vmem:[#allocation2 + $0xa0] sm:$0xff] %vm47_vm0, %v675_v18  ;;  %vm935_vm7 = vcmp.ge.f32.partialorder %v886_v21, 0.0  ;;  %v984_v30 = vmul.f32 0.2, %v886_v21 }
 0x136   :  { %v856_v29 = vmul.f32 %v1869_v6, %v800_v24  ;;  %750 = vst.msk [vmem:[#allocation2 + $0x168] sm:$0xff] %vm47_vm0, %v700_v19  ;;  %vm960_vm8 = vcmp.ge.f32.partialorder %v911_v22, 0.0  ;;  %v1009_v31 = vmul.f32 0.2, %v911_v22  ;;  %v516_v32 = vpop.f32.mrf.mxu0  ;;  %v641_v33 = vpop.f32.mrf.mxu1  ;;  %v1383_v19 = vld [vmem:[%s2203_s2] ss:$0 sm:$0xff] }
 0x137   :  { %v887_v34 = vadd.f32 %v1871_v9, %v831_v28  ;;  %v676_v36 = vadd.f32 %v516_v32, %v118_v20  ;;  %v701_v37 = vadd.f32 %v641_v33, %v143_v27  ;;  %v1033_v39 = vsel %vm935_vm7, %v886_v21, %v984_v30  ;;  %v1384_v26 = vld [vmem:[#allocation5] ss:$0 sm:$0xff] }
 0x138   :  { %v912_v35 = vadd.f32 %v1871_v9, %v856_v29  ;;  %v1058_v40 = vsel %vm960_vm8, %v911_v22, %v1009_v31  ;;  %v776_v41 = vld [vmem:[#allocation2 + $0x98] sm:$0xff]  ;;  %v1291_v43 = vpop.f32.mrf.mxu0  ;;  %v1366_v44 = vpop.f32.mrf.mxu1  ;;  %1082 = vst.msk [vmem:[%s2205_s4 + $0x88] sm:$0xff] %vm47_vm0, %v1033_v39 }
 0x139   :  { %v801_v42 = vld [vmem:[#allocation2 + $0x160] sm:$0xff]  ;;  %1107 = vst.msk [vmem:[%s2205_s4 + $0x150] sm:$0xff] %vm47_vm0, %v1058_v40  ;;  %vm936_vm9 = vcmp.ge.f32.partialorder %v887_v34, 0.0  ;;  %v985_v46 = vmul.f32 0.2, %v887_v34  ;;  %726 = vst.msk [vmem:[#allocation2 + $0xa8] sm:$0xff] %vm47_vm0, %v676_v36  ;;  %v832_v48 = vmul.f32 %v1869_v6, %v776_v41 }
 0x13a   :  { %vm961_vm10 = vcmp.ge.f32.partialorder %v912_v35, 0.0  ;;  %v1010_v47 = vmul.f32 0.2, %v912_v35  ;;  %751 = vst.msk [vmem:[#allocation2 + $0x170] sm:$0xff] %vm47_vm0, %v701_v37  ;;  %v857_v49 = vmul.f32 %v1869_v6, %v801_v42  ;;  %v521_v50 = vpop.f32.mrf.mxu0  ;;  %v646_v51 = vpop.f32.mrf.mxu1 }
 0x13b   :  { %v1034_v52 = vsel %vm936_vm9, %v887_v34, %v985_v46  ;;  %v677_v54 = vadd.f32 %v521_v50, %v119_v38  ;;  %v702_v55 = vadd.f32 %v646_v51, %v144_v45  ;;  %v888_v57 = vadd.f32 %v1871_v9, %v832_v48 }
 0x13c   :  { %v1059_v53 = vsel %vm961_vm10, %v912_v35, %v1010_v47  ;;  %1083 = vst.msk [vmem:[%s2205_s4 + $0x90] sm:$0xff] %vm47_vm0, %v1034_v52  ;;  %v913_v58 = vadd.f32 %v1871_v9, %v857_v49  ;;  %v777_v59 = vld [vmem:[#allocation2 + $0xa0] sm:$0xff]  ;;  %v1294_v61 = vpop.f32.mrf.mxu0  ;;  %v1369_v62 = vpop.f32.mrf.mxu1 }
 0x13d   :  { %1108 = vst.msk [vmem:[%s2205_s4 + $0x158] sm:$0xff] %vm47_vm0, %v1059_v53  ;;  %v802_v60 = vld [vmem:[#allocation2 + $0x168] sm:$0xff]  ;;  %v833_v0 = vmul.f32 %v1869_v6, %v777_v59  ;;  %727 = vst.msk [vmem:[#allocation2 + $0xb0] sm:$0xff] %vm47_vm0, %v677_v54  ;;  %vm937_vm11 = vcmp.ge.f32.partialorder %v888_v57, 0.0  ;;  %v986_v2 = vmul.f32 0.2, %v888_v57 }
 0x13e   :  { %v858_v1 = vmul.f32 %v1869_v6, %v802_v60  ;;  %752 = vst.msk [vmem:[#allocation2 + $0x178] sm:$0xff] %vm47_vm0, %v702_v55  ;;  %vm962_vm12 = vcmp.ge.f32.partialorder %v913_v58, 0.0  ;;  %v1011_v3 = vmul.f32 0.2, %v913_v58  ;;  %v526_v4 = vpop.f32.mrf.mxu0  ;;  %v651_v5 = vpop.f32.mrf.mxu1 }
 0x13f   :  { %v889_v7 = vadd.f32 %v1871_v9, %v833_v0  ;;  %v678_v10 = vadd.f32 %v526_v4, %v120_v56  ;;  %v703_v11 = vadd.f32 %v651_v5, %v145_v63  ;;  %v1035_v12 = vsel %vm937_vm11, %v888_v57, %v986_v2 }
 0x140   :  { %v914_v8 = vadd.f32 %v1871_v9, %v858_v1  ;;  %v1060_v13 = vsel %vm962_vm12, %v913_v58, %v1011_v3  ;;  %v778_v14 = vld [vmem:[#allocation2 + $0xa8] sm:$0xff]  ;;  %v1297_v15 = vpop.f32.mrf.mxu0  ;;  %v1372_v17 = vpop.f32.mrf.mxu1  ;;  %1084 = vst.msk [vmem:[%s2205_s4 + $0x98] sm:$0xff] %vm47_vm0, %v1035_v12 }
 0x141   :  { %v803_v6 = vld [vmem:[#allocation2 + $0x170] sm:$0xff]  ;;  %1109 = vst.msk [vmem:[%s2205_s4 + $0x160] sm:$0xff] %vm47_vm0, %v1060_v13  ;;  %vm938_vm13 = vcmp.ge.f32.partialorder %v889_v7, 0.0  ;;  %v987_v9 = vmul.f32 0.2, %v889_v7  ;;  %728 = vst.msk [vmem:[#allocation2 + $0xb8] sm:$0xff] %vm47_vm0, %v678_v10  ;;  %v834_v20 = vmul.f32 %v1383_v19, %v778_v14 }
 0x142   :  { %vm963_vm14 = vcmp.ge.f32.partialorder %v914_v8, 0.0  ;;  %v1012_v18 = vmul.f32 0.2, %v914_v8  ;;  %753 = vst.msk [vmem:[#allocation2 + $0x180] sm:$0xff] %vm47_vm0, %v703_v11  ;;  %v859_v21 = vmul.f32 %v1383_v19, %v803_v6  ;;  %v531_v22 = vpop.f32.mrf.mxu0 }
 0x143   :  { %v1036_v23 = vsel %vm938_vm13, %v889_v7, %v987_v9  ;;  %v679_v25 = vadd.f32 %v531_v22, %v121_v16  ;;  %v890_v27 = vadd.f32 %v1384_v26, %v834_v20 }
 0x144   :  { %v1061_v24 = vsel %vm963_vm14, %v914_v8, %v1012_v18  ;;  %1085 = vst.msk [vmem:[%s2205_s4 + $0xa0] sm:$0xff] %vm47_vm0, %v1036_v23  ;;  %v915_v28 = vadd.f32 %v1384_v26, %v859_v21  ;;  %v779_v29 = vld [vmem:[#allocation2 + $0xb0] sm:$0xff]  ;;  %v1300_v31 = vpop.f32.mrf.mxu0 }
 0x145   :  { %1110 = vst.msk [vmem:[%s2205_s4 + $0x168] sm:$0xff] %vm47_vm0, %v1061_v24  ;;  %v804_v30 = vld [vmem:[#allocation2 + $0x178] sm:$0xff]  ;;  %v835_v32 = vmul.f32 %v1383_v19, %v779_v29  ;;  %729 = vst.msk [vmem:[#allocation2 + $0xc0] sm:$0xff] %vm47_vm0, %v679_v25  ;;  %vm939_vm15 = vcmp.ge.f32.partialorder %v890_v27, 0.0  ;;  %v988_v34 = vmul.f32 0.2, %v890_v27 }
 0x146   :  { %v860_v33 = vmul.f32 %v1383_v19, %v804_v30  ;;  %vm964_vm1 = vcmp.ge.f32.partialorder %v915_v28, 0.0  ;;  %v1013_v35 = vmul.f32 0.2, %v915_v28 }
 0x147   :  { %v891_v36 = vadd.f32 %v1384_v26, %v835_v32  ;;  %v1037_v38 = vsel %vm939_vm15, %v890_v27, %v988_v34 }
 0x148   :  { %v916_v37 = vadd.f32 %v1384_v26, %v860_v33  ;;  %v1062_v39 = vsel %vm964_vm1, %v915_v28, %v1013_v35  ;;  %v780_v40 = vld [vmem:[#allocation2 + $0xb8] sm:$0xff]  ;;  %1086 = vst.msk [vmem:[%s2205_s4 + $0xa8] sm:$0xff] %vm47_vm0, %v1037_v38 }
 0x149   :  { %v805_v41 = vld [vmem:[#allocation2 + $0x180] sm:$0xff]  ;;  %1111 = vst.msk [vmem:[%s2205_s4 + $0x170] sm:$0xff] %vm47_vm0, %v1062_v39  ;;  %vm940_vm2 = vcmp.ge.f32.partialorder %v891_v36, 0.0  ;;  %v989_v42 = vmul.f32 0.2, %v891_v36  ;;  %v836_v44 = vmul.f32 %v1383_v19, %v780_v40 }
 0x14a   :  { %vm965_vm3 = vcmp.ge.f32.partialorder %v916_v37, 0.0  ;;  %v1014_v43 = vmul.f32 0.2, %v916_v37  ;;  %v861_v45 = vmul.f32 %v1383_v19, %v805_v41 }
 0x14b   :  { %v1038_v46 = vsel %vm940_vm2, %v891_v36, %v989_v42  ;;  %v892_v48 = vadd.f32 %v1384_v26, %v836_v44 }
 0x14c   :  { %v1063_v47 = vsel %vm965_vm3, %v916_v37, %v1014_v43  ;;  %1087 = vst.msk [vmem:[%s2205_s4 + $0xb0] sm:$0xff] %vm47_vm0, %v1038_v46  ;;  %v917_v49 = vadd.f32 %v1384_v26, %v861_v45  ;;  %v781_v50 = vld [vmem:[#allocation2 + $0xc0] sm:$0xff] }
 0x14d   :  { %1112 = vst.msk [vmem:[%s2205_s4 + $0x178] sm:$0xff] %vm47_vm0, %v1063_v47  ;;  %v837_v51 = vmul.f32 %v1383_v19, %v781_v50  ;;  %vm941_vm4 = vcmp.ge.f32.partialorder %v892_v48, 0.0  ;;  %v990_v52 = vmul.f32 0.2, %v892_v48 }
 0x14e   :  { %vm966_vm5 = vcmp.ge.f32.partialorder %v917_v49, 0.0  ;;  %v1015_v53 = vmul.f32 0.2, %v917_v49 }
 0x14f   :  { %v893_v54 = vadd.f32 %v1384_v26, %v837_v51  ;;  %v1039_v55 = vsel %vm941_vm4, %v892_v48, %v990_v52 }
 0x150   :  { %v1064_v56 = vsel %vm966_vm5, %v917_v49, %v1015_v53  ;;  %1088 = vst.msk [vmem:[%s2205_s4 + $0xb8] sm:$0xff] %vm47_vm0, %v1039_v55 }
 0x151   :  { %1113 = vst.msk [vmem:[%s2205_s4 + $0x180] sm:$0xff] %vm47_vm0, %v1064_v56  ;;  %vm942_vm6 = vcmp.ge.f32.partialorder %v893_v54, 0.0  ;;  %v991_v57 = vmul.f32 0.2, %v893_v54 }
 0x153   :  { %v1040_v58 = vsel %vm942_vm6, %v893_v54, %v991_v57 }
 0x154   :  { %1089 = vst.msk [vmem:[%s2205_s4 + $0xc0] sm:$0xff] %vm47_vm0, %v1040_v58 }
 0x155   :  { %1118 = vsyncpa [#allocation4], 1 }
 0x156   :  { %1119 = vsyncpa [#allocation6], 1 }

// kernel: fast_discriminator_forward.5
= control target key start
LH: loop header
LB: loop body
LE: loop exit
PB: predicated region body
PF: predicated region fallthrough
CT: control target
= control target key end

     0   :  { %vm21_vm0 = vcmask 523264   ;;  %vm34_vm1 = vcmask 517120   ;;  %s1198_s1 = inlined_call_operand.vmem [shape: f32[512,64], index: 1, kind: input, shape index: {}]   ;;  %s1199_s0 = inlined_call_operand.vmem [shape: f32[98,512], index: 0, kind: input, shape index: {}]   ;;  %s1200_s2 = inlined_call_operand.vmem [shape: f32[1,64], index: 2, kind: input, shape index: {}]   ;;  %s1201_s3 = inlined_call_operand.vmem [shape: f32[1,64], index: 3, kind: input, shape index: {}]   ;;  %s1202_s4 = inlined_call_operand.vmem [shape: f32[98,64], index: 4, kind: output, shape index: {}]  }
   0x1   :  { %v132_v0 = vld [vmem:[%s1198_s1 + $0xf8] sm:$0xff]  ;;  %v131_v4 = vld [vmem:[%s1198_s1 + $0xf0] sm:$0xff]  ;;  %v130_v8 = vld [vmem:[%s1198_s1 + $0xe8] sm:$0xff] }
   0x2   :  { %v164_v1 = vld [vmem:[%s1198_s1 + $0x1f8] sm:$0xff]  ;;  %567 = vmatprep.subr.mxu0 %v132_v0  ;;  %v163_v5 = vld [vmem:[%s1198_s1 + $0x1f0] sm:$0xff]  ;;  %v162_v9 = vld [vmem:[%s1198_s1 + $0x1e8] sm:$0xff] }
   0x3   :  { %v116_v2 = vld [vmem:[%s1198_s1 + $0x78] sm:$0xff]  ;;  %638 = vmatprep.subr.mxu1 %v164_v1  ;;  %v115_v6 = vld [vmem:[%s1198_s1 + $0x70] sm:$0xff]  ;;  %v114_v10 = vld [vmem:[%s1198_s1 + $0x68] sm:$0xff] }
   0x4   :  { %v148_v3 = vld [vmem:[%s1198_s1 + $0x178] sm:$0xff]  ;;  %568 = vmatpush3.msra.mxu0 %v116_v2  ;;  %v147_v7 = vld [vmem:[%s1198_s1 + $0x170] sm:$0xff]  ;;  %v146_v11 = vld [vmem:[%s1198_s1 + $0x168] sm:$0xff] }
   0x5   :  { %639 = vmatpush3.msra.mxu1 %v148_v3  ;;  %569 = vmatprep.subr.mxu0 %v131_v4  ;;  %v129_v12 = vld [vmem:[%s1198_s1 + $0xe0] sm:$0xff]  ;;  %v128_v16 = vld [vmem:[%s1198_s1 + $0xd8] sm:$0xff]  ;;  %v127_v20 = vld [vmem:[%s1198_s1 + $0xd0] sm:$0xff] }
   0x6   :  { %640 = vmatprep.subr.mxu1 %v163_v5  ;;  %570 = vmatpush3.msra.mxu0 %v115_v6  ;;  %v161_v13 = vld [vmem:[%s1198_s1 + $0x1e0] sm:$0xff]  ;;  %v160_v17 = vld [vmem:[%s1198_s1 + $0x1d8] sm:$0xff]  ;;  %v159_v21 = vld [vmem:[%s1198_s1 + $0x1d0] sm:$0xff] }
   0x7   :  { %641 = vmatpush3.msra.mxu1 %v147_v7  ;;  %571 = vmatprep.subr.mxu0 %v130_v8  ;;  %v113_v14 = vld [vmem:[%s1198_s1 + $0x60] sm:$0xff]  ;;  %v112_v18 = vld [vmem:[%s1198_s1 + $0x58] sm:$0xff]  ;;  %v111_v22 = vld [vmem:[%s1198_s1 + $0x50] sm:$0xff] }
   0x8   :  { %642 = vmatprep.subr.mxu1 %v162_v9  ;;  %v145_v15 = vld [vmem:[%s1198_s1 + $0x160] sm:$0xff]  ;;  %572 = vmatpush3.msra.mxu0 %v114_v10  ;;  %v144_v19 = vld [vmem:[%s1198_s1 + $0x158] sm:$0xff]  ;;  %v143_v23 = vld [vmem:[%s1198_s1 + $0x150] sm:$0xff] }
   0x9   :  { %643 = vmatpush3.msra.mxu1 %v146_v11  ;;  %573 = vmatprep.subr.mxu0 %v129_v12  ;;  %v126_v24 = vld [vmem:[%s1198_s1 + $0xc8] sm:$0xff]  ;;  %v125_v28 = vld [vmem:[%s1198_s1 + $0xc0] sm:$0xff]  ;;  %v124_v32 = vld [vmem:[%s1198_s1 + $0xb8] sm:$0xff] }
   0xa   :  { %644 = vmatprep.subr.mxu1 %v161_v13  ;;  %574 = vmatpush3.msra.mxu0 %v113_v14  ;;  %v158_v25 = vld [vmem:[%s1198_s1 + $0x1c8] sm:$0xff]  ;;  %v157_v29 = vld [vmem:[%s1198_s1 + $0x1c0] sm:$0xff]  ;;  %v156_v33 = vld [vmem:[%s1198_s1 + $0x1b8] sm:$0xff] }
   0xb   :  { %645 = vmatpush3.msra.mxu1 %v145_v15  ;;  %575 = vmatprep.subr.mxu0 %v128_v16  ;;  %v110_v26 = vld [vmem:[%s1198_s1 + $0x48] sm:$0xff]  ;;  %v109_v30 = vld [vmem:[%s1198_s1 + $0x40] sm:$0xff]  ;;  %v108_v34 = vld [vmem:[%s1198_s1 + $0x38] sm:$0xff] }
   0xc   :  { %646 = vmatprep.subr.mxu1 %v160_v17  ;;  %576 = vmatpush3.msra.mxu0 %v112_v18  ;;  %v142_v27 = vld [vmem:[%s1198_s1 + $0x148] sm:$0xff]  ;;  %v141_v31 = vld [vmem:[%s1198_s1 + $0x140] sm:$0xff]  ;;  %v140_v35 = vld [vmem:[%s1198_s1 + $0x138] sm:$0xff] }
   0xd   :  { %647 = vmatpush3.msra.mxu1 %v144_v19  ;;  %577 = vmatprep.subr.mxu0 %v127_v20  ;;  %v123_v36 = vld [vmem:[%s1198_s1 + $0xb0] sm:$0xff]  ;;  %v122_v40 = vld [vmem:[%s1198_s1 + $0xa8] sm:$0xff]  ;;  %v121_v44 = vld [vmem:[%s1198_s1 + $0xa0] sm:$0xff] }
   0xe   :  { %648 = vmatprep.subr.mxu1 %v159_v21  ;;  %578 = vmatpush3.msra.mxu0 %v111_v22  ;;  %v155_v37 = vld [vmem:[%s1198_s1 + $0x1b0] sm:$0xff]  ;;  %v154_v41 = vld [vmem:[%s1198_s1 + $0x1a8] sm:$0xff]  ;;  %v153_v45 = vld [vmem:[%s1198_s1 + $0x1a0] sm:$0xff] }
   0xf   :  { %649 = vmatpush3.msra.mxu1 %v143_v23  ;;  %579 = vmatprep.subr.mxu0 %v126_v24  ;;  %v107_v38 = vld [vmem:[%s1198_s1 + $0x30] sm:$0xff]  ;;  %v106_v42 = vld [vmem:[%s1198_s1 + $0x28] sm:$0xff]  ;;  %v105_v46 = vld [vmem:[%s1198_s1 + $0x20] sm:$0xff] }
  0x10   :  { %650 = vmatprep.subr.mxu1 %v158_v25  ;;  %580 = vmatpush3.msra.mxu0 %v110_v26  ;;  %v139_v39 = vld [vmem:[%s1198_s1 + $0x130] sm:$0xff]  ;;  %v138_v43 = vld [vmem:[%s1198_s1 + $0x128] sm:$0xff]  ;;  %v137_v47 = vld [vmem:[%s1198_s1 + $0x120] sm:$0xff] }
  0x11   :  { %651 = vmatpush3.msra.mxu1 %v142_v27  ;;  %581 = vmatprep.subr.mxu0 %v125_v28  ;;  %v120_v48 = vld [vmem:[%s1198_s1 + $0x98] sm:$0xff]  ;;  %v119_v52 = vld [vmem:[%s1198_s1 + $0x90] sm:$0xff]  ;;  %v118_v56 = vld [vmem:[%s1198_s1 + $0x88] sm:$0xff] }
  0x12   :  { %652 = vmatprep.subr.mxu1 %v157_v29  ;;  %582 = vmatpush3.msra.mxu0 %v109_v30  ;;  %v152_v49 = vld [vmem:[%s1198_s1 + $0x198] sm:$0xff]  ;;  %v151_v53 = vld [vmem:[%s1198_s1 + $0x190] sm:$0xff]  ;;  %v150_v57 = vld [vmem:[%s1198_s1 + $0x188] sm:$0xff] }
  0x13   :  { %653 = vmatpush3.msra.mxu1 %v141_v31  ;;  %583 = vmatprep.subr.mxu0 %v124_v32  ;;  %v104_v50 = vld [vmem:[%s1198_s1 + $0x18] sm:$0xff]  ;;  %v103_v54 = vld [vmem:[%s1198_s1 + $0x10] sm:$0xff]  ;;  %v102_v58 = vld [vmem:[%s1198_s1 + $0x8] sm:$0xff] }
  0x14   :  { %654 = vmatprep.subr.mxu1 %v156_v33  ;;  %584 = vmatpush3.msra.mxu0 %v108_v34  ;;  %v136_v51 = vld [vmem:[%s1198_s1 + $0x118] sm:$0xff]  ;;  %v135_v55 = vld [vmem:[%s1198_s1 + $0x110] sm:$0xff]  ;;  %v134_v59 = vld [vmem:[%s1198_s1 + $0x108] sm:$0xff] }
  0x15   :  { %655 = vmatpush3.msra.mxu1 %v140_v35  ;;  %585 = vmatprep.subr.mxu0 %v123_v36  ;;  %v117_v60 = vld [vmem:[%s1198_s1 + $0x80] sm:$0xff]  ;;  %v50_v63 = vld [vmem:[%s1199_s0 + $0x8] sm:$0xff]  ;;  %v52_v1 = vld [vmem:[%s1199_s0 + $0x18] sm:$0xff] }
  0x16   :  { %656 = vmatprep.subr.mxu1 %v155_v37  ;;  %586 = vmatpush3.msra.mxu0 %v107_v38  ;;  %v149_v61 = vld [vmem:[%s1198_s1 + $0x180] sm:$0xff]  ;;  %v51_v3 = vld [vmem:[%s1199_s0 + $0x10] sm:$0xff]  ;;  %v54_v4 = vld [vmem:[%s1199_s0 + $0x28] sm:$0xff] }
  0x17   :  { %657 = vmatpush3.msra.mxu1 %v139_v39  ;;  %587 = vmatprep.subr.mxu0 %v122_v40  ;;  %v101_v62 = vld [vmem:[%s1198_s1] sm:$0xff]  ;;  %v56_v5 = vld [vmem:[%s1199_s0 + $0x38] sm:$0xff]  ;;  %v55_v7 = vld [vmem:[%s1199_s0 + $0x30] sm:$0xff] }
  0x18   :  { %658 = vmatprep.subr.mxu1 %v154_v41  ;;  %588 = vmatpush3.msra.mxu0 %v106_v42  ;;  %v133_v0 = vld [vmem:[%s1198_s1 + $0x100] sm:$0xff]  ;;  %v58_v8 = vld [vmem:[%s1199_s0 + $0x48] sm:$0xff]  ;;  %v60_v9 = vld [vmem:[%s1199_s0 + $0x58] sm:$0xff] }
  0x19   :  { %659 = vmatpush3.msra.mxu1 %v138_v43  ;;  %589 = vmatprep.subr.mxu0 %v121_v44  ;;  %v49_v2 = vld [vmem:[%s1199_s0] sm:$0xff]  ;;  %v59_v11 = vld [vmem:[%s1199_s0 + $0x50] sm:$0xff]  ;;  %v62_v12 = vld [vmem:[%s1199_s0 + $0x68] sm:$0xff] }
  0x1a   :  { %660 = vmatprep.subr.mxu1 %v153_v45  ;;  %590 = vmatpush3.msra.mxu0 %v105_v46  ;;  %v53_v6 = vld [vmem:[%s1199_s0 + $0x20] sm:$0xff]  ;;  %v64_v13 = vld [vmem:[%s1199_s0 + $0x78] sm:$0xff]  ;;  %v63_v15 = vld [vmem:[%s1199_s0 + $0x70] sm:$0xff] }
  0x1b   :  { %661 = vmatpush3.msra.mxu1 %v137_v47  ;;  %591 = vmatprep.subr.mxu0 %v120_v48  ;;  %v57_v10 = vld [vmem:[%s1199_s0 + $0x40] sm:$0xff]  ;;  %v66_v16 = vld [vmem:[%s1199_s0 + $0x88] sm:$0xff]  ;;  %v68_v17 = vld [vmem:[%s1199_s0 + $0x98] sm:$0xff] }
  0x1c   :  { %662 = vmatprep.subr.mxu1 %v152_v49  ;;  %592 = vmatpush3.msra.mxu0 %v104_v50  ;;  %v61_v14 = vld [vmem:[%s1199_s0 + $0x60] sm:$0xff]  ;;  %v67_v19 = vld [vmem:[%s1199_s0 + $0x90] sm:$0xff]  ;;  %v70_v20 = vld [vmem:[%s1199_s0 + $0xa8] sm:$0xff] }
  0x1d   :  { %663 = vmatpush3.msra.mxu1 %v136_v51  ;;  %593 = vmatprep.subr.mxu0 %v119_v52  ;;  %v65_v18 = vld [vmem:[%s1199_s0 + $0x80] sm:$0xff]  ;;  %v72_v21 = vld [vmem:[%s1199_s0 + $0xb8] sm:$0xff]  ;;  %v71_v23 = vld [vmem:[%s1199_s0 + $0xb0] sm:$0xff]  ;;  %v710_v52 = vmov 0.0  }
  0x1e   :  { %664 = vmatprep.subr.mxu1 %v151_v53  ;;  %594 = vmatpush3.msra.mxu0 %v103_v54  ;;  %v69_v22 = vld [vmem:[%s1199_s0 + $0xa0] sm:$0xff]  ;;  %v74_v24 = vld [vmem:[%s1199_s0 + $0xc8] sm:$0xff]  ;;  %v76_v25 = vld [vmem:[%s1199_s0 + $0xd8] sm:$0xff]  ;;  %22 = vst.msk [vmem:[#allocation2] sm:$0xff] %vm21_vm0, %v710_v52 }
  0x1f   :  { %665 = vmatpush3.msra.mxu1 %v135_v55  ;;  %595 = vmatprep.subr.mxu0 %v118_v56  ;;  %v73_v26 = vld [vmem:[%s1199_s0 + $0xc0] sm:$0xff]  ;;  %v75_v27 = vld [vmem:[%s1199_s0 + $0xd0] sm:$0xff]  ;;  %v78_v28 = vld [vmem:[%s1199_s0 + $0xe8] sm:$0xff]  ;;  %23 = vst.msk [vmem:[#allocation2 + $0x8] sm:$0xff] %vm21_vm0, %v710_v52 }
  0x20   :  { %666 = vmatprep.subr.mxu1 %v150_v57  ;;  %596 = vmatpush3.msra.mxu0 %v102_v58  ;;  %v80_v29 = vld [vmem:[%s1199_s0 + $0xf8] sm:$0xff]  ;;  %v77_v30 = vld [vmem:[%s1199_s0 + $0xe0] sm:$0xff]  ;;  %v79_v31 = vld [vmem:[%s1199_s0 + $0xf0] sm:$0xff]  ;;  %24 = vst.msk [vmem:[#allocation2 + $0x10] sm:$0xff] %vm21_vm0, %v710_v52 }
  0x21   :  { %667 = vmatpush3.msra.mxu1 %v134_v59  ;;  %597 = vmatprep.subr.mxu0 %v117_v60  ;;  %v82_v32 = vld [vmem:[%s1199_s0 + $0x108] sm:$0xff]  ;;  %v84_v33 = vld [vmem:[%s1199_s0 + $0x118] sm:$0xff]  ;;  %v81_v34 = vld [vmem:[%s1199_s0 + $0x100] sm:$0xff]  ;;  %25 = vst.msk [vmem:[#allocation2 + $0x18] sm:$0xff] %vm21_vm0, %v710_v52 }
  0x22   :  { %668 = vmatprep.subr.mxu1 %v149_v61  ;;  %598 = vmatpush3.msra.mxu0 %v101_v62  ;;  %v83_v35 = vld [vmem:[%s1199_s0 + $0x110] sm:$0xff]  ;;  %v86_v36 = vld [vmem:[%s1199_s0 + $0x128] sm:$0xff]  ;;  %v88_v37 = vld [vmem:[%s1199_s0 + $0x138] sm:$0xff]  ;;  %26 = vst.msk [vmem:[#allocation2 + $0x20] sm:$0xff] %vm21_vm0, %v710_v52 }
  0x23   :  { %229 = vmatprep.mubr.f32.mxu0 %v50_v63  ;;  %669 = vmatpush3.msra.mxu1 %v133_v0  ;;  %v85_v38 = vld [vmem:[%s1199_s0 + $0x120] sm:$0xff]  ;;  %v87_v39 = vld [vmem:[%s1199_s0 + $0x130] sm:$0xff]  ;;  %v90_v40 = vld [vmem:[%s1199_s0 + $0x148] sm:$0xff]  ;;  %27 = vst.msk [vmem:[#allocation2 + $0x28] sm:$0xff] %vm21_vm0, %v710_v52 }
  0x24   :  { %359 = vmatprep.mubr.f32.mxu1 %v52_v1  ;;  %230 = vmatmul.mubr.f32.vlgmr.msra.gmra.mxu0 %v49_v2  ;;  %v92_v41 = vld [vmem:[%s1199_s0 + $0x158] sm:$0xff]  ;;  %v89_v42 = vld [vmem:[%s1199_s0 + $0x140] sm:$0xff]  ;;  %v91_v43 = vld [vmem:[%s1199_s0 + $0x150] sm:$0xff]  ;;  %28 = vst.msk [vmem:[#allocation2 + $0x30] sm:$0xff] %vm21_vm0, %v710_v52 }
  0x25   :  { %360 = vmatmul.mubr.f32.vlgmr.msra.gmra.mxu1 %v51_v3  ;;  %234 = vmatprep.mubr.f32.mxu0 %v54_v4  ;;  %v94_v44 = vld [vmem:[%s1199_s0 + $0x168] sm:$0xff]  ;;  %v96_v45 = vld [vmem:[%s1199_s0 + $0x178] sm:$0xff]  ;;  %v93_v46 = vld [vmem:[%s1199_s0 + $0x160] sm:$0xff]  ;;  %29 = vst.msk [vmem:[#allocation2 + $0x38] sm:$0xff] %vm21_vm0, %v710_v52 }
  0x26   :  { %364 = vmatprep.mubr.f32.mxu1 %v56_v5  ;;  %v95_v47 = vld [vmem:[%s1199_s0 + $0x170] sm:$0xff]  ;;  %v98_v48 = vld [vmem:[%s1199_s0 + $0x188] sm:$0x3]  ;;  %v100_v49 = vld [vmem:[%s1199_s0 + $0x198] sm:$0x3]  ;;  %30 = vst.msk [vmem:[#allocation2 + $0x40] sm:$0xff] %vm21_vm0, %v710_v52 }
  0x27   :  { %v97_v50 = vld [vmem:[%s1199_s0 + $0x180] sm:$0x3]  ;;  %v99_v51 = vld [vmem:[%s1199_s0 + $0x190] sm:$0x3]  ;;  %31 = vst.msk [vmem:[#allocation2 + $0x48] sm:$0xff] %vm21_vm0, %v710_v52  ;;  %32 = vst.msk [vmem:[#allocation2 + $0x50] sm:$0xff] %vm21_vm0, %v710_v52 }
  0x28   :  { %235 = vmatmul.mubr.f32.gmra.mxu0 %v53_v6  ;;  %33 = vst.msk [vmem:[#allocation2 + $0x58] sm:$0xff] %vm21_vm0, %v710_v52  ;;  %v36_v59 = vld [vmem:[#allocation2] sm:$0xff]  ;;  %v37_v4 = vld [vmem:[#allocation2 + $0x8] sm:$0xff] }
  0x29   :  { %365 = vmatmul.mubr.f32.gmra.mxu1 %v55_v7  ;;  %239 = vmatprep.mubr.f32.mxu0 %v58_v8  ;;  %35 = vst.msk [vmem:[#allocation2 + $0x60] sm:$0x3] %vm34_vm1, %v710_v52 }
  0x2a   :  { %369 = vmatprep.mubr.f32.mxu1 %v60_v9 }
  0x2c   :  { %240 = vmatmul.mubr.f32.gmra.mxu0 %v57_v10 }
  0x2d   :  { %370 = vmatmul.mubr.f32.gmra.mxu1 %v59_v11  ;;  %244 = vmatprep.mubr.f32.mxu0 %v62_v12 }
  0x2e   :  { %374 = vmatprep.mubr.f32.mxu1 %v64_v13  ;;  %v38_v13 = vld [vmem:[#allocation2 + $0x10] sm:$0xff] }
  0x30   :  { %245 = vmatmul.mubr.f32.gmra.mxu0 %v61_v14 }
  0x31   :  { %375 = vmatmul.mubr.f32.gmra.mxu1 %v63_v15  ;;  %249 = vmatprep.mubr.f32.mxu0 %v66_v16 }
  0x32   :  { %379 = vmatprep.mubr.f32.mxu1 %v68_v17  ;;  %v1102_v17 = vld [vmem:[%s1200_s2] ss:$0 sm:$0xff] }
  0x34   :  { %250 = vmatmul.mubr.f32.gmra.mxu0 %v65_v18 }
  0x35   :  { %380 = vmatmul.mubr.f32.gmra.mxu1 %v67_v19  ;;  %254 = vmatprep.mubr.f32.mxu0 %v70_v20 }
  0x36   :  { %384 = vmatprep.mubr.f32.mxu1 %v72_v21 }
  0x38   :  { %255 = vmatmul.mubr.f32.gmra.mxu0 %v69_v22 }
  0x39   :  { %385 = vmatmul.mubr.f32.gmra.mxu1 %v71_v23  ;;  %259 = vmatprep.mubr.f32.mxu0 %v74_v24  ;;  %v1107_v24 = vld [vmem:[%s1201_s3] ss:$0 sm:$0xff] }
  0x3a   :  { %389 = vmatprep.mubr.f32.mxu1 %v76_v25  ;;  %v39_v25 = vld [vmem:[#allocation2 + $0x18] sm:$0xff] }
  0x3c   :  { %260 = vmatmul.mubr.f32.gmra.mxu0 %v73_v26 }
  0x3d   :  { %390 = vmatmul.mubr.f32.gmra.mxu1 %v75_v27  ;;  %264 = vmatprep.mubr.f32.mxu0 %v78_v28 }
  0x3e   :  { %394 = vmatprep.mubr.f32.mxu1 %v80_v29 }
  0x40   :  { %265 = vmatmul.mubr.f32.gmra.mxu0 %v77_v30 }
  0x41   :  { %395 = vmatmul.mubr.f32.gmra.mxu1 %v79_v31  ;;  %269 = vmatprep.mubr.f32.mxu0 %v82_v32 }
  0x42   :  { %399 = vmatprep.mubr.f32.mxu1 %v84_v33 }
  0x44   :  { %270 = vmatmul.mubr.f32.gmra.mxu0 %v81_v34 }
  0x45   :  { %400 = vmatmul.mubr.f32.gmra.mxu1 %v83_v35  ;;  %274 = vmatprep.mubr.f32.mxu0 %v86_v36 }
  0x46   :  { %404 = vmatprep.mubr.f32.mxu1 %v88_v37  ;;  %v40_v37 = vld [vmem:[#allocation2 + $0x20] sm:$0xff] }
  0x48   :  { %275 = vmatmul.mubr.f32.gmra.mxu0 %v85_v38 }
  0x49   :  { %405 = vmatmul.mubr.f32.gmra.mxu1 %v87_v39  ;;  %279 = vmatprep.mubr.f32.mxu0 %v90_v40 }
  0x4a   :  { %409 = vmatprep.mubr.f32.mxu1 %v92_v41 }
  0x4c   :  { %280 = vmatmul.mubr.f32.gmra.mxu0 %v89_v42 }
  0x4d   :  { %410 = vmatmul.mubr.f32.gmra.mxu1 %v91_v43  ;;  %284 = vmatprep.mubr.f32.mxu0 %v94_v44 }
  0x4e   :  { %414 = vmatprep.mubr.f32.mxu1 %v96_v45 }
  0x50   :  { %285 = vmatmul.mubr.f32.gmra.mxu0 %v93_v46 }
  0x51   :  { %415 = vmatmul.mubr.f32.gmra.mxu1 %v95_v47  ;;  %289 = vmatprep.mubr.f32.mxu0 %v98_v48 }
  0x52   :  { %419 = vmatprep.mubr.f32.mxu1 %v100_v49 }
  0x54   :  { %290 = vmatmul.mubr.f32.gmra.mxu0 %v97_v50 }
  0x55   :  { %420 = vmatmul.mubr.f32.gmra.mxu1 %v99_v51 }
  0xe4   :  { %v599_v53 = vpop.f32.mrf.mxu0 }
  0xe5   :  { %v670_v54 = vpop.f32.mrf.mxu1 }
  0xe6   :  { %v600_v55 = vpop.f32.mrf.mxu0 }
  0xe7   :  { %v671_v56 = vpop.f32.mrf.mxu1  ;;  %v601_v57 = vadd.f32 %v600_v55, %v599_v53  ;;  %v41_v55 = vld [vmem:[#allocation2 + $0x28] sm:$0xff] }
  0xe8   :  { %v672_v58 = vadd.f32 %v671_v56, %v670_v54  ;;  %v602_v60 = vpop.f32.mrf.mxu0 }
  0xe9   :  { %v673_v61 = vpop.f32.mrf.mxu1 }
  0xea   :  { %v362_v62 = vadd.f32 %v672_v58, %v601_v57  ;;  %v603_v63 = vpop.f32.mrf.mxu0 }
  0xeb   :  { %v674_v0 = vpop.f32.mrf.mxu1  ;;  %v604_v2 = vadd.f32 %v603_v63, %v602_v60 }
  0xec   :  { %v425_v1 = vadd.f32 %v362_v62, %v36_v59  ;;  %v675_v3 = vadd.f32 %v674_v0, %v673_v61  ;;  %v605_v5 = vpop.f32.mrf.mxu0 }
  0xed   :  { %v676_v6 = vpop.f32.mrf.mxu1 }
  0xee   :  { %439 = vst.msk [vmem:[#allocation2] sm:$0xff] %vm21_vm0, %v425_v1  ;;  %v367_v7 = vadd.f32 %v675_v3, %v604_v2  ;;  %v606_v8 = vpop.f32.mrf.mxu0  ;;  %v42_v1 = vld [vmem:[#allocation2 + $0x30] sm:$0xff] }
  0xef   :  { %v677_v9 = vpop.f32.mrf.mxu1  ;;  %v607_v11 = vadd.f32 %v606_v8, %v605_v5 }
  0xf0   :  { %v426_v10 = vadd.f32 %v367_v7, %v37_v4  ;;  %v678_v12 = vadd.f32 %v677_v9, %v676_v6  ;;  %v608_v14 = vpop.f32.mrf.mxu0 }
  0xf1   :  { %v679_v15 = vpop.f32.mrf.mxu1 }
  0xf2   :  { %440 = vst.msk [vmem:[#allocation2 + $0x8] sm:$0xff] %vm21_vm0, %v426_v10  ;;  %v372_v16 = vadd.f32 %v678_v12, %v607_v11  ;;  %v609_v18 = vpop.f32.mrf.mxu0 }
  0xf3   :  { %v680_v19 = vpop.f32.mrf.mxu1  ;;  %v610_v21 = vadd.f32 %v609_v18, %v608_v14 }
  0xf4   :  { %v427_v20 = vadd.f32 %v372_v16, %v38_v13  ;;  %v681_v22 = vadd.f32 %v680_v19, %v679_v15  ;;  %v611_v26 = vpop.f32.mrf.mxu0 }
  0xf5   :  { %v456_v23 = vld [vmem:[#allocation2] sm:$0xff]  ;;  %v682_v27 = vpop.f32.mrf.mxu1 }
  0xf6   :  { %v476_v28 = vmul.f32 %v1102_v17, %v456_v23  ;;  %441 = vst.msk [vmem:[#allocation2 + $0x10] sm:$0xff] %vm21_vm0, %v427_v20  ;;  %v377_v29 = vadd.f32 %v681_v22, %v610_v21  ;;  %v612_v30 = vpop.f32.mrf.mxu0  ;;  %v43_v20 = vld [vmem:[#allocation2 + $0x38] sm:$0xff] }
  0xf7   :  { %v683_v31 = vpop.f32.mrf.mxu1  ;;  %v613_v34 = vadd.f32 %v612_v30, %v611_v26  ;;  %v44_v30 = vld [vmem:[#allocation2 + $0x40] sm:$0xff] }
  0xf8   :  { %v496_v32 = vadd.f32 %v1107_v24, %v476_v28  ;;  %v428_v33 = vadd.f32 %v377_v29, %v39_v25  ;;  %v684_v35 = vadd.f32 %v683_v31, %v682_v27  ;;  %v614_v38 = vpop.f32.mrf.mxu0 }
  0xf9   :  { %v457_v36 = vld [vmem:[#allocation2 + $0x8] sm:$0xff]  ;;  %v685_v39 = vpop.f32.mrf.mxu1 }
  0xfa   :  { %vm509_vm2 = vcmp.ge.f32.partialorder %v496_v32, 0.0  ;;  %v522_v40 = vmul.f32 0.2, %v496_v32  ;;  %v477_v41 = vmul.f32 %v1102_v17, %v457_v36  ;;  %442 = vst.msk [vmem:[#allocation2 + $0x18] sm:$0xff] %vm21_vm0, %v428_v33  ;;  %v382_v42 = vadd.f32 %v684_v35, %v613_v34  ;;  %v615_v43 = vpop.f32.mrf.mxu0 }
  0xfb   :  { %v686_v44 = vpop.f32.mrf.mxu1  ;;  %v616_v48 = vadd.f32 %v615_v43, %v614_v38 }
  0xfc   :  { %v535_v45 = vsel %vm509_vm2, %v496_v32, %v522_v40  ;;  %v497_v46 = vadd.f32 %v1107_v24, %v477_v41  ;;  %v429_v47 = vadd.f32 %v382_v42, %v40_v37  ;;  %v687_v50 = vadd.f32 %v686_v44, %v685_v39  ;;  %v617_v51 = vpop.f32.mrf.mxu0 }
  0xfd   :  { %548 = vst.msk [vmem:[%s1202_s4] sm:$0xff] %vm21_vm0, %v535_v45  ;;  %v458_v49 = vld [vmem:[#allocation2 + $0x10] sm:$0xff]  ;;  %v688_v52 = vpop.f32.mrf.mxu1  ;;  %v45_v45 = vld [vmem:[#allocation2 + $0x48] sm:$0xff] }
  0xfe   :  { %vm510_vm3 = vcmp.ge.f32.partialorder %v497_v46, 0.0  ;;  %v523_v53 = vmul.f32 0.2, %v497_v46  ;;  %v478_v54 = vmul.f32 %v1102_v17, %v458_v49  ;;  %443 = vst.msk [vmem:[#allocation2 + $0x20] sm:$0xff] %vm21_vm0, %v429_v47  ;;  %v387_v56 = vadd.f32 %v687_v50, %v616_v48  ;;  %v618_v57 = vpop.f32.mrf.mxu0 }
  0xff   :  { %v689_v58 = vpop.f32.mrf.mxu1  ;;  %v619_v61 = vadd.f32 %v618_v57, %v617_v51 }
 0x100   :  { %v536_v59 = vsel %vm510_vm3, %v497_v46, %v523_v53  ;;  %v498_v60 = vadd.f32 %v1107_v24, %v478_v54  ;;  %v690_v62 = vadd.f32 %v689_v58, %v688_v52  ;;  %v430_v0 = vadd.f32 %v387_v56, %v41_v55  ;;  %v620_v2 = vpop.f32.mrf.mxu0  ;;  %v46_v58 = vld [vmem:[#allocation2 + $0x50] sm:$0xff] }
 0x101   :  { %549 = vst.msk [vmem:[%s1202_s4 + $0x8] sm:$0xff] %vm21_vm0, %v536_v59  ;;  %v459_v63 = vld [vmem:[#allocation2 + $0x18] sm:$0xff]  ;;  %v691_v3 = vpop.f32.mrf.mxu1 }
 0x102   :  { %vm511_vm4 = vcmp.ge.f32.partialorder %v498_v60, 0.0  ;;  %v524_v4 = vmul.f32 0.2, %v498_v60  ;;  %v479_v5 = vmul.f32 %v1102_v17, %v459_v63  ;;  %v392_v6 = vadd.f32 %v690_v62, %v619_v61  ;;  %444 = vst.msk [vmem:[#allocation2 + $0x28] sm:$0xff] %vm21_vm0, %v430_v0  ;;  %v621_v7 = vpop.f32.mrf.mxu0 }
 0x103   :  { %v692_v8 = vpop.f32.mrf.mxu1  ;;  %v622_v12 = vadd.f32 %v621_v7, %v620_v2 }
 0x104   :  { %v537_v9 = vsel %vm511_vm4, %v498_v60, %v524_v4  ;;  %v499_v10 = vadd.f32 %v1107_v24, %v479_v5  ;;  %v431_v11 = vadd.f32 %v392_v6, %v42_v1  ;;  %v693_v14 = vadd.f32 %v692_v8, %v691_v3  ;;  %v623_v15 = vpop.f32.mrf.mxu0 }
 0x105   :  { %550 = vst.msk [vmem:[%s1202_s4 + $0x10] sm:$0xff] %vm21_vm0, %v537_v9  ;;  %v460_v13 = vld [vmem:[#allocation2 + $0x20] sm:$0xff]  ;;  %v694_v16 = vpop.f32.mrf.mxu1  ;;  %v47_v9 = vld [vmem:[#allocation2 + $0x58] sm:$0xff] }
 0x106   :  { %vm512_vm5 = vcmp.ge.f32.partialorder %v499_v10, 0.0  ;;  %v525_v18 = vmul.f32 0.2, %v499_v10  ;;  %v480_v19 = vmul.f32 %v1102_v17, %v460_v13  ;;  %445 = vst.msk [vmem:[#allocation2 + $0x30] sm:$0xff] %vm21_vm0, %v431_v11  ;;  %v397_v21 = vadd.f32 %v693_v14, %v622_v12  ;;  %v624_v22 = vpop.f32.mrf.mxu0 }
 0x107   :  { %v695_v23 = vpop.f32.mrf.mxu1  ;;  %v625_v27 = vadd.f32 %v624_v22, %v623_v15 }
 0x108   :  { %v538_v25 = vsel %vm512_vm5, %v499_v10, %v525_v18  ;;  %v500_v26 = vadd.f32 %v1107_v24, %v480_v19  ;;  %v696_v28 = vadd.f32 %v695_v23, %v694_v16  ;;  %v432_v29 = vadd.f32 %v397_v21, %v43_v20  ;;  %v626_v31 = vpop.f32.mrf.mxu0 }
 0x109   :  { %551 = vst.msk [vmem:[%s1202_s4 + $0x18] sm:$0xff] %vm21_vm0, %v538_v25  ;;  %v697_v32 = vpop.f32.mrf.mxu1  ;;  %v461_v34 = vld [vmem:[#allocation2 + $0x28] sm:$0xff]  ;;  %v48_v25 = vld [vmem:[#allocation2 + $0x60] sm:$0x3] }
 0x10a   :  { %vm513_vm6 = vcmp.ge.f32.partialorder %v500_v26, 0.0  ;;  %v526_v33 = vmul.f32 0.2, %v500_v26  ;;  %v402_v35 = vadd.f32 %v696_v28, %v625_v27  ;;  %v481_v36 = vmul.f32 %v1102_v17, %v461_v34  ;;  %446 = vst.msk [vmem:[#allocation2 + $0x38] sm:$0xff] %vm21_vm0, %v432_v29  ;;  %v627_v37 = vpop.f32.mrf.mxu0 }
 0x10b   :  { %v698_v38 = vpop.f32.mrf.mxu1  ;;  %v628_v41 = vadd.f32 %v627_v37, %v626_v31 }
 0x10c   :  { %v539_v39 = vsel %vm513_vm6, %v500_v26, %v526_v33  ;;  %v433_v40 = vadd.f32 %v402_v35, %v44_v30  ;;  %v699_v42 = vadd.f32 %v698_v38, %v697_v32  ;;  %v501_v43 = vadd.f32 %v1107_v24, %v481_v36  ;;  %v629_v46 = vpop.f32.mrf.mxu0 }
 0x10d   :  { %552 = vst.msk [vmem:[%s1202_s4 + $0x20] sm:$0xff] %vm21_vm0, %v539_v39  ;;  %v462_v44 = vld [vmem:[#allocation2 + $0x30] sm:$0xff]  ;;  %v700_v47 = vpop.f32.mrf.mxu1 }
 0x10e   :  { %v482_v48 = vmul.f32 %v1102_v17, %v462_v44  ;;  %447 = vst.msk [vmem:[#allocation2 + $0x40] sm:$0xff] %vm21_vm0, %v433_v40  ;;  %v407_v49 = vadd.f32 %v699_v42, %v628_v41  ;;  %vm514_vm7 = vcmp.ge.f32.partialorder %v501_v43, 0.0  ;;  %v527_v50 = vmul.f32 0.2, %v501_v43  ;;  %v630_v51 = vpop.f32.mrf.mxu0 }
 0x10f   :  { %v701_v52 = vpop.f32.mrf.mxu1  ;;  %v631_v55 = vadd.f32 %v630_v51, %v629_v46 }
 0x110   :  { %v502_v53 = vadd.f32 %v1107_v24, %v482_v48  ;;  %v434_v54 = vadd.f32 %v407_v49, %v45_v45  ;;  %v702_v56 = vadd.f32 %v701_v52, %v700_v47  ;;  %v540_v57 = vsel %vm514_vm7, %v501_v43, %v527_v50  ;;  %v632_v59 = vpop.f32.mrf.mxu0 }
 0x111   :  { %v703_v60 = vpop.f32.mrf.mxu1  ;;  %553 = vst.msk [vmem:[%s1202_s4 + $0x28] sm:$0xff] %vm21_vm0, %v540_v57  ;;  %v463_v62 = vld [vmem:[#allocation2 + $0x38] sm:$0xff] }
 0x112   :  { %vm515_vm8 = vcmp.ge.f32.partialorder %v502_v53, 0.0  ;;  %v528_v61 = vmul.f32 0.2, %v502_v53  ;;  %448 = vst.msk [vmem:[#allocation2 + $0x48] sm:$0xff] %vm21_vm0, %v434_v54  ;;  %v412_v63 = vadd.f32 %v702_v56, %v631_v55  ;;  %v483_v0 = vmul.f32 %v1102_v17, %v463_v62  ;;  %v633_v1 = vpop.f32.mrf.mxu0 }
 0x113   :  { %v704_v2 = vpop.f32.mrf.mxu1  ;;  %v634_v5 = vadd.f32 %v633_v1, %v632_v59 }
 0x114   :  { %v541_v3 = vsel %vm515_vm8, %v502_v53, %v528_v61  ;;  %v435_v4 = vadd.f32 %v412_v63, %v46_v58  ;;  %v705_v6 = vadd.f32 %v704_v2, %v703_v60  ;;  %v503_v7 = vadd.f32 %v1107_v24, %v483_v0  ;;  %v635_v10 = vpop.f32.mrf.mxu0 }
 0x115   :  { %554 = vst.msk [vmem:[%s1202_s4 + $0x30] sm:$0xff] %vm21_vm0, %v541_v3  ;;  %v464_v8 = vld [vmem:[#allocation2 + $0x40] sm:$0xff]  ;;  %v706_v11 = vpop.f32.mrf.mxu1 }
 0x116   :  { %v484_v12 = vmul.f32 %v1102_v17, %v464_v8  ;;  %449 = vst.msk [vmem:[#allocation2 + $0x50] sm:$0xff] %vm21_vm0, %v435_v4  ;;  %v417_v13 = vadd.f32 %v705_v6, %v634_v5  ;;  %vm516_vm9 = vcmp.ge.f32.partialorder %v503_v7, 0.0  ;;  %v529_v14 = vmul.f32 0.2, %v503_v7  ;;  %v636_v15 = vpop.f32.mrf.mxu0 }
 0x117   :  { %v707_v16 = vpop.f32.mrf.mxu1  ;;  %v637_v20 = vadd.f32 %v636_v15, %v635_v10 }
 0x118   :  { %v504_v18 = vadd.f32 %v1107_v24, %v484_v12  ;;  %v436_v19 = vadd.f32 %v417_v13, %v47_v9  ;;  %v708_v21 = vadd.f32 %v707_v16, %v706_v11  ;;  %v542_v22 = vsel %vm516_vm9, %v503_v7, %v529_v14 }
 0x119   :  { %v465_v23 = vld [vmem:[#allocation2 + $0x48] sm:$0xff]  ;;  %555 = vst.msk [vmem:[%s1202_s4 + $0x38] sm:$0xff] %vm21_vm0, %v542_v22 }
 0x11a   :  { %vm517_vm10 = vcmp.ge.f32.partialorder %v504_v18, 0.0  ;;  %v530_v26 = vmul.f32 0.2, %v504_v18  ;;  %v485_v27 = vmul.f32 %v1102_v17, %v465_v23  ;;  %450 = vst.msk [vmem:[#allocation2 + $0x58] sm:$0xff] %vm21_vm0, %v436_v19  ;;  %v422_v28 = vadd.f32 %v708_v21, %v637_v20 }
 0x11c   :  { %v543_v29 = vsel %vm517_vm10, %v504_v18, %v530_v26  ;;  %v505_v30 = vadd.f32 %v1107_v24, %v485_v27  ;;  %v437_v31 = vadd.f32 %v422_v28, %v48_v25 }
 0x11d   :  { %556 = vst.msk [vmem:[%s1202_s4 + $0x40] sm:$0xff] %vm21_vm0, %v543_v29  ;;  %v466_v32 = vld [vmem:[#allocation2 + $0x50] sm:$0xff] }
 0x11e   :  { %vm518_vm11 = vcmp.ge.f32.partialorder %v505_v30, 0.0  ;;  %v531_v33 = vmul.f32 0.2, %v505_v30  ;;  %v486_v34 = vmul.f32 %v1102_v17, %v466_v32  ;;  %452 = vst.msk [vmem:[#allocation2 + $0x60] sm:$0x3] %vm34_vm1, %v437_v31 }
 0x120   :  { %v544_v35 = vsel %vm518_vm11, %v505_v30, %v531_v33  ;;  %v506_v36 = vadd.f32 %v1107_v24, %v486_v34 }
 0x121   :  { %557 = vst.msk [vmem:[%s1202_s4 + $0x48] sm:$0xff] %vm21_vm0, %v544_v35  ;;  %v467_v37 = vld [vmem:[#allocation2 + $0x58] sm:$0xff] }
 0x122   :  { %vm519_vm12 = vcmp.ge.f32.partialorder %v506_v36, 0.0  ;;  %v532_v38 = vmul.f32 0.2, %v506_v36  ;;  %v487_v39 = vmul.f32 %v1102_v17, %v467_v37 }
 0x124   :  { %v545_v40 = vsel %vm519_vm12, %v506_v36, %v532_v38  ;;  %v507_v41 = vadd.f32 %v1107_v24, %v487_v39 }
 0x125   :  { %558 = vst.msk [vmem:[%s1202_s4 + $0x50] sm:$0xff] %vm21_vm0, %v545_v40  ;;  %v468_v42 = vld [vmem:[#allocation2 + $0x60] sm:$0x3] }
 0x126   :  { %vm520_vm13 = vcmp.ge.f32.partialorder %v507_v41, 0.0  ;;  %v533_v43 = vmul.f32 0.2, %v507_v41  ;;  %v488_v44 = vmul.f32 %v1102_v17, %v468_v42 }
 0x128   :  { %v546_v45 = vsel %vm520_vm13, %v507_v41, %v533_v43  ;;  %v508_v46 = vadd.f32 %v1107_v24, %v488_v44 }
 0x129   :  { %559 = vst.msk [vmem:[%s1202_s4 + $0x58] sm:$0xff] %vm21_vm0, %v546_v45 }
 0x12a   :  { %vm521_vm14 = vcmp.ge.f32.partialorder %v508_v46, 0.0  ;;  %v534_v47 = vmul.f32 0.2, %v508_v46 }
 0x12c   :  { %v547_v48 = vsel %vm521_vm14, %v508_v46, %v534_v47 }
 0x12d   :  { %560 = vst.msk [vmem:[%s1202_s4 + $0x60] sm:$0x3] %vm34_vm1, %v547_v48 }

// kernel: fast_discriminator_forward.6
= control target key start
LH: loop header
LB: loop body
LE: loop exit
PB: predicated region body
PF: predicated region fallthrough
CT: control target
= control target key end

     0   :  { %s2141_s1 = inlined_call_operand.vmem [shape: f32[1024,128], index: 1, kind: input, shape index: {}]   ;;  %s2142_s0 = inlined_call_operand.vmem [shape: f32[98,1024], index: 0, kind: input, shape index: {}]   ;;  %s2143_s2 = inlined_call_operand.vmem [shape: f32[1,128], index: 2, kind: input, shape index: {}]   ;;  %s2144_s3 = inlined_call_operand.vmem [shape: f32[1,128], index: 3, kind: input, shape index: {}]   ;;  %s2145_s4 = inlined_call_operand.vmem [shape: f32[98,128], index: 4, kind: output, shape index: {}]  }
   0x1   :  { %v182_v0 = vld [vmem:[%s2141_s1 + $0xf8] sm:$0xff]  ;;  %v181_v4 = vld [vmem:[%s2141_s1 + $0xf0] sm:$0xff]  ;;  %v180_v8 = vld [vmem:[%s2141_s1 + $0xe8] sm:$0xff] }
   0x2   :  { %v214_v1 = vld [vmem:[%s2141_s1 + $0x1f8] sm:$0xff]  ;;  %939 = vmatprep.subr.mxu0 %v182_v0  ;;  %v213_v5 = vld [vmem:[%s2141_s1 + $0x1f0] sm:$0xff]  ;;  %v212_v9 = vld [vmem:[%s2141_s1 + $0x1e8] sm:$0xff] }
   0x3   :  { %v166_v2 = vld [vmem:[%s2141_s1 + $0x78] sm:$0xff]  ;;  %1010 = vmatprep.subr.mxu1 %v214_v1  ;;  %v165_v6 = vld [vmem:[%s2141_s1 + $0x70] sm:$0xff]  ;;  %v164_v10 = vld [vmem:[%s2141_s1 + $0x68] sm:$0xff] }
   0x4   :  { %v198_v3 = vld [vmem:[%s2141_s1 + $0x178] sm:$0xff]  ;;  %940 = vmatpush3.msra.mxu0 %v166_v2  ;;  %v197_v7 = vld [vmem:[%s2141_s1 + $0x170] sm:$0xff]  ;;  %v196_v11 = vld [vmem:[%s2141_s1 + $0x168] sm:$0xff] }
   0x5   :  { %1011 = vmatpush3.msra.mxu1 %v198_v3  ;;  %941 = vmatprep.subr.mxu0 %v181_v4  ;;  %v179_v12 = vld [vmem:[%s2141_s1 + $0xe0] sm:$0xff]  ;;  %v178_v16 = vld [vmem:[%s2141_s1 + $0xd8] sm:$0xff]  ;;  %v177_v20 = vld [vmem:[%s2141_s1 + $0xd0] sm:$0xff] }
   0x6   :  { %1012 = vmatprep.subr.mxu1 %v213_v5  ;;  %942 = vmatpush3.msra.mxu0 %v165_v6  ;;  %v211_v13 = vld [vmem:[%s2141_s1 + $0x1e0] sm:$0xff]  ;;  %v210_v17 = vld [vmem:[%s2141_s1 + $0x1d8] sm:$0xff]  ;;  %v209_v21 = vld [vmem:[%s2141_s1 + $0x1d0] sm:$0xff] }
   0x7   :  { %1013 = vmatpush3.msra.mxu1 %v197_v7  ;;  %943 = vmatprep.subr.mxu0 %v180_v8  ;;  %v163_v14 = vld [vmem:[%s2141_s1 + $0x60] sm:$0xff]  ;;  %v162_v18 = vld [vmem:[%s2141_s1 + $0x58] sm:$0xff]  ;;  %v161_v22 = vld [vmem:[%s2141_s1 + $0x50] sm:$0xff] }
   0x8   :  { %1014 = vmatprep.subr.mxu1 %v212_v9  ;;  %v195_v15 = vld [vmem:[%s2141_s1 + $0x160] sm:$0xff]  ;;  %944 = vmatpush3.msra.mxu0 %v164_v10  ;;  %v194_v19 = vld [vmem:[%s2141_s1 + $0x158] sm:$0xff]  ;;  %v193_v23 = vld [vmem:[%s2141_s1 + $0x150] sm:$0xff] }
   0x9   :  { %1015 = vmatpush3.msra.mxu1 %v196_v11  ;;  %945 = vmatprep.subr.mxu0 %v179_v12  ;;  %v176_v24 = vld [vmem:[%s2141_s1 + $0xc8] sm:$0xff]  ;;  %v175_v28 = vld [vmem:[%s2141_s1 + $0xc0] sm:$0xff]  ;;  %v174_v32 = vld [vmem:[%s2141_s1 + $0xb8] sm:$0xff] }
   0xa   :  { %1016 = vmatprep.subr.mxu1 %v211_v13  ;;  %946 = vmatpush3.msra.mxu0 %v163_v14  ;;  %v208_v25 = vld [vmem:[%s2141_s1 + $0x1c8] sm:$0xff]  ;;  %v207_v29 = vld [vmem:[%s2141_s1 + $0x1c0] sm:$0xff]  ;;  %v206_v33 = vld [vmem:[%s2141_s1 + $0x1b8] sm:$0xff] }
   0xb   :  { %1017 = vmatpush3.msra.mxu1 %v195_v15  ;;  %947 = vmatprep.subr.mxu0 %v178_v16  ;;  %v160_v26 = vld [vmem:[%s2141_s1 + $0x48] sm:$0xff]  ;;  %v159_v30 = vld [vmem:[%s2141_s1 + $0x40] sm:$0xff]  ;;  %v158_v34 = vld [vmem:[%s2141_s1 + $0x38] sm:$0xff] }
   0xc   :  { %1018 = vmatprep.subr.mxu1 %v210_v17  ;;  %948 = vmatpush3.msra.mxu0 %v162_v18  ;;  %v192_v27 = vld [vmem:[%s2141_s1 + $0x148] sm:$0xff]  ;;  %v191_v31 = vld [vmem:[%s2141_s1 + $0x140] sm:$0xff]  ;;  %v190_v35 = vld [vmem:[%s2141_s1 + $0x138] sm:$0xff] }
   0xd   :  { %1019 = vmatpush3.msra.mxu1 %v194_v19  ;;  %949 = vmatprep.subr.mxu0 %v177_v20  ;;  %v173_v36 = vld [vmem:[%s2141_s1 + $0xb0] sm:$0xff]  ;;  %v172_v40 = vld [vmem:[%s2141_s1 + $0xa8] sm:$0xff]  ;;  %v171_v44 = vld [vmem:[%s2141_s1 + $0xa0] sm:$0xff] }
   0xe   :  { %1020 = vmatprep.subr.mxu1 %v209_v21  ;;  %950 = vmatpush3.msra.mxu0 %v161_v22  ;;  %v205_v37 = vld [vmem:[%s2141_s1 + $0x1b0] sm:$0xff]  ;;  %v204_v41 = vld [vmem:[%s2141_s1 + $0x1a8] sm:$0xff]  ;;  %v203_v45 = vld [vmem:[%s2141_s1 + $0x1a0] sm:$0xff] }
   0xf   :  { %1021 = vmatpush3.msra.mxu1 %v193_v23  ;;  %951 = vmatprep.subr.mxu0 %v176_v24  ;;  %v157_v38 = vld [vmem:[%s2141_s1 + $0x30] sm:$0xff]  ;;  %v156_v42 = vld [vmem:[%s2141_s1 + $0x28] sm:$0xff]  ;;  %v155_v46 = vld [vmem:[%s2141_s1 + $0x20] sm:$0xff] }
  0x10   :  { %1022 = vmatprep.subr.mxu1 %v208_v25  ;;  %952 = vmatpush3.msra.mxu0 %v160_v26  ;;  %v189_v39 = vld [vmem:[%s2141_s1 + $0x130] sm:$0xff]  ;;  %v188_v43 = vld [vmem:[%s2141_s1 + $0x128] sm:$0xff]  ;;  %v187_v47 = vld [vmem:[%s2141_s1 + $0x120] sm:$0xff] }
  0x11   :  { %1023 = vmatpush3.msra.mxu1 %v192_v27  ;;  %953 = vmatprep.subr.mxu0 %v175_v28  ;;  %v170_v48 = vld [vmem:[%s2141_s1 + $0x98] sm:$0xff]  ;;  %v169_v52 = vld [vmem:[%s2141_s1 + $0x90] sm:$0xff]  ;;  %v168_v56 = vld [vmem:[%s2141_s1 + $0x88] sm:$0xff] }
  0x12   :  { %1024 = vmatprep.subr.mxu1 %v207_v29  ;;  %954 = vmatpush3.msra.mxu0 %v159_v30  ;;  %v202_v49 = vld [vmem:[%s2141_s1 + $0x198] sm:$0xff]  ;;  %v201_v53 = vld [vmem:[%s2141_s1 + $0x190] sm:$0xff]  ;;  %v200_v57 = vld [vmem:[%s2141_s1 + $0x188] sm:$0xff] }
  0x13   :  { %1025 = vmatpush3.msra.mxu1 %v191_v31  ;;  %955 = vmatprep.subr.mxu0 %v174_v32  ;;  %v154_v50 = vld [vmem:[%s2141_s1 + $0x18] sm:$0xff]  ;;  %v153_v54 = vld [vmem:[%s2141_s1 + $0x10] sm:$0xff]  ;;  %v152_v58 = vld [vmem:[%s2141_s1 + $0x8] sm:$0xff] }
  0x14   :  { %1026 = vmatprep.subr.mxu1 %v206_v33  ;;  %956 = vmatpush3.msra.mxu0 %v158_v34  ;;  %v186_v51 = vld [vmem:[%s2141_s1 + $0x118] sm:$0xff]  ;;  %v185_v55 = vld [vmem:[%s2141_s1 + $0x110] sm:$0xff]  ;;  %v184_v59 = vld [vmem:[%s2141_s1 + $0x108] sm:$0xff] }
  0x15   :  { %1027 = vmatpush3.msra.mxu1 %v190_v35  ;;  %957 = vmatprep.subr.mxu0 %v173_v36  ;;  %v167_v60 = vld [vmem:[%s2141_s1 + $0x80] sm:$0xff]  ;;  %v48_v63 = vld [vmem:[%s2142_s0 + $0x8] sm:$0xff]  ;;  %v50_v1 = vld [vmem:[%s2142_s0 + $0x18] sm:$0xff] }
  0x16   :  { %1028 = vmatprep.subr.mxu1 %v205_v37  ;;  %958 = vmatpush3.msra.mxu0 %v157_v38  ;;  %v199_v61 = vld [vmem:[%s2141_s1 + $0x180] sm:$0xff]  ;;  %v49_v3 = vld [vmem:[%s2142_s0 + $0x10] sm:$0xff]  ;;  %v246_v4 = vld [vmem:[%s2141_s1 + $0x2f8] sm:$0xff] }
  0x17   :  { %1029 = vmatpush3.msra.mxu1 %v189_v39  ;;  %959 = vmatprep.subr.mxu0 %v172_v40  ;;  %v151_v62 = vld [vmem:[%s2141_s1] sm:$0xff]  ;;  %v278_v5 = vld [vmem:[%s2141_s1 + $0x3f8] sm:$0xff]  ;;  %v56_v7 = vld [vmem:[%s2142_s0 + $0x48] sm:$0xff] }
  0x18   :  { %1030 = vmatprep.subr.mxu1 %v204_v41  ;;  %960 = vmatpush3.msra.mxu0 %v156_v42  ;;  %v183_v0 = vld [vmem:[%s2141_s1 + $0x100] sm:$0xff]  ;;  %v230_v6 = vld [vmem:[%s2141_s1 + $0x278] sm:$0xff]  ;;  %v57_v11 = vld [vmem:[%s2142_s0 + $0x50] sm:$0xff] }
  0x19   :  { %1031 = vmatpush3.msra.mxu1 %v188_v43  ;;  %961 = vmatprep.subr.mxu0 %v171_v44  ;;  %v47_v2 = vld [vmem:[%s2142_s0] sm:$0xff]  ;;  %v58_v8 = vld [vmem:[%s2142_s0 + $0x58] sm:$0xff]  ;;  %v245_v12 = vld [vmem:[%s2141_s1 + $0x2f0] sm:$0xff] }
  0x1a   :  { %1032 = vmatprep.subr.mxu1 %v203_v45  ;;  %962 = vmatpush3.msra.mxu0 %v155_v46  ;;  %v262_v9 = vld [vmem:[%s2141_s1 + $0x378] sm:$0xff]  ;;  %v55_v10 = vld [vmem:[%s2142_s0 + $0x40] sm:$0xff]  ;;  %v277_v13 = vld [vmem:[%s2141_s1 + $0x3f0] sm:$0xff] }
  0x1b   :  { %1033 = vmatpush3.msra.mxu1 %v187_v47  ;;  %963 = vmatprep.subr.mxu0 %v170_v48  ;;  %v229_v14 = vld [vmem:[%s2141_s1 + $0x270] sm:$0xff]  ;;  %v64_v15 = vld [vmem:[%s2142_s0 + $0x88] sm:$0xff]  ;;  %v66_v16 = vld [vmem:[%s2142_s0 + $0x98] sm:$0xff] }
  0x1c   :  { %1034 = vmatprep.subr.mxu1 %v202_v49  ;;  %964 = vmatpush3.msra.mxu0 %v154_v50  ;;  %v244_v17 = vld [vmem:[%s2141_s1 + $0x2e8] sm:$0xff]  ;;  %v261_v18 = vld [vmem:[%s2141_s1 + $0x370] sm:$0xff]  ;;  %v63_v19 = vld [vmem:[%s2142_s0 + $0x80] sm:$0xff] }
  0x1d   :  { %1035 = vmatpush3.msra.mxu1 %v186_v51  ;;  %965 = vmatprep.subr.mxu0 %v169_v52  ;;  %v65_v20 = vld [vmem:[%s2142_s0 + $0x90] sm:$0xff]  ;;  %v228_v21 = vld [vmem:[%s2141_s1 + $0x268] sm:$0xff]  ;;  %v243_v23 = vld [vmem:[%s2141_s1 + $0x2e0] sm:$0xff] }
  0x1e   :  { %1036 = vmatprep.subr.mxu1 %v201_v53  ;;  %966 = vmatpush3.msra.mxu0 %v153_v54  ;;  %v276_v22 = vld [vmem:[%s2141_s1 + $0x3e8] sm:$0xff]  ;;  %v74_v26 = vld [vmem:[%s2142_s0 + $0xd8] sm:$0xff]  ;;  %v227_v27 = vld [vmem:[%s2141_s1 + $0x260] sm:$0xff] }
  0x1f   :  { %1037 = vmatpush3.msra.mxu1 %v185_v55  ;;  %967 = vmatprep.subr.mxu0 %v168_v56  ;;  %v260_v24 = vld [vmem:[%s2141_s1 + $0x368] sm:$0xff]  ;;  %v71_v28 = vld [vmem:[%s2142_s0 + $0xc0] sm:$0xff]  ;;  %v73_v29 = vld [vmem:[%s2142_s0 + $0xd0] sm:$0xff] }
  0x20   :  { %1038 = vmatprep.subr.mxu1 %v200_v57  ;;  %968 = vmatpush3.msra.mxu0 %v152_v58  ;;  %v72_v25 = vld [vmem:[%s2142_s0 + $0xc8] sm:$0xff]  ;;  %v275_v30 = vld [vmem:[%s2141_s1 + $0x3e0] sm:$0xff]  ;;  %v242_v31 = vld [vmem:[%s2141_s1 + $0x2d8] sm:$0xff] }
  0x21   :  { %1039 = vmatpush3.msra.mxu1 %v184_v59  ;;  %969 = vmatprep.subr.mxu0 %v167_v60  ;;  %v259_v32 = vld [vmem:[%s2141_s1 + $0x360] sm:$0xff]  ;;  %v226_v33 = vld [vmem:[%s2141_s1 + $0x258] sm:$0xff]  ;;  %v80_v34 = vld [vmem:[%s2142_s0 + $0x108] sm:$0xff] }
  0x22   :  { %1040 = vmatprep.subr.mxu1 %v199_v61  ;;  %970 = vmatpush3.msra.mxu0 %v151_v62  ;;  %v82_v35 = vld [vmem:[%s2142_s0 + $0x118] sm:$0xff]  ;;  %v79_v37 = vld [vmem:[%s2142_s0 + $0x100] sm:$0xff]  ;;  %v81_v38 = vld [vmem:[%s2142_s0 + $0x110] sm:$0xff] }
  0x23   :  { %343 = vmatprep.mubr.f32.mxu0 %v48_v63  ;;  %1041 = vmatpush3.msra.mxu1 %v183_v0  ;;  %v274_v36 = vld [vmem:[%s2141_s1 + $0x3d8] sm:$0xff]  ;;  %v241_v39 = vld [vmem:[%s2141_s1 + $0x2d0] sm:$0xff]  ;;  %v88_v42 = vld [vmem:[%s2142_s0 + $0x148] sm:$0xff] }
  0x24   :  { %473 = vmatprep.mubr.f32.mxu1 %v50_v1  ;;  %344 = vmatmul.mubr.f32.vlgmr.msra.gmra.mxu0 %v47_v2  ;;  %v258_v40 = vld [vmem:[%s2141_s1 + $0x358] sm:$0xff]  ;;  %v225_v41 = vld [vmem:[%s2141_s1 + $0x250] sm:$0xff]  ;;  %v87_v45 = vld [vmem:[%s2142_s0 + $0x140] sm:$0xff] }
  0x25   :  { %474 = vmatmul.mubr.f32.vlgmr.msra.gmra.mxu1 %v49_v3  ;;  %1081 = vmatprep.subr.mxu0 %v246_v4  ;;  %v90_v43 = vld [vmem:[%s2142_s0 + $0x158] sm:$0xff]  ;;  %v273_v44 = vld [vmem:[%s2141_s1 + $0x3d0] sm:$0xff]  ;;  %v240_v47 = vld [vmem:[%s2141_s1 + $0x2c8] sm:$0xff] }
  0x26   :  { %1152 = vmatprep.subr.mxu1 %v278_v5  ;;  %1082 = vmatpush3.msra.mxu0 %v230_v6  ;;  %v89_v46 = vld [vmem:[%s2142_s0 + $0x150] sm:$0xff]  ;;  %v224_v49 = vld [vmem:[%s2141_s1 + $0x248] sm:$0xff]  ;;  %v98_v52 = vld [vmem:[%s2142_s0 + $0x198] sm:$0xff] }
  0x27   :  { %348 = vmatprep.mubr.f32.mxu0 %v56_v7  ;;  %478 = vmatprep.mubr.f32.mxu1 %v58_v8  ;;  %v257_v48 = vld [vmem:[%s2141_s1 + $0x350] sm:$0xff]  ;;  %v272_v50 = vld [vmem:[%s2141_s1 + $0x3c8] sm:$0xff]  ;;  %v239_v53 = vld [vmem:[%s2141_s1 + $0x2c0] sm:$0xff] }
  0x28   :  { %1153 = vmatpush3.msra.mxu1 %v262_v9  ;;  %349 = vmatmul.mubr.f32.gmra.mxu0 %v55_v10  ;;  %v96_v51 = vld [vmem:[%s2142_s0 + $0x188] sm:$0xff]  ;;  %v95_v55 = vld [vmem:[%s2142_s0 + $0x180] sm:$0xff]  ;;  %v97_v56 = vld [vmem:[%s2142_s0 + $0x190] sm:$0xff] }
  0x29   :  { %479 = vmatmul.mubr.f32.gmra.mxu1 %v57_v11  ;;  %1083 = vmatprep.subr.mxu0 %v245_v12  ;;  %v256_v54 = vld [vmem:[%s2141_s1 + $0x348] sm:$0xff]  ;;  %v223_v57 = vld [vmem:[%s2141_s1 + $0x240] sm:$0xff]  ;;  %v238_v59 = vld [vmem:[%s2141_s1 + $0x2b8] sm:$0xff] }
  0x2a   :  { %1154 = vmatprep.subr.mxu1 %v277_v13  ;;  %1084 = vmatpush3.msra.mxu0 %v229_v14  ;;  %v271_v58 = vld [vmem:[%s2141_s1 + $0x3c0] sm:$0xff]  ;;  %v104_v61 = vld [vmem:[%s2142_s0 + $0x1c8] sm:$0xff]  ;;  %v106_v62 = vld [vmem:[%s2142_s0 + $0x1d8] sm:$0xff] }
  0x2b   :  { %353 = vmatprep.mubr.f32.mxu0 %v64_v15  ;;  %483 = vmatprep.mubr.f32.mxu1 %v66_v16  ;;  %v255_v60 = vld [vmem:[%s2141_s1 + $0x340] sm:$0xff]  ;;  %v222_v63 = vld [vmem:[%s2141_s1 + $0x238] sm:$0xff]  ;;  %v105_v1 = vld [vmem:[%s2142_s0 + $0x1d0] sm:$0xff] }
  0x2c   :  { %1085 = vmatprep.subr.mxu0 %v244_v17  ;;  %1155 = vmatpush3.msra.mxu1 %v261_v18  ;;  %v103_v0 = vld [vmem:[%s2142_s0 + $0x1c0] sm:$0xff]  ;;  %v270_v2 = vld [vmem:[%s2141_s1 + $0x3b8] sm:$0xff]  ;;  %v237_v3 = vld [vmem:[%s2141_s1 + $0x2b0] sm:$0xff] }
  0x2d   :  { %354 = vmatmul.mubr.f32.gmra.mxu0 %v63_v19  ;;  %484 = vmatmul.mubr.f32.gmra.mxu1 %v65_v20  ;;  %v254_v4 = vld [vmem:[%s2141_s1 + $0x338] sm:$0xff]  ;;  %v112_v5 = vld [vmem:[%s2142_s0 + $0x208] sm:$0xff]  ;;  %v221_v7 = vld [vmem:[%s2141_s1 + $0x230] sm:$0xff] }
  0x2e   :  { %1086 = vmatpush3.msra.mxu0 %v228_v21  ;;  %1156 = vmatprep.subr.mxu1 %v276_v22  ;;  %v114_v6 = vld [vmem:[%s2142_s0 + $0x218] sm:$0xff]  ;;  %v111_v8 = vld [vmem:[%s2142_s0 + $0x200] sm:$0xff]  ;;  %v113_v9 = vld [vmem:[%s2142_s0 + $0x210] sm:$0xff] }
  0x2f   :  { %1087 = vmatprep.subr.mxu0 %v243_v23  ;;  %1157 = vmatpush3.msra.mxu1 %v260_v24  ;;  %v269_v10 = vld [vmem:[%s2141_s1 + $0x3b0] sm:$0xff]  ;;  %v236_v11 = vld [vmem:[%s2141_s1 + $0x2a8] sm:$0xff]  ;;  %v122_v15 = vld [vmem:[%s2142_s0 + $0x258] sm:$0xff] }
  0x30   :  { %358 = vmatprep.mubr.f32.mxu0 %v72_v25  ;;  %488 = vmatprep.mubr.f32.mxu1 %v74_v26  ;;  %v253_v12 = vld [vmem:[%s2141_s1 + $0x330] sm:$0xff]  ;;  %v220_v13 = vld [vmem:[%s2141_s1 + $0x228] sm:$0xff]  ;;  %v119_v17 = vld [vmem:[%s2142_s0 + $0x240] sm:$0xff] }
  0x31   :  { %1088 = vmatpush3.msra.mxu0 %v227_v27  ;;  %489 = vmatmul.mubr.f32.gmra.mxu1 %v73_v29  ;;  %v120_v14 = vld [vmem:[%s2142_s0 + $0x248] sm:$0xff]  ;;  %v121_v18 = vld [vmem:[%s2142_s0 + $0x250] sm:$0xff]  ;;  %v235_v19 = vld [vmem:[%s2141_s1 + $0x2a0] sm:$0xff] }
  0x32   :  { %359 = vmatmul.mubr.f32.gmra.mxu0 %v71_v28  ;;  %1158 = vmatprep.subr.mxu1 %v275_v30  ;;  %v268_v16 = vld [vmem:[%s2141_s1 + $0x3a8] sm:$0xff]  ;;  %v219_v21 = vld [vmem:[%s2141_s1 + $0x220] sm:$0xff]  ;;  %v130_v24 = vld [vmem:[%s2142_s0 + $0x298] sm:$0xff] }
  0x33   :  { %1089 = vmatprep.subr.mxu0 %v242_v31  ;;  %1159 = vmatpush3.msra.mxu1 %v259_v32  ;;  %v252_v20 = vld [vmem:[%s2141_s1 + $0x328] sm:$0xff]  ;;  %v267_v22 = vld [vmem:[%s2141_s1 + $0x3a0] sm:$0xff]  ;;  %v234_v25 = vld [vmem:[%s2141_s1 + $0x298] sm:$0xff] }
  0x34   :  { %1090 = vmatpush3.msra.mxu0 %v226_v33  ;;  %363 = vmatprep.mubr.f32.mxu0 %v80_v34  ;;  %v128_v23 = vld [vmem:[%s2142_s0 + $0x288] sm:$0xff]  ;;  %v251_v26 = vld [vmem:[%s2141_s1 + $0x320] sm:$0xff]  ;;  %v129_v28 = vld [vmem:[%s2142_s0 + $0x290] sm:$0xff] }
  0x35   :  { %493 = vmatprep.mubr.f32.mxu1 %v82_v35  ;;  %1160 = vmatprep.subr.mxu1 %v274_v36  ;;  %v127_v27 = vld [vmem:[%s2142_s0 + $0x280] sm:$0xff]  ;;  %v218_v29 = vld [vmem:[%s2141_s1 + $0x218] sm:$0xff]  ;;  %v136_v31 = vld [vmem:[%s2142_s0 + $0x2c8] sm:$0xff] }
  0x36   :  { %364 = vmatmul.mubr.f32.gmra.mxu0 %v79_v37  ;;  %494 = vmatmul.mubr.f32.gmra.mxu1 %v81_v38  ;;  %v266_v30 = vld [vmem:[%s2141_s1 + $0x398] sm:$0xff]  ;;  %v233_v34 = vld [vmem:[%s2141_s1 + $0x290] sm:$0xff]  ;;  %v135_v35 = vld [vmem:[%s2142_s0 + $0x2c0] sm:$0xff] }
  0x37   :  { %1091 = vmatprep.subr.mxu0 %v241_v39  ;;  %1161 = vmatpush3.msra.mxu1 %v258_v40  ;;  %v250_v32 = vld [vmem:[%s2141_s1 + $0x318] sm:$0xff]  ;;  %v137_v36 = vld [vmem:[%s2142_s0 + $0x2d0] sm:$0xff]  ;;  %v232_v39 = vld [vmem:[%s2141_s1 + $0x288] sm:$0xff] }
  0x38   :  { %1092 = vmatpush3.msra.mxu0 %v225_v41  ;;  %368 = vmatprep.mubr.f32.mxu0 %v88_v42  ;;  %v138_v33 = vld [vmem:[%s2142_s0 + $0x2d8] sm:$0xff]  ;;  %v217_v37 = vld [vmem:[%s2141_s1 + $0x210] sm:$0xff]  ;;  %v144_v41 = vld [vmem:[%s2142_s0 + $0x308] sm:$0x3] }
  0x39   :  { %498 = vmatprep.mubr.f32.mxu1 %v90_v43  ;;  %1162 = vmatprep.subr.mxu1 %v273_v44  ;;  %v265_v38 = vld [vmem:[%s2141_s1 + $0x390] sm:$0xff]  ;;  %v146_v42 = vld [vmem:[%s2142_s0 + $0x318] sm:$0x3]  ;;  %v216_v43 = vld [vmem:[%s2141_s1 + $0x208] sm:$0xff] }
  0x3a   :  { %369 = vmatmul.mubr.f32.gmra.mxu0 %v87_v45  ;;  %499 = vmatmul.mubr.f32.gmra.mxu1 %v89_v46  ;;  %v249_v40 = vld [vmem:[%s2141_s1 + $0x310] sm:$0xff]  ;;  %v143_v44 = vld [vmem:[%s2142_s0 + $0x300] sm:$0x3]  ;;  %v264_v46 = vld [vmem:[%s2141_s1 + $0x388] sm:$0xff] }
  0x3b   :  { %1093 = vmatprep.subr.mxu0 %v240_v47  ;;  %1163 = vmatpush3.msra.mxu1 %v257_v48  ;;  %v145_v45 = vld [vmem:[%s2142_s0 + $0x310] sm:$0x3]  ;;  %v231_v47 = vld [vmem:[%s2141_s1 + $0x280] sm:$0xff]  ;;  %v248_v48 = vld [vmem:[%s2141_s1 + $0x308] sm:$0xff] }
  0x3c   :  { %1094 = vmatpush3.msra.mxu0 %v224_v49  ;;  %1164 = vmatprep.subr.mxu1 %v272_v50  ;;  %v215_v49 = vld [vmem:[%s2141_s1 + $0x200] sm:$0xff]  ;;  %v52_v50 = vld [vmem:[%s2142_s0 + $0x28] sm:$0xff] }
  0x3d   :  { %373 = vmatprep.mubr.f32.mxu0 %v96_v51  ;;  %503 = vmatprep.mubr.f32.mxu1 %v98_v52  ;;  %v263_v51 = vld [vmem:[%s2141_s1 + $0x380] sm:$0xff] }
  0x3e   :  { %1095 = vmatprep.subr.mxu0 %v239_v53  ;;  %1165 = vmatpush3.msra.mxu1 %v256_v54  ;;  %v51_v52 = vld [vmem:[%s2142_s0 + $0x20] sm:$0xff]  ;;  %v54_v54 = vld [vmem:[%s2142_s0 + $0x38] sm:$0xff] }
  0x3f   :  { %374 = vmatmul.mubr.f32.gmra.mxu0 %v95_v55  ;;  %504 = vmatmul.mubr.f32.gmra.mxu1 %v97_v56  ;;  %v247_v53 = vld [vmem:[%s2141_s1 + $0x300] sm:$0xff]  ;;  %v60_v55 = vld [vmem:[%s2142_s0 + $0x68] sm:$0xff]  ;;  %v53_v56 = vld [vmem:[%s2142_s0 + $0x30] sm:$0xff] }
  0x40   :  { %1096 = vmatpush3.msra.mxu0 %v223_v57  ;;  %1166 = vmatprep.subr.mxu1 %v271_v58  ;;  %v62_v57 = vld [vmem:[%s2142_s0 + $0x78] sm:$0xff]  ;;  %v59_v58 = vld [vmem:[%s2142_s0 + $0x60] sm:$0xff] }
  0x41   :  { %1097 = vmatprep.subr.mxu0 %v238_v59  ;;  %1167 = vmatpush3.msra.mxu1 %v255_v60  ;;  %v68_v59 = vld [vmem:[%s2142_s0 + $0xa8] sm:$0xff]  ;;  %v61_v60 = vld [vmem:[%s2142_s0 + $0x70] sm:$0xff] }
  0x42   :  { %378 = vmatprep.mubr.f32.mxu0 %v104_v61  ;;  %508 = vmatprep.mubr.f32.mxu1 %v106_v62  ;;  %v70_v61 = vld [vmem:[%s2142_s0 + $0xb8] sm:$0xff]  ;;  %v67_v62 = vld [vmem:[%s2142_s0 + $0xa0] sm:$0xff] }
  0x43   :  { %1098 = vmatpush3.msra.mxu0 %v222_v63  ;;  %509 = vmatmul.mubr.f32.gmra.mxu1 %v105_v1  ;;  %v76_v63 = vld [vmem:[%s2142_s0 + $0xe8] sm:$0xff]  ;;  %v78_v1 = vld [vmem:[%s2142_s0 + $0xf8] sm:$0xff] }
  0x44   :  { %379 = vmatmul.mubr.f32.gmra.mxu0 %v103_v0  ;;  %1168 = vmatprep.subr.mxu1 %v270_v2  ;;  %v69_v0 = vld [vmem:[%s2142_s0 + $0xb0] sm:$0xff]  ;;  %v75_v2 = vld [vmem:[%s2142_s0 + $0xe0] sm:$0xff] }
  0x45   :  { %1099 = vmatprep.subr.mxu0 %v237_v3  ;;  %1169 = vmatpush3.msra.mxu1 %v254_v4  ;;  %v84_v3 = vld [vmem:[%s2142_s0 + $0x128] sm:$0xff]  ;;  %v77_v4 = vld [vmem:[%s2142_s0 + $0xf0] sm:$0xff] }
  0x46   :  { %383 = vmatprep.mubr.f32.mxu0 %v112_v5  ;;  %513 = vmatprep.mubr.f32.mxu1 %v114_v6  ;;  %v86_v5 = vld [vmem:[%s2142_s0 + $0x138] sm:$0xff]  ;;  %v83_v6 = vld [vmem:[%s2142_s0 + $0x120] sm:$0xff] }
  0x47   :  { %1100 = vmatpush3.msra.mxu0 %v221_v7  ;;  %514 = vmatmul.mubr.f32.gmra.mxu1 %v113_v9  ;;  %v92_v7 = vld [vmem:[%s2142_s0 + $0x168] sm:$0xff]  ;;  %v94_v9 = vld [vmem:[%s2142_s0 + $0x178] sm:$0xff] }
  0x48   :  { %384 = vmatmul.mubr.f32.gmra.mxu0 %v111_v8  ;;  %1170 = vmatprep.subr.mxu1 %v269_v10  ;;  %v85_v8 = vld [vmem:[%s2142_s0 + $0x130] sm:$0xff]  ;;  %v91_v10 = vld [vmem:[%s2142_s0 + $0x160] sm:$0xff] }
  0x49   :  { %1101 = vmatprep.subr.mxu0 %v236_v11  ;;  %1171 = vmatpush3.msra.mxu1 %v253_v12  ;;  %v100_v11 = vld [vmem:[%s2142_s0 + $0x1a8] sm:$0xff]  ;;  %v93_v12 = vld [vmem:[%s2142_s0 + $0x170] sm:$0xff] }
  0x4a   :  { %1102 = vmatpush3.msra.mxu0 %v220_v13  ;;  %388 = vmatprep.mubr.f32.mxu0 %v120_v14  ;;  %v102_v13 = vld [vmem:[%s2142_s0 + $0x1b8] sm:$0xff]  ;;  %v99_v14 = vld [vmem:[%s2142_s0 + $0x1a0] sm:$0xff] }
  0x4b   :  { %518 = vmatprep.mubr.f32.mxu1 %v122_v15  ;;  %1172 = vmatprep.subr.mxu1 %v268_v16  ;;  %v108_v15 = vld [vmem:[%s2142_s0 + $0x1e8] sm:$0xff]  ;;  %v101_v16 = vld [vmem:[%s2142_s0 + $0x1b0] sm:$0xff] }
  0x4c   :  { %389 = vmatmul.mubr.f32.gmra.mxu0 %v119_v17  ;;  %519 = vmatmul.mubr.f32.gmra.mxu1 %v121_v18  ;;  %v110_v17 = vld [vmem:[%s2142_s0 + $0x1f8] sm:$0xff]  ;;  %v107_v18 = vld [vmem:[%s2142_s0 + $0x1e0] sm:$0xff] }
  0x4d   :  { %1103 = vmatprep.subr.mxu0 %v235_v19  ;;  %1173 = vmatpush3.msra.mxu1 %v252_v20  ;;  %v116_v19 = vld [vmem:[%s2142_s0 + $0x228] sm:$0xff]  ;;  %v109_v20 = vld [vmem:[%s2142_s0 + $0x1f0] sm:$0xff] }
  0x4e   :  { %1104 = vmatpush3.msra.mxu0 %v219_v21  ;;  %1174 = vmatprep.subr.mxu1 %v267_v22  ;;  %v118_v21 = vld [vmem:[%s2142_s0 + $0x238] sm:$0xff]  ;;  %v115_v22 = vld [vmem:[%s2142_s0 + $0x220] sm:$0xff] }
  0x4f   :  { %393 = vmatprep.mubr.f32.mxu0 %v128_v23  ;;  %523 = vmatprep.mubr.f32.mxu1 %v130_v24  ;;  %v124_v23 = vld [vmem:[%s2142_s0 + $0x268] sm:$0xff]  ;;  %v117_v24 = vld [vmem:[%s2142_s0 + $0x230] sm:$0xff] }
  0x50   :  { %1105 = vmatprep.subr.mxu0 %v234_v25  ;;  %1175 = vmatpush3.msra.mxu1 %v251_v26  ;;  %v126_v25 = vld [vmem:[%s2142_s0 + $0x278] sm:$0xff]  ;;  %v123_v26 = vld [vmem:[%s2142_s0 + $0x260] sm:$0xff] }
  0x51   :  { %394 = vmatmul.mubr.f32.gmra.mxu0 %v127_v27  ;;  %524 = vmatmul.mubr.f32.gmra.mxu1 %v129_v28  ;;  %v132_v27 = vld [vmem:[%s2142_s0 + $0x2a8] sm:$0xff]  ;;  %v125_v28 = vld [vmem:[%s2142_s0 + $0x270] sm:$0xff] }
  0x52   :  { %1106 = vmatpush3.msra.mxu0 %v218_v29  ;;  %1176 = vmatprep.subr.mxu1 %v266_v30  ;;  %v134_v29 = vld [vmem:[%s2142_s0 + $0x2b8] sm:$0xff]  ;;  %v131_v30 = vld [vmem:[%s2142_s0 + $0x2a0] sm:$0xff] }
  0x53   :  { %398 = vmatprep.mubr.f32.mxu0 %v136_v31  ;;  %1177 = vmatpush3.msra.mxu1 %v250_v32  ;;  %v140_v31 = vld [vmem:[%s2142_s0 + $0x2e8] sm:$0xff]  ;;  %v133_v32 = vld [vmem:[%s2142_s0 + $0x2b0] sm:$0xff] }
  0x54   :  { %528 = vmatprep.mubr.f32.mxu1 %v138_v33  ;;  %1107 = vmatprep.subr.mxu0 %v233_v34  ;;  %v142_v33 = vld [vmem:[%s2142_s0 + $0x2f8] sm:$0xff]  ;;  %v139_v34 = vld [vmem:[%s2142_s0 + $0x2e0] sm:$0xff] }
  0x55   :  { %399 = vmatmul.mubr.f32.gmra.mxu0 %v135_v35  ;;  %529 = vmatmul.mubr.f32.gmra.mxu1 %v137_v36  ;;  %v148_v35 = vld [vmem:[%s2142_s0 + $0x328] sm:$0x3]  ;;  %v141_v36 = vld [vmem:[%s2142_s0 + $0x2f0] sm:$0xff] }
  0x56   :  { %1108 = vmatpush3.msra.mxu0 %v217_v37  ;;  %1178 = vmatprep.subr.mxu1 %v265_v38  ;;  %v150_v37 = vld [vmem:[%s2142_s0 + $0x338] sm:$0x3]  ;;  %v147_v38 = vld [vmem:[%s2142_s0 + $0x320] sm:$0x3] }
  0x57   :  { %1109 = vmatprep.subr.mxu0 %v232_v39  ;;  %1179 = vmatpush3.msra.mxu1 %v249_v40  ;;  %v149_v39 = vld [vmem:[%s2142_s0 + $0x330] sm:$0x3]  ;;  %v1224_v40 = vmov 0.0  }
  0x58   :  { %403 = vmatprep.mubr.f32.mxu0 %v144_v41  ;;  %533 = vmatprep.mubr.f32.mxu1 %v146_v42  ;;  %33 = vst [vmem:[#allocation2 + $0x40] sm:$0x3] %v1224_v40 }
  0x59   :  { %1110 = vmatpush3.msra.mxu0 %v216_v43  ;;  %534 = vmatmul.mubr.f32.gmra.mxu1 %v145_v45 }
  0x5a   :  { %404 = vmatmul.mubr.f32.gmra.mxu0 %v143_v44  ;;  %1180 = vmatprep.subr.mxu1 %v264_v46 }
  0x5b   :  { %1111 = vmatprep.subr.mxu0 %v231_v47  ;;  %1181 = vmatpush3.msra.mxu1 %v248_v48 }
  0x5c   :  { %1112 = vmatpush3.msra.mxu0 %v215_v49  ;;  %603 = vmatprep.mubr.f32.mxu0 %v52_v50 }
  0x5d   :  { %1182 = vmatprep.subr.mxu1 %v263_v51  ;;  %733 = vmatprep.mubr.f32.mxu1 %v54_v54 }
  0x5e   :  { %604 = vmatmul.mubr.f32.vlgmr.msra.gmra.mxu0 %v51_v52  ;;  %1183 = vmatpush3.msra.mxu1 %v247_v53 }
  0x5f   :  { %608 = vmatprep.mubr.f32.mxu0 %v60_v55  ;;  %734 = vmatmul.mubr.f32.vlgmr.msra.gmra.mxu1 %v53_v56 }
  0x60   :  { %738 = vmatprep.mubr.f32.mxu1 %v62_v57 }
  0x62   :  { %609 = vmatmul.mubr.f32.gmra.mxu0 %v59_v58 }
  0x63   :  { %613 = vmatprep.mubr.f32.mxu0 %v68_v59  ;;  %739 = vmatmul.mubr.f32.gmra.mxu1 %v61_v60 }
  0x64   :  { %743 = vmatprep.mubr.f32.mxu1 %v70_v61 }
  0x66   :  { %614 = vmatmul.mubr.f32.gmra.mxu0 %v67_v62 }
  0x67   :  { %618 = vmatprep.mubr.f32.mxu0 %v76_v63  ;;  %744 = vmatmul.mubr.f32.gmra.mxu1 %v69_v0 }
  0x68   :  { %748 = vmatprep.mubr.f32.mxu1 %v78_v1 }
  0x6a   :  { %619 = vmatmul.mubr.f32.gmra.mxu0 %v75_v2 }
  0x6b   :  { %623 = vmatprep.mubr.f32.mxu0 %v84_v3  ;;  %749 = vmatmul.mubr.f32.gmra.mxu1 %v77_v4 }
  0x6c   :  { %753 = vmatprep.mubr.f32.mxu1 %v86_v5 }
  0x6e   :  { %624 = vmatmul.mubr.f32.gmra.mxu0 %v83_v6 }
  0x6f   :  { %628 = vmatprep.mubr.f32.mxu0 %v92_v7  ;;  %754 = vmatmul.mubr.f32.gmra.mxu1 %v85_v8 }
  0x70   :  { %758 = vmatprep.mubr.f32.mxu1 %v94_v9 }
  0x72   :  { %629 = vmatmul.mubr.f32.gmra.mxu0 %v91_v10 }
  0x73   :  { %633 = vmatprep.mubr.f32.mxu0 %v100_v11  ;;  %759 = vmatmul.mubr.f32.gmra.mxu1 %v93_v12 }
  0x74   :  { %763 = vmatprep.mubr.f32.mxu1 %v102_v13 }
  0x76   :  { %634 = vmatmul.mubr.f32.gmra.mxu0 %v99_v14 }
  0x77   :  { %638 = vmatprep.mubr.f32.mxu0 %v108_v15  ;;  %764 = vmatmul.mubr.f32.gmra.mxu1 %v101_v16 }
  0x78   :  { %768 = vmatprep.mubr.f32.mxu1 %v110_v17 }
  0x7a   :  { %639 = vmatmul.mubr.f32.gmra.mxu0 %v107_v18 }
  0x7b   :  { %643 = vmatprep.mubr.f32.mxu0 %v116_v19  ;;  %769 = vmatmul.mubr.f32.gmra.mxu1 %v109_v20 }
  0x7c   :  { %773 = vmatprep.mubr.f32.mxu1 %v118_v21 }
  0x7e   :  { %644 = vmatmul.mubr.f32.gmra.mxu0 %v115_v22 }
  0x7f   :  { %648 = vmatprep.mubr.f32.mxu0 %v124_v23  ;;  %774 = vmatmul.mubr.f32.gmra.mxu1 %v117_v24 }
  0x80   :  { %778 = vmatprep.mubr.f32.mxu1 %v126_v25 }
  0x82   :  { %649 = vmatmul.mubr.f32.gmra.mxu0 %v123_v26 }
  0x83   :  { %653 = vmatprep.mubr.f32.mxu0 %v132_v27  ;;  %779 = vmatmul.mubr.f32.gmra.mxu1 %v125_v28 }
  0x84   :  { %783 = vmatprep.mubr.f32.mxu1 %v134_v29 }
  0x86   :  { %654 = vmatmul.mubr.f32.gmra.mxu0 %v131_v30 }
  0x87   :  { %658 = vmatprep.mubr.f32.mxu0 %v140_v31  ;;  %784 = vmatmul.mubr.f32.gmra.mxu1 %v133_v32 }
  0x88   :  { %788 = vmatprep.mubr.f32.mxu1 %v142_v33 }
  0x8a   :  { %659 = vmatmul.mubr.f32.gmra.mxu0 %v139_v34 }
  0x8b   :  { %663 = vmatprep.mubr.f32.mxu0 %v148_v35  ;;  %789 = vmatmul.mubr.f32.gmra.mxu1 %v141_v36 }
  0x8c   :  { %793 = vmatprep.mubr.f32.mxu1 %v150_v37 }
  0x8e   :  { %664 = vmatmul.mubr.f32.gmra.mxu0 %v147_v38 }
  0x8f   :  { %794 = vmatmul.mubr.f32.gmra.mxu1 %v149_v39 }
  0xe4   :  { %v971_v41 = vpop.f32.mrf.mxu0 }
  0xe5   :  { %v1042_v42 = vpop.f32.mrf.mxu1 }
  0xe6   :  { %v972_v43 = vpop.f32.mrf.mxu0 }
  0xe7   :  { %v1043_v44 = vpop.f32.mrf.mxu1  ;;  %v973_v29 = vadd.f32 %v972_v43, %v971_v41  ;;  %v2029_v41 = vld [vmem:[%s2143_s2] ss:$0 sm:$0xff] }
  0xe8   :  { %v974_v45 = vpop.f32.mrf.mxu0  ;;  %v1044_v30 = vadd.f32 %v1043_v44, %v1042_v42 }
  0xe9   :  { %v1045_v46 = vpop.f32.mrf.mxu1 }
  0xea   :  { %v975_v47 = vpop.f32.mrf.mxu0  ;;  %v476_v36 = vadd.f32 %v1044_v30, %v973_v29 }
  0xeb   :  { %v1046_v48 = vpop.f32.mrf.mxu1  ;;  %v976_v32 = vadd.f32 %v975_v47, %v974_v45 }
  0xec   :  { %v1047_v33 = vadd.f32 %v1046_v48, %v1045_v46  ;;  %v2034_v46 = vld [vmem:[%s2144_s3] ss:$0 sm:$0xff] }
  0xed   :  { %v977_v49 = vpop.f32.mrf.mxu0  ;;  %v1048_v50 = vpop.f32.mrf.mxu1 }
  0xef   :  { %v978_v51 = vpop.f32.mrf.mxu0  ;;  %v1049_v52 = vpop.f32.mrf.mxu1 }
  0xf1   :  { %v1948_v54 = vpop.f32.mrf.mxu1 }
  0xf2   :  { %v1946_v53 = vpop.f32.mrf.mxu0 }
  0xf3   :  { %v1952_v56 = vpop.f32.mrf.mxu1 }
  0xf4   :  { %v1950_v55 = vpop.f32.mrf.mxu0 }
  0xf6   :  { %v1954_v57 = vpop.f32.mrf.mxu0  ;;  %v1956_v58 = vpop.f32.mrf.mxu1 }
  0xf8   :  { %v1958_v59 = vpop.f32.mrf.mxu0  ;;  %v1960_v60 = vpop.f32.mrf.mxu1 }
  0xfa   :  { %v1962_v61 = vpop.f32.mrf.mxu0  ;;  %v1964_v62 = vpop.f32.mrf.mxu1 }
  0xfc   :  { %v1966_v63 = vpop.f32.mrf.mxu0  ;;  %v1968_v0 = vpop.f32.mrf.mxu1 }
  0xff   :  { %v1970_v1 = vpop.f32.mrf.mxu0  ;;  %v1972_v2 = vpop.f32.mrf.mxu1 }
 0x101   :  { %v1974_v3 = vpop.f32.mrf.mxu0  ;;  %v1976_v4 = vpop.f32.mrf.mxu1 }
 0x103   :  { %v1980_v6 = vpop.f32.mrf.mxu1 }
 0x104   :  { %v1978_v5 = vpop.f32.mrf.mxu0 }
 0x105   :  { %v1984_v8 = vpop.f32.mrf.mxu1 }
 0x106   :  { %v1982_v7 = vpop.f32.mrf.mxu0 }
 0x107   :  { %v1988_v10 = vpop.f32.mrf.mxu1 }
 0x108   :  { %v1986_v9 = vpop.f32.mrf.mxu0 }
 0x109   :  { %v1992_v12 = vpop.f32.mrf.mxu1 }
 0x10a   :  { %v1990_v11 = vpop.f32.mrf.mxu0 }
 0x10c   :  { %v1994_v13 = vpop.f32.mrf.mxu0  ;;  %v1996_v14 = vpop.f32.mrf.mxu1 }
 0x10e   :  { %v1998_v15 = vpop.f32.mrf.mxu0  ;;  %v2000_v16 = vpop.f32.mrf.mxu1 }
 0x111   :  { %v2002_v17 = vpop.f32.mrf.mxu0  ;;  %v2004_v18 = vpop.f32.mrf.mxu1 }
 0x113   :  { %v2006_v19 = vpop.f32.mrf.mxu0  ;;  %v2008_v20 = vpop.f32.mrf.mxu1 }
 0x115   :  { %v2010_v21 = vpop.f32.mrf.mxu0  ;;  %v2012_v22 = vpop.f32.mrf.mxu1 }
 0x116   :  { %2146 = vst [vmem:[#allocation3_spill] sm:$0xff] %v2010_v21  ;;  %2147 = vst [vmem:[#allocation4_spill] sm:$0xff] %v2012_v22 }
 0x117   :  { %v2014_v23 = vpop.f32.mrf.mxu0  ;;  %v2016_v24 = vpop.f32.mrf.mxu1 }
 0x118   :  { %2148 = vst [vmem:[#allocation5_spill] sm:$0xff] %v2014_v23  ;;  %2149 = vst [vmem:[#allocation6_spill] sm:$0xff] %v2016_v24  ;;  %v979_v23 = vadd.f32 %v978_v51, %v977_v49 }
 0x119   :  { %v2020_v26 = vpop.f32.mrf.mxu1 }
 0x11a   :  { %v2018_v25 = vpop.f32.mrf.mxu0  ;;  %2151 = vst [vmem:[#allocation8_spill] sm:$0xff] %v2020_v26 }
 0x11b   :  { %2150 = vst [vmem:[#allocation7_spill] sm:$0xff] %v2018_v25  ;;  %v2024_v28 = vpop.f32.mrf.mxu1  ;;  %v481_v25 = vadd.f32 %v1047_v33, %v976_v32 }
 0x11c   :  { %v2022_v27 = vpop.f32.mrf.mxu0  ;;  %2153 = vst [vmem:[#allocation10_spill] sm:$0xff] %v2024_v28 }
 0x11d   :  { %2152 = vst [vmem:[#allocation9_spill] sm:$0xff] %v2022_v27  ;;  %v1050_v27 = vadd.f32 %v1049_v52, %v1048_v50 }
 0x11e   :  { %v1113_v31 = vpop.f32.mrf.mxu0 }
 0x11f   :  { %v1184_v34 = vpop.f32.mrf.mxu1  ;;  %v486_v49 = vadd.f32 %v1050_v27, %v979_v23 }
 0x120   :  { %v1114_v35 = vpop.f32.mrf.mxu0 }
 0x121   :  { %v1115_v37 = vadd.f32 %v1114_v35, %v1113_v31  ;;  %v1185_v38 = vpop.f32.mrf.mxu1  ;;  %v1059_v35 = vadd.f32 %v1968_v0, %v1964_v62 }
 0x122   :  { %v1116_v39 = vpop.f32.mrf.mxu0  ;;  %v1186_v24 = vadd.f32 %v1185_v38, %v1184_v34 }
 0x123   :  { %v606_v40 = vadd.f32 %v1115_v37, %v476_v36  ;;  %v1187_v22 = vpop.f32.mrf.mxu1 }
 0x124   :  { %v1117_v26 = vpop.f32.mrf.mxu0 }
 0x125   :  { %v736_v21 = vadd.f32 %v1186_v24, %v606_v40  ;;  %v1118_v28 = vadd.f32 %v1117_v26, %v1116_v39  ;;  %v1188_v42 = vpop.f32.mrf.mxu1  ;;  %v982_v24 = vadd.f32 %v1950_v55, %v1946_v53  ;;  %v1053_v26 = vadd.f32 %v1952_v56, %v1948_v54 }
 0x126   :  { %v1119_v43 = vpop.f32.mrf.mxu0  ;;  %v1189_v45 = vadd.f32 %v1188_v42, %v1187_v22  ;;  %v985_v22 = vadd.f32 %v1958_v59, %v1954_v57 }
 0x127   :  { %v611_v44 = vadd.f32 %v1118_v28, %v481_v25  ;;  %v1190_v47 = vpop.f32.mrf.mxu1  ;;  %v848_v50 = vmul.f32 %v2029_v41, %v736_v21  ;;  %v1056_v25 = vadd.f32 %v1960_v60, %v1956_v58  ;;  %v491_v54 = vadd.f32 %v1053_v26, %v982_v24 }
 0x128   :  { %v1120_v48 = vpop.f32.mrf.mxu0  ;;  %v988_v60 = vadd.f32 %v1966_v63, %v1962_v61 }
 0x129   :  { %v741_v51 = vadd.f32 %v1189_v45, %v611_v44  ;;  %v1121_v52 = vadd.f32 %v1120_v48, %v1119_v43  ;;  %v1191_v28 = vpop.f32.mrf.mxu1  ;;  %v868_v23 = vadd.f32 %v2034_v46, %v848_v50  ;;  %v496_v59 = vadd.f32 %v1056_v25, %v985_v22 }
 0x12a   :  { %v1122_v29 = vpop.f32.mrf.mxu0  ;;  %v1192_v21 = vadd.f32 %v1191_v28, %v1190_v47  ;;  %v501_v48 = vadd.f32 %v1059_v35, %v988_v60  ;;  %v1062_v50 = vadd.f32 %v1976_v4, %v1972_v2  ;;  %v994_v2 = vadd.f32 %v1982_v7, %v1978_v5 }
 0x12b   :  { %v616_v27 = vadd.f32 %v1121_v52, %v486_v49  ;;  %v1193_v30 = vpop.f32.mrf.mxu1  ;;  %vm881_vm0 = vcmp.ge.f32.partialorder %v868_v23, 0.0  ;;  %v894_v32 = vmul.f32 0.2, %v868_v23  ;;  %v849_v53 = vmul.f32 %v2029_v41, %v741_v51 }
 0x12c   :  { %v1123_v31 = vpop.f32.mrf.mxu0  ;;  %v991_v49 = vadd.f32 %v1974_v3, %v1970_v1  ;;  %v1068_v5 = vadd.f32 %v1992_v12, %v1988_v10 }
 0x12d   :  { %v746_v55 = vadd.f32 %v1192_v21, %v616_v27  ;;  %v1124_v56 = vadd.f32 %v1123_v31, %v1122_v29  ;;  %v1194_v33 = vpop.f32.mrf.mxu1  ;;  %v907_v34 = vsel %vm881_vm0, %v868_v23, %v894_v32  ;;  %v869_v58 = vadd.f32 %v2034_v46, %v849_v53 }
 0x12e   :  { %v1125_v57 = vpop.f32.mrf.mxu0  ;;  %920 = vst [vmem:[%s2145_s4] sm:$0xff] %v907_v34  ;;  %v1195_v37 = vadd.f32 %v1194_v33, %v1193_v30  ;;  %v506_v3 = vadd.f32 %v1062_v50, %v991_v49  ;;  %v1065_v31 = vadd.f32 %v1984_v8, %v1980_v6 }
 0x12f   :  { %v621_v36 = vadd.f32 %v1124_v56, %v491_v54  ;;  %v1196_v38 = vpop.f32.mrf.mxu1  ;;  %vm882_vm1 = vcmp.ge.f32.partialorder %v869_v58, 0.0  ;;  %v895_v40 = vmul.f32 0.2, %v869_v58  ;;  %v850_v42 = vmul.f32 %v2029_v41, %v746_v55 }
 0x130   :  { %v1126_v39 = vpop.f32.mrf.mxu0  ;;  %v997_v54 = vadd.f32 %v1990_v11, %v1986_v9  ;;  %v511_v12 = vadd.f32 %v1065_v31, %v994_v2  ;;  %v2154_v31 = vld [vmem:[#allocation3_spill] sm:$0xff] }
 0x131   :  { %v1127_v43 = vadd.f32 %v1126_v39, %v1125_v57  ;;  %v751_v44 = vadd.f32 %v1195_v37, %v621_v36  ;;  %v1197_v45 = vpop.f32.mrf.mxu1  ;;  %v908_v61 = vsel %vm882_vm1, %v869_v58, %v895_v40  ;;  %v870_v63 = vadd.f32 %v2034_v46, %v850_v42 }
 0x132   :  { %v1128_v47 = vpop.f32.mrf.mxu0  ;;  %v1198_v0 = vadd.f32 %v1197_v45, %v1196_v38  ;;  %921 = vst [vmem:[%s2145_s4 + $0x8] sm:$0xff] %v908_v61  ;;  %v516_v37 = vadd.f32 %v1068_v5, %v997_v54  ;;  %v1000_v40 = vadd.f32 %v1998_v15, %v1994_v13  ;;  %v1071_v42 = vadd.f32 %v2000_v16, %v1996_v14  ;;  %v2157_v54 = vld [vmem:[#allocation6_spill] sm:$0xff] }
 0x133   :  { %v626_v62 = vadd.f32 %v1127_v43, %v496_v59  ;;  %v1199_v51 = vpop.f32.mrf.mxu1  ;;  %vm883_vm2 = vcmp.ge.f32.partialorder %v870_v63, 0.0  ;;  %v896_v24 = vmul.f32 0.2, %v870_v63  ;;  %v851_v25 = vmul.f32 %v2029_v41, %v751_v44 }
 0x134   :  { %v1129_v52 = vpop.f32.mrf.mxu0  ;;  %v521_v50 = vadd.f32 %v1071_v42, %v1000_v40 }
 0x135   :  { %v756_v26 = vadd.f32 %v1198_v0, %v626_v62  ;;  %v1130_v22 = vadd.f32 %v1129_v52, %v1128_v47  ;;  %v1200_v28 = vpop.f32.mrf.mxu1  ;;  %v909_v23 = vsel %vm883_vm2, %v870_v63, %v896_v24  ;;  %v871_v4 = vadd.f32 %v2034_v46, %v851_v25 }
 0x136   :  { %v1131_v29 = vpop.f32.mrf.mxu0  ;;  %v1201_v1 = vadd.f32 %v1200_v28, %v1199_v51  ;;  %922 = vst [vmem:[%s2145_s4 + $0x10] sm:$0xff] %v909_v23  ;;  %v1003_v51 = vadd.f32 %v2006_v19, %v2002_v17  ;;  %v1074_v52 = vadd.f32 %v2008_v20, %v2004_v18 }
 0x137   :  { %v631_v27 = vadd.f32 %v1130_v22, %v501_v48  ;;  %v1202_v21 = vpop.f32.mrf.mxu1  ;;  %v852_v32 = vmul.f32 %v2029_v41, %v756_v26  ;;  %vm884_vm3 = vcmp.ge.f32.partialorder %v871_v4, 0.0  ;;  %v897_v7 = vmul.f32 0.2, %v871_v4 }
 0x138   :  { %v1132_v30 = vpop.f32.mrf.mxu0  ;;  %v526_v2 = vadd.f32 %v1074_v52, %v1003_v51 }
 0x139   :  { %v761_v53 = vadd.f32 %v1201_v1, %v631_v27  ;;  %v1133_v55 = vadd.f32 %v1132_v30, %v1131_v29  ;;  %v1203_v56 = vpop.f32.mrf.mxu1  ;;  %v872_v57 = vadd.f32 %v2034_v46, %v852_v32  ;;  %v910_v58 = vsel %vm884_vm3, %v871_v4, %v897_v7  ;;  %v2155_v32 = vld [vmem:[#allocation5_spill] sm:$0xff] }
 0x13a   :  { %v1134_v33 = vpop.f32.mrf.mxu0  ;;  %v1204_v34 = vadd.f32 %v1203_v56, %v1202_v21  ;;  %923 = vst [vmem:[%s2145_s4 + $0x18] sm:$0xff] %v910_v58  ;;  %v2158_v58 = vld [vmem:[#allocation7_spill] sm:$0xff] }
 0x13b   :  { %v636_v59 = vadd.f32 %v1133_v55, %v506_v3  ;;  %v1205_v6 = vpop.f32.mrf.mxu1  ;;  %vm885_vm4 = vcmp.ge.f32.partialorder %v872_v57, 0.0  ;;  %v898_v9 = vmul.f32 0.2, %v872_v57  ;;  %v853_v11 = vmul.f32 %v2029_v41, %v761_v53  ;;  %v2156_v55 = vld [vmem:[#allocation4_spill] sm:$0xff] }
 0x13c   :  { %v1135_v8 = vpop.f32.mrf.mxu0  ;;  %v1006_v53 = vadd.f32 %v2155_v32, %v2154_v31  ;;  %v1077_v5 = vadd.f32 %v2157_v54, %v2156_v55 }
 0x13d   :  { %v766_v10 = vadd.f32 %v1204_v34, %v636_v59  ;;  %v1136_v60 = vadd.f32 %v1135_v8, %v1134_v33  ;;  %v1206_v35 = vpop.f32.mrf.mxu1  ;;  %v911_v38 = vsel %vm885_vm4, %v872_v57, %v898_v9  ;;  %v873_v39 = vadd.f32 %v2034_v46, %v853_v11  ;;  %v2160_v9 = vld [vmem:[#allocation8_spill] sm:$0xff]  ;;  %v2161_v11 = vld [vmem:[#allocation10_spill] sm:$0xff] }
 0x13e   :  { %v1137_v36 = vpop.f32.mrf.mxu0  ;;  %924 = vst [vmem:[%s2145_s4 + $0x20] sm:$0xff] %v911_v38  ;;  %v1207_v44 = vadd.f32 %v1206_v35, %v1205_v6  ;;  %v2159_v6 = vld [vmem:[#allocation9_spill] sm:$0xff] }
 0x13f   :  { %v641_v43 = vadd.f32 %v1136_v60, %v511_v12  ;;  %v1208_v45 = vpop.f32.mrf.mxu1  ;;  %vm886_vm5 = vcmp.ge.f32.partialorder %v873_v39, 0.0  ;;  %v899_v61 = vmul.f32 0.2, %v873_v39  ;;  %v854_v63 = vmul.f32 %v2029_v41, %v766_v10 }
 0x140   :  { %v1138_v47 = vpop.f32.mrf.mxu0  ;;  %v1009_v8 = vadd.f32 %v2159_v6, %v2158_v58  ;;  %v1080_v10 = vadd.f32 %v2161_v11, %v2160_v9 }
 0x141   :  { %v1139_v62 = vadd.f32 %v1138_v47, %v1137_v36  ;;  %v771_v0 = vadd.f32 %v1207_v44, %v641_v43  ;;  %v1209_v48 = vpop.f32.mrf.mxu1  ;;  %v912_v13 = vsel %vm886_vm5, %v873_v39, %v899_v61  ;;  %v874_v15 = vadd.f32 %v2034_v46, %v854_v63 }
 0x142   :  { %v1140_v49 = vpop.f32.mrf.mxu0  ;;  %v1210_v16 = vadd.f32 %v1209_v48, %v1208_v45  ;;  %925 = vst [vmem:[%s2145_s4 + $0x28] sm:$0xff] %v912_v13  ;;  %v531_v39 = vadd.f32 %v1077_v5, %v1006_v53  ;;  %v536_v47 = vadd.f32 %v1080_v10, %v1009_v8 }
 0x143   :  { %v646_v14 = vadd.f32 %v1139_v62, %v516_v37  ;;  %v1211_v24 = vpop.f32.mrf.mxu1  ;;  %vm887_vm6 = vcmp.ge.f32.partialorder %v874_v15, 0.0  ;;  %v900_v22 = vmul.f32 0.2, %v874_v15  ;;  %v855_v29 = vmul.f32 %v2029_v41, %v771_v0 }
 0x144   :  { %v1141_v26 = vpop.f32.mrf.mxu0 }
 0x145   :  { %v776_v25 = vadd.f32 %v1210_v16, %v646_v14  ;;  %v1142_v28 = vadd.f32 %v1141_v26, %v1140_v49  ;;  %v1212_v23 = vpop.f32.mrf.mxu1  ;;  %v913_v1 = vsel %vm887_vm6, %v874_v15, %v900_v22  ;;  %v875_v18 = vadd.f32 %v2034_v46, %v855_v29 }
 0x146   :  { %v1143_v27 = vpop.f32.mrf.mxu0  ;;  %v1213_v17 = vadd.f32 %v1212_v23, %v1211_v24  ;;  %926 = vst [vmem:[%s2145_s4 + $0x30] sm:$0xff] %v913_v1  ;;  %v46_v24 = vld [vmem:[#allocation2 + $0x40] sm:$0x3] }
 0x147   :  { %v651_v3 = vadd.f32 %v1142_v28, %v521_v50  ;;  %v1214_v19 = vpop.f32.mrf.mxu1  ;;  %v856_v4 = vmul.f32 %v2029_v41, %v776_v25  ;;  %vm888_vm7 = vcmp.ge.f32.partialorder %v875_v18, 0.0  ;;  %v901_v7 = vmul.f32 0.2, %v875_v18 }
 0x148   :  { %v1144_v20 = vpop.f32.mrf.mxu0 }
 0x149   :  { %v781_v21 = vadd.f32 %v1213_v17, %v651_v3  ;;  %v1145_v30 = vadd.f32 %v1144_v20, %v1143_v27  ;;  %v1215_v56 = vpop.f32.mrf.mxu1  ;;  %v876_v57 = vadd.f32 %v2034_v46, %v856_v4  ;;  %v914_v12 = vsel %vm888_vm7, %v875_v18, %v901_v7 }
 0x14a   :  { %v1146_v33 = vpop.f32.mrf.mxu0  ;;  %v1216_v34 = vadd.f32 %v1215_v56, %v1214_v19  ;;  %927 = vst [vmem:[%s2145_s4 + $0x38] sm:$0xff] %v914_v12 }
 0x14b   :  { %v656_v59 = vadd.f32 %v1145_v30, %v526_v2  ;;  %v1217_v60 = vpop.f32.mrf.mxu1  ;;  %vm889_vm8 = vcmp.ge.f32.partialorder %v876_v57, 0.0  ;;  %v902_v36 = vmul.f32 0.2, %v876_v57  ;;  %v857_v37 = vmul.f32 %v2029_v41, %v781_v21 }
 0x14c   :  { %v1147_v35 = vpop.f32.mrf.mxu0 }
 0x14d   :  { %v786_v38 = vadd.f32 %v1216_v34, %v656_v59  ;;  %v1148_v40 = vadd.f32 %v1147_v35, %v1146_v33  ;;  %v1218_v42 = vpop.f32.mrf.mxu1  ;;  %v915_v44 = vsel %vm889_vm8, %v876_v57, %v902_v36  ;;  %v877_v45 = vadd.f32 %v2034_v46, %v857_v37 }
 0x14e   :  { %v1149_v43 = vpop.f32.mrf.mxu0  ;;  %928 = vst [vmem:[%s2145_s4 + $0x40] sm:$0xff] %v915_v44  ;;  %v1219_v63 = vadd.f32 %v1218_v42, %v1217_v60 }
 0x14f   :  { %v661_v61 = vadd.f32 %v1148_v40, %v531_v39  ;;  %v1220_v62 = vpop.f32.mrf.mxu1  ;;  %vm890_vm9 = vcmp.ge.f32.partialorder %v877_v45, 0.0  ;;  %v903_v48 = vmul.f32 0.2, %v877_v45  ;;  %v858_v49 = vmul.f32 %v2029_v41, %v786_v38 }
 0x150   :  { %v1150_v0 = vpop.f32.mrf.mxu0 }
 0x151   :  { %v1151_v13 = vadd.f32 %v1150_v0, %v1149_v43  ;;  %v791_v15 = vadd.f32 %v1219_v63, %v661_v61  ;;  %v1221_v14 = vpop.f32.mrf.mxu1  ;;  %v916_v16 = vsel %vm890_vm9, %v877_v45, %v903_v48  ;;  %v878_v50 = vadd.f32 %v2034_v46, %v858_v49 }
 0x152   :  { %v1222_v52 = vadd.f32 %v1221_v14, %v1220_v62  ;;  %929 = vst [vmem:[%s2145_s4 + $0x48] sm:$0xff] %v916_v16 }
 0x153   :  { %v666_v51 = vadd.f32 %v1151_v13, %v536_v47  ;;  %vm891_vm10 = vcmp.ge.f32.partialorder %v878_v50, 0.0  ;;  %v904_v26 = vmul.f32 0.2, %v878_v50  ;;  %v859_v25 = vmul.f32 %v2029_v41, %v791_v15 }
 0x155   :  { %v796_v22 = vadd.f32 %v1222_v52, %v666_v51  ;;  %v917_v28 = vsel %vm891_vm10, %v878_v50, %v904_v26  ;;  %v879_v23 = vadd.f32 %v2034_v46, %v859_v25 }
 0x156   :  { %930 = vst [vmem:[%s2145_s4 + $0x50] sm:$0xff] %v917_v28 }
 0x157   :  { %v811_v29 = vadd.f32 %v796_v22, %v46_v24  ;;  %vm892_vm11 = vcmp.ge.f32.partialorder %v879_v23, 0.0  ;;  %v905_v27 = vmul.f32 0.2, %v879_v23 }
 0x159   :  { %824 = vst [vmem:[#allocation2 + $0x40] sm:$0x3] %v811_v29  ;;  %v918_v1 = vsel %vm892_vm11, %v879_v23, %v905_v27 }
 0x15a   :  { %931 = vst [vmem:[%s2145_s4 + $0x58] sm:$0xff] %v918_v1 }
 0x160   :  { %v840_v3 = vld [vmem:[#allocation2 + $0x40] sm:$0x3] }
 0x161   :  { %v860_v17 = vmul.f32 %v2029_v41, %v840_v3 }
 0x163   :  { %v880_v18 = vadd.f32 %v2034_v46, %v860_v17 }
 0x165   :  { %vm893_vm12 = vcmp.ge.f32.partialorder %v880_v18, 0.0  ;;  %v906_v19 = vmul.f32 0.2, %v880_v18 }
 0x167   :  { %v919_v20 = vsel %vm893_vm12, %v880_v18, %v906_v19 }
 0x168   :  { %932 = vst [vmem:[%s2145_s4 + $0x60] sm:$0x3] %v919_v20 }

// kernel: fast_discriminator_forward.7
= control target key start
LH: loop header
LB: loop body
LE: loop exit
PB: predicated region body
PF: predicated region fallthrough
CT: control target
= control target key end

     0   :  { %s1050_s15 = smov 0   ;;  %s1052_s16 = smov 0   ;;  %s1239_s0 = inlined_call_operand.vmem [shape: f32[2,6272], index: 0, kind: input, shape index: {}]   ;;  %s1240_s1 = inlined_call_operand.vmem [shape: f32[6272,32], index: 1, kind: input, shape index: {}]   ;;  %s1241_s2 = inlined_call_operand.vmem [shape: f32[1,32], index: 2, kind: input, shape index: {}]   ;;  %s1242_s3 = inlined_call_operand.vmem [shape: f32[1,32], index: 3, kind: input, shape index: {}]   ;;  %s1243_s4 = inlined_call_operand.vmem [shape: f32[2,1], index: 4, kind: output, shape index: {}]  }
   0x1   :  { %s1054_s17 = smov 0  }
   0x2 LB: > { %s23_s18 = sadd.s32 1, %s1015_s16  ;;  %p800_p0 = scmp.ge.s32.totalorder %s1019_s17, 1  ;;  %s1019_s17 = sphi %s1054_s17, %s14_s17   ;;  %s1015_s16 = sphi %s1052_s16, %s1245_s16   ;;  %s1011_s15 = sphi %s1050_s15, %s1244_s15  }
   0x3   : > { %p24_p1 = scmp.ge.s32.totalorder %s23_s18, 7  ;;  %p192_p2 = scmp.lt.s32.totalorder %s1019_s17, 8 }
   0x5   : > { %s1247_s18 = smov (%p24_p1, %s23_s18), 0  ;;  %p193_p3 = pnand %p800_p0, %p192_p2 }
   0x6   : > { %s226_s19 = smul.u32 (!%p193_p3), 7, %s1011_s15  ;;  %p803_p6 = scmp.ne.s32.totalorder (!%p193_p3), %s1011_s15, 0 }
   0x7   : > { %196 = sbr.rel (%p193_p3) target bundleno = 447 (0x1bf), region = 36 }
   0x8   : > { %s236_s20 = smul.u32 (!%p193_p3), 112, %s1011_s15  ;;  %p229_p4 = scmp.lt.s32.totalorder (!%p193_p3), %s226_s19, 48 }
   0xa   : > { %p237_p5 = scmp.lt.s32.totalorder (!%p193_p3), %s236_s20, 783 }
   0xc   : > { %s1249_s19 = smov (!%p229_p4, %s226_s19), 48  ;;  %s1251_s20 = smov (!%p237_p5, %s236_s20), 783 }
   0xd   : > { %s801_s21 = sshll.u32 %s1249_s19, 1  ;;  %s802_s25 = sshll.u32 %s1251_s20, 3 }
   0xe   : > { %s1075_s24 = scalar_lea.vmem %s1239_s0, %s801_s21  ;;  %s1080_s28 = scalar_lea.vmem %s1240_s1, %s802_s25 }
   0xf   : > { %249 = sbr.rel (%p803_p6) target bundleno = 22 (0x16), region = 40 }
  0x14   : > { %vm250_vm0 = vcmask 254976   ;;  %v1021_v0 = vmov 0.0  }
  0x15   : > { %251 = vst.msk [vmem:[#allocation2] sm:$0x3] %vm250_vm0, %v1021_v0 }
  0x16 PF: > { %v286_v1 = vld [vmem:[%s1080_s28 + $0xf8] sm:$0xff]  ;;  %v285_v5 = vld [vmem:[%s1080_s28 + $0xf0] sm:$0xff]  ;;  %v284_v9 = vld [vmem:[%s1080_s28 + $0xe8] sm:$0xff]  ;;  %v1022_v31 = vmov 1983009808   ;;  %v373_v33 = vlaneseq  ;;  %vm1024_vm1 = vmmov 0  }
  0x17   : > { %v318_v2 = vld [vmem:[%s1080_s28 + $0x1f8] sm:$0xff]  ;;  %810 = vmatprep.subr.mxu0 %v286_v1  ;;  %v317_v6 = vld [vmem:[%s1080_s28 + $0x1f0] sm:$0xff]  ;;  %v316_v10 = vld [vmem:[%s1080_s28 + $0x1e8] sm:$0xff]  ;;  %v371_v32 = vunpack.c.l.s4 %v1022_v31  ;;  %vm690_vm2 = vcmask 254976   ;;  %p804_p7 = scmp.ne.s32.totalorder %s1011_s15, 6 }
  0x18   : > { %v270_v3 = vld [vmem:[%s1080_s28 + $0x78] sm:$0xff]  ;;  %845 = vmatprep.subr.mxu1 %v318_v2  ;;  %v269_v7 = vld [vmem:[%s1080_s28 + $0x70] sm:$0xff]  ;;  %v268_v11 = vld [vmem:[%s1080_s28 + $0x68] sm:$0xff]  ;;  %v374_v43 = vshrl.u32 %v373_v33, 7 }
  0x19   : > { %v302_v4 = vld [vmem:[%s1080_s28 + $0x178] sm:$0xff]  ;;  %811 = vmatpush3.msra.mxu0 %v270_v3  ;;  %v301_v8 = vld [vmem:[%s1080_s28 + $0x170] sm:$0xff]  ;;  %v300_v12 = vld [vmem:[%s1080_s28 + $0x168] sm:$0xff]  ;;  %v372_v42 = vunpack.c.0.s8 %v371_v32 }
  0x1a   : > { %846 = vmatpush3.msra.mxu1 %v302_v4  ;;  %812 = vmatprep.subr.mxu0 %v285_v5  ;;  %v283_v13 = vld [vmem:[%s1080_s28 + $0xe0] sm:$0xff]  ;;  %v282_v17 = vld [vmem:[%s1080_s28 + $0xd8] sm:$0xff]  ;;  %v281_v21 = vld [vmem:[%s1080_s28 + $0xd0] sm:$0xff] }
  0x1b   : > { %847 = vmatprep.subr.mxu1 %v317_v6  ;;  %813 = vmatpush3.msra.mxu0 %v269_v7  ;;  %v315_v14 = vld [vmem:[%s1080_s28 + $0x1e0] sm:$0xff]  ;;  %v314_v18 = vld [vmem:[%s1080_s28 + $0x1d8] sm:$0xff]  ;;  %v313_v22 = vld [vmem:[%s1080_s28 + $0x1d0] sm:$0xff]  ;;  %v1129_v52 = vsub.s32 %v372_v42, %v374_v43 }
  0x1c   : > { %848 = vmatpush3.msra.mxu1 %v301_v8  ;;  %814 = vmatprep.subr.mxu0 %v284_v9  ;;  %v267_v15 = vld [vmem:[%s1080_s28 + $0x60] sm:$0xff]  ;;  %v266_v19 = vld [vmem:[%s1080_s28 + $0x58] sm:$0xff]  ;;  %v265_v23 = vld [vmem:[%s1080_s28 + $0x50] sm:$0xff] }
  0x1d   : > { %849 = vmatprep.subr.mxu1 %v316_v10  ;;  %v299_v16 = vld [vmem:[%s1080_s28 + $0x160] sm:$0xff]  ;;  %815 = vmatpush3.msra.mxu0 %v268_v11  ;;  %v298_v20 = vld [vmem:[%s1080_s28 + $0x158] sm:$0xff]  ;;  %v297_v24 = vld [vmem:[%s1080_s28 + $0x150] sm:$0xff] }
  0x1e   : > { %850 = vmatpush3.msra.mxu1 %v300_v12  ;;  %816 = vmatprep.subr.mxu0 %v283_v13  ;;  %v280_v25 = vld [vmem:[%s1080_s28 + $0xc8] sm:$0xff]  ;;  %v279_v29 = vld [vmem:[%s1080_s28 + $0xc0] sm:$0xff]  ;;  %v278_v36 = vld [vmem:[%s1080_s28 + $0xb8] sm:$0xff] }
  0x1f   : > { %851 = vmatprep.subr.mxu1 %v315_v14  ;;  %817 = vmatpush3.msra.mxu0 %v267_v15  ;;  %v312_v26 = vld [vmem:[%s1080_s28 + $0x1c8] sm:$0xff]  ;;  %v311_v30 = vld [vmem:[%s1080_s28 + $0x1c0] sm:$0xff]  ;;  %v310_v37 = vld [vmem:[%s1080_s28 + $0x1b8] sm:$0xff] }
  0x20   : > { %852 = vmatpush3.msra.mxu1 %v299_v16  ;;  %818 = vmatprep.subr.mxu0 %v282_v17  ;;  %v264_v27 = vld [vmem:[%s1080_s28 + $0x48] sm:$0xff]  ;;  %v263_v34 = vld [vmem:[%s1080_s28 + $0x40] sm:$0xff]  ;;  %v262_v38 = vld [vmem:[%s1080_s28 + $0x38] sm:$0xff] }
  0x21   : > { %853 = vmatprep.subr.mxu1 %v314_v18  ;;  %819 = vmatpush3.msra.mxu0 %v266_v19  ;;  %v296_v28 = vld [vmem:[%s1080_s28 + $0x148] sm:$0xff]  ;;  %v295_v35 = vld [vmem:[%s1080_s28 + $0x140] sm:$0xff]  ;;  %v294_v39 = vld [vmem:[%s1080_s28 + $0x138] sm:$0xff]  ;;  %v1023_v18 = vmov 0.0  }
  0x22   : > { %854 = vmatpush3.msra.mxu1 %v298_v20  ;;  %820 = vmatprep.subr.mxu0 %v281_v21  ;;  %v277_v40 = vld [vmem:[%s1080_s28 + $0xb0] sm:$0xff]  ;;  %v276_v46 = vld [vmem:[%s1080_s28 + $0xa8] sm:$0xff]  ;;  %v275_v50 = vld [vmem:[%s1080_s28 + $0xa0] sm:$0xff] }
  0x23   : > { %855 = vmatprep.subr.mxu1 %v313_v22  ;;  %821 = vmatpush3.msra.mxu0 %v265_v23  ;;  %v309_v41 = vld [vmem:[%s1080_s28 + $0x1b0] sm:$0xff]  ;;  %v308_v47 = vld [vmem:[%s1080_s28 + $0x1a8] sm:$0xff]  ;;  %v307_v51 = vld [vmem:[%s1080_s28 + $0x1a0] sm:$0xff] }
  0x24   : > { %856 = vmatpush3.msra.mxu1 %v297_v24  ;;  %822 = vmatprep.subr.mxu0 %v280_v25  ;;  %v261_v44 = vld [vmem:[%s1080_s28 + $0x30] sm:$0xff]  ;;  %v260_v48 = vld [vmem:[%s1080_s28 + $0x28] sm:$0xff]  ;;  %v259_v53 = vld [vmem:[%s1080_s28 + $0x20] sm:$0xff] }
  0x25   : > { %857 = vmatprep.subr.mxu1 %v312_v26  ;;  %823 = vmatpush3.msra.mxu0 %v264_v27  ;;  %v293_v45 = vld [vmem:[%s1080_s28 + $0x130] sm:$0xff]  ;;  %v292_v49 = vld [vmem:[%s1080_s28 + $0x128] sm:$0xff]  ;;  %v291_v54 = vld [vmem:[%s1080_s28 + $0x120] sm:$0xff] }
  0x26   : > { %858 = vmatpush3.msra.mxu1 %v296_v28  ;;  %824 = vmatprep.subr.mxu0 %v279_v29  ;;  %v253_v55 = vld [vmem:[%s1075_s24] sm:$0xff]  ;;  %v274_v56 = vld [vmem:[%s1080_s28 + $0x98] sm:$0xff]  ;;  %v273_v61 = vld [vmem:[%s1080_s28 + $0x90] sm:$0xff] }
  0x27   : > { %859 = vmatprep.subr.mxu1 %v311_v30  ;;  %825 = vmatpush3.msra.mxu0 %v263_v34  ;;  %v306_v57 = vld [vmem:[%s1080_s28 + $0x198] sm:$0xff]  ;;  %v369_v58 = vcombine.high %v253_v55, %v253_v55  ;;  %v305_v62 = vld [vmem:[%s1080_s28 + $0x190] sm:$0xff]  ;;  %v376_v63 = vrot.slane %v253_v55, %v1129_v52  ;;  %v272_v3 = vld [vmem:[%s1080_s28 + $0x88] sm:$0xff] }
  0x28   : > { %860 = vmatpush3.msra.mxu1 %v295_v35  ;;  %826 = vmatprep.subr.mxu0 %v278_v36  ;;  %v258_v59 = vld [vmem:[%s1080_s28 + $0x18] sm:$0xff]  ;;  %v257_v0 = vld [vmem:[%s1080_s28 + $0x10] sm:$0xff]  ;;  %v304_v4 = vld [vmem:[%s1080_s28 + $0x188] sm:$0xff] }
  0x29   : > { %861 = vmatprep.subr.mxu1 %v310_v37  ;;  %827 = vmatpush3.msra.mxu0 %v262_v38  ;;  %v290_v60 = vld [vmem:[%s1080_s28 + $0x118] sm:$0xff]  ;;  %v289_v1 = vld [vmem:[%s1080_s28 + $0x110] sm:$0xff]  ;;  %v383_v2 = vrot.slane %v369_v58, %v1129_v52  ;;  %v256_v5 = vld [vmem:[%s1080_s28 + $0x8] sm:$0xff]  ;;  %v384_v9 = vcombine.high %v376_v63, %v376_v63 }
  0x2a   : > { %862 = vmatpush3.msra.mxu1 %v294_v39  ;;  %828 = vmatprep.subr.mxu0 %v277_v40  ;;  %v288_v6 = vld [vmem:[%s1080_s28 + $0x108] sm:$0xff]  ;;  %v271_v7 = vld [vmem:[%s1080_s28 + $0x80] sm:$0xff]  ;;  %v350_v13 = vld [vmem:[%s1080_s28 + $0x2f8] sm:$0xff] }
  0x2b   : > { %863 = vmatprep.subr.mxu1 %v309_v41  ;;  %829 = vmatpush3.msra.mxu0 %v261_v44  ;;  %v303_v8 = vld [vmem:[%s1080_s28 + $0x180] sm:$0xff]  ;;  %v385_v11 = vcombine.high %v383_v2, %v383_v2  ;;  %v334_v14 = vld [vmem:[%s1080_s28 + $0x278] sm:$0xff]  ;;  %v349_v16 = vld [vmem:[%s1080_s28 + $0x2f0] sm:$0xff] }
  0x2c   : > { %864 = vmatpush3.msra.mxu1 %v293_v45  ;;  %830 = vmatprep.subr.mxu0 %v276_v46  ;;  %v255_v10 = vld [vmem:[%s1080_s28] sm:$0xff]  ;;  %v366_v15 = vld [vmem:[%s1080_s28 + $0x378] sm:$0xff]  ;;  %v333_v17 = vld [vmem:[%s1080_s28 + $0x270] sm:$0xff] }
  0x2d   : > { %865 = vmatprep.subr.mxu1 %v308_v47  ;;  %831 = vmatpush3.msra.mxu0 %v260_v48  ;;  %v287_v12 = vld [vmem:[%s1080_s28 + $0x100] sm:$0xff]  ;;  %v365_v19 = vld [vmem:[%s1080_s28 + $0x370] sm:$0xff]  ;;  %v348_v20 = vld [vmem:[%s1080_s28 + $0x2e8] sm:$0xff] }
  0x2e   : > { %866 = vmatpush3.msra.mxu1 %v292_v49  ;;  %832 = vmatprep.subr.mxu0 %v275_v50  ;;  %v332_v21 = vld [vmem:[%s1080_s28 + $0x268] sm:$0xff]  ;;  %v347_v23 = vld [vmem:[%s1080_s28 + $0x2e0] sm:$0xff]  ;;  %v346_v26 = vld [vmem:[%s1080_s28 + $0x2d8] sm:$0xff] }
  0x2f   : > { %867 = vmatprep.subr.mxu1 %v307_v51  ;;  %833 = vmatpush3.msra.mxu0 %v259_v53  ;;  %v364_v22 = vld [vmem:[%s1080_s28 + $0x368] sm:$0xff]  ;;  %v331_v24 = vld [vmem:[%s1080_s28 + $0x260] sm:$0xff]  ;;  %v330_v27 = vld [vmem:[%s1080_s28 + $0x258] sm:$0xff] }
  0x30   : > { %868 = vmatpush3.msra.mxu1 %v291_v54  ;;  %834 = vmatprep.subr.mxu0 %v274_v56  ;;  %v363_v25 = vld [vmem:[%s1080_s28 + $0x360] sm:$0xff]  ;;  %v362_v28 = vld [vmem:[%s1080_s28 + $0x358] sm:$0xff]  ;;  %v345_v29 = vld [vmem:[%s1080_s28 + $0x2d0] sm:$0xff] }
  0x31   : > { %869 = vmatprep.subr.mxu1 %v306_v57  ;;  %835 = vmatpush3.msra.mxu0 %v258_v59  ;;  %v329_v30 = vld [vmem:[%s1080_s28 + $0x250] sm:$0xff]  ;;  %v344_v32 = vld [vmem:[%s1080_s28 + $0x2c8] sm:$0xff]  ;;  %v343_v35 = vld [vmem:[%s1080_s28 + $0x2c0] sm:$0xff] }
  0x32   : > { %870 = vmatpush3.msra.mxu1 %v290_v60  ;;  %836 = vmatprep.subr.mxu0 %v273_v61  ;;  %v361_v31 = vld [vmem:[%s1080_s28 + $0x350] sm:$0xff]  ;;  %v328_v33 = vld [vmem:[%s1080_s28 + $0x248] sm:$0xff]  ;;  %v327_v36 = vld [vmem:[%s1080_s28 + $0x240] sm:$0xff] }
  0x33   : > { %871 = vmatprep.subr.mxu1 %v305_v62  ;;  %837 = vmatpush3.msra.mxu0 %v257_v0  ;;  %v360_v34 = vld [vmem:[%s1080_s28 + $0x348] sm:$0xff]  ;;  %v359_v37 = vld [vmem:[%s1080_s28 + $0x340] sm:$0xff]  ;;  %v342_v38 = vld [vmem:[%s1080_s28 + $0x2b8] sm:$0xff] }
  0x34   : > { %872 = vmatpush3.msra.mxu1 %v289_v1  ;;  %838 = vmatprep.subr.mxu0 %v272_v3  ;;  %v326_v39 = vld [vmem:[%s1080_s28 + $0x238] sm:$0xff]  ;;  %v341_v41 = vld [vmem:[%s1080_s28 + $0x2b0] sm:$0xff]  ;;  %v254_v44 = vld [vmem:[%s1075_s24 + $0x8] sm:$0x3f] }
  0x35   : > { %873 = vmatprep.subr.mxu1 %v304_v4  ;;  %839 = vmatpush3.msra.mxu0 %v256_v5  ;;  %v358_v40 = vld [vmem:[%s1080_s28 + $0x338] sm:$0xff]  ;;  %v325_v42 = vld [vmem:[%s1080_s28 + $0x230] sm:$0xff]  ;;  %v340_v45 = vld [vmem:[%s1080_s28 + $0x2a8] sm:$0xff]  ;;  %v393_v49 = vrot.slane %v254_v44, %v1129_v52  ;;  %v386_v62 = vcombine.high %v254_v44, %v254_v44 }
  0x36   : > { %874 = vmatpush3.msra.mxu1 %v288_v6  ;;  %840 = vmatprep.subr.mxu0 %v271_v7  ;;  %v357_v43 = vld [vmem:[%s1080_s28 + $0x330] sm:$0xff]  ;;  %v324_v46 = vld [vmem:[%s1080_s28 + $0x228] sm:$0xff]  ;;  %v339_v48 = vld [vmem:[%s1080_s28 + $0x2a0] sm:$0xff] }
  0x37   : > { %875 = vmatprep.subr.mxu1 %v303_v8  ;;  %841 = vmatpush3.msra.mxu0 %v255_v10  ;;  %v356_v47 = vld [vmem:[%s1080_s28 + $0x328] sm:$0xff]  ;;  %v323_v50 = vld [vmem:[%s1080_s28 + $0x220] sm:$0xff]  ;;  %v338_v53 = vld [vmem:[%s1080_s28 + $0x298] sm:$0xff]  ;;  %v401_v57 = vcombine.high %v393_v49, %v393_v49  ;;  %v400_v3 = vrot.slane %v386_v62, %v1129_v52 }
  0x38   : > { %473 = vmatprep.mubr.f32.mxu0 %v384_v9  ;;  %876 = vmatpush3.msra.mxu1 %v287_v12  ;;  %v355_v51 = vld [vmem:[%s1080_s28 + $0x320] sm:$0xff]  ;;  %v322_v54 = vld [vmem:[%s1080_s28 + $0x218] sm:$0xff]  ;;  %v337_v56 = vld [vmem:[%s1080_s28 + $0x290] sm:$0xff] }
  0x39   : > { %543 = vmatprep.mubr.f32.mxu1 %v385_v11  ;;  %474 = vmatmul.mubr.f32.vlgmr.msra.gmra.mxu0 %v376_v63  ;;  %v354_v55 = vld [vmem:[%s1080_s28 + $0x318] sm:$0xff]  ;;  %v321_v58 = vld [vmem:[%s1080_s28 + $0x210] sm:$0xff]  ;;  %v336_v59 = vld [vmem:[%s1080_s28 + $0x288] sm:$0xff] }
  0x3a   : > { %544 = vmatmul.mubr.f32.vlgmr.msra.gmra.mxu1 %v383_v2  ;;  %880 = vmatprep.subr.mxu0 %v350_v13  ;;  %v353_v60 = vld [vmem:[%s1080_s28 + $0x310] sm:$0xff]  ;;  %v320_v61 = vld [vmem:[%s1080_s28 + $0x208] sm:$0xff]  ;;  %v335_v63 = vld [vmem:[%s1080_s28 + $0x280] sm:$0xff] }
  0x3b   : > { %932 = vmatprep.subr.mxu1 %v1023_v18  ;;  %881 = vmatpush3.msra.mxu0 %v334_v14  ;;  %v352_v0 = vld [vmem:[%s1080_s28 + $0x308] sm:$0xff]  ;;  %v319_v1 = vld [vmem:[%s1080_s28 + $0x200] sm:$0xff] }
  0x3c   : > { %933 = vmatpush3.msra.mxu1 %v366_v15  ;;  %882 = vmatprep.subr.mxu0 %v349_v16  ;;  %v351_v2 = vld [vmem:[%s1080_s28 + $0x300] sm:$0xff] }
  0x3d   : > { %934 = vmatprep.subr.mxu1 %v1023_v18  ;;  %883 = vmatpush3.msra.mxu0 %v333_v17  ;;  %v252_v16 = vld [vmem:[#allocation2] sm:$0x3] }
  0x3e   : > { %935 = vmatpush3.msra.mxu1 %v365_v19  ;;  %884 = vmatprep.subr.mxu0 %v348_v20 }
  0x3f   : > { %936 = vmatprep.subr.mxu1 %v1023_v18  ;;  %885 = vmatpush3.msra.mxu0 %v332_v21 }
  0x40   : > { %937 = vmatpush3.msra.mxu1 %v364_v22  ;;  %886 = vmatprep.subr.mxu0 %v347_v23 }
  0x41   : > { %938 = vmatprep.subr.mxu1 %v1023_v18  ;;  %887 = vmatpush3.msra.mxu0 %v331_v24 }
  0x42   : > { %939 = vmatpush3.msra.mxu1 %v363_v25  ;;  %888 = vmatprep.subr.mxu0 %v346_v26 }
  0x43   : > { %940 = vmatprep.subr.mxu1 %v1023_v18  ;;  %889 = vmatpush3.msra.mxu0 %v330_v27 }
  0x44   : > { %941 = vmatpush3.msra.mxu1 %v362_v28  ;;  %890 = vmatprep.subr.mxu0 %v345_v29 }
  0x45   : > { %942 = vmatprep.subr.mxu1 %v1023_v18  ;;  %891 = vmatpush3.msra.mxu0 %v329_v30 }
  0x46   : > { %943 = vmatpush3.msra.mxu1 %v361_v31  ;;  %892 = vmatprep.subr.mxu0 %v344_v32 }
  0x47   : > { %944 = vmatprep.subr.mxu1 %v1023_v18  ;;  %893 = vmatpush3.msra.mxu0 %v328_v33 }
  0x48   : > { %945 = vmatpush3.msra.mxu1 %v360_v34  ;;  %894 = vmatprep.subr.mxu0 %v343_v35 }
  0x49   : > { %946 = vmatprep.subr.mxu1 %v1023_v18  ;;  %895 = vmatpush3.msra.mxu0 %v327_v36 }
  0x4a   : > { %947 = vmatpush3.msra.mxu1 %v359_v37  ;;  %896 = vmatprep.subr.mxu0 %v342_v38 }
  0x4b   : > { %948 = vmatprep.subr.mxu1 %v1023_v18  ;;  %897 = vmatpush3.msra.mxu0 %v326_v39 }
  0x4c   : > { %949 = vmatpush3.msra.mxu1 %v358_v40  ;;  %898 = vmatprep.subr.mxu0 %v341_v41 }
  0x4d   : > { %950 = vmatprep.subr.mxu1 %v1023_v18  ;;  %899 = vmatpush3.msra.mxu0 %v325_v42 }
  0x4e   : > { %951 = vmatpush3.msra.mxu1 %v357_v43  ;;  %900 = vmatprep.subr.mxu0 %v340_v45 }
  0x4f   : > { %952 = vmatprep.subr.mxu1 %v1023_v18  ;;  %901 = vmatpush3.msra.mxu0 %v324_v46 }
  0x50   : > { %953 = vmatpush3.msra.mxu1 %v356_v47  ;;  %902 = vmatprep.subr.mxu0 %v339_v48 }
  0x51   : > { %954 = vmatprep.subr.mxu1 %v1023_v18  ;;  %903 = vmatpush3.msra.mxu0 %v323_v50 }
  0x52   : > { %955 = vmatpush3.msra.mxu1 %v355_v51  ;;  %904 = vmatprep.subr.mxu0 %v338_v53 }
  0x53   : > { %956 = vmatprep.subr.mxu1 %v1023_v18  ;;  %905 = vmatpush3.msra.mxu0 %v322_v54 }
  0x54   : > { %957 = vmatpush3.msra.mxu1 %v354_v55  ;;  %906 = vmatprep.subr.mxu0 %v337_v56 }
  0x55   : > { %958 = vmatprep.subr.mxu1 %v1023_v18  ;;  %907 = vmatpush3.msra.mxu0 %v321_v58 }
  0x56   : > { %613 = vmatprep.mubr.f32.mxu0 %v401_v57  ;;  %908 = vmatprep.subr.mxu0 %v336_v59 }
  0x57   : > { %959 = vmatpush3.msra.mxu1 %v353_v60  ;;  %909 = vmatpush3.msra.mxu0 %v320_v61 }
  0x58   : > { %960 = vmatprep.subr.mxu1 %v1023_v18  ;;  %910 = vmatprep.subr.mxu0 %v335_v63 }
  0x59   : > { %961 = vmatpush3.msra.mxu1 %v352_v0  ;;  %911 = vmatpush3.msra.mxu0 %v319_v1 }
  0x5a   : > { %962 = vmatprep.subr.mxu1 %v1023_v18  ;;  %614 = vmatmul.mubr.f32.vlgmr.msra.gmra.mxu0 %v393_v49 }
  0x5b   : > { %963 = vmatpush3.msra.mxu1 %v351_v2  ;;  %964 = vmatprep.mubr.msk.f32.mxu1 %vm1024_vm1, %v1023_v18 }
  0x5c   : > { %965 = vmatmul.mubr.f32.vlgmr.msra.gmra.mxu1 %v400_v3 }
  0xf9   : > { %v842_v4 = vpop.f32.mrf.mxu0 }
  0xfa   : > { %v877_v5 = vpop.f32.mrf.mxu1 }
  0xfb   : > { %v843_v6 = vpop.f32.mrf.mxu0 }
  0xfc   : > { %v878_v7 = vpop.f32.mrf.mxu1  ;;  %v844_v8 = vadd.f32 %v843_v6, %v842_v4 }
  0xfd   : > { %v879_v9 = vadd.f32 %v878_v7, %v877_v5 }
  0xff   : > { %v546_v13 = vadd.f32 %v879_v9, %v844_v8 }
 0x11a   : > { %v912_v10 = vpop.f32.mrf.mxu0 }
 0x11c   : > { %v913_v11 = vpop.f32.mrf.mxu0  ;;  %v685_v12 = vpop.f32.mrf.mxu1 }
 0x11d   : > { %v914_v52 = vadd.f32 %v913_v11, %v912_v10 }
 0x11e   : > { %v966_v14 = vpop.f32.mrf.mxu1 }
 0x11f   : > { %v616_v15 = vadd.f32 %v914_v52, %v546_v13 }
 0x121   : > { %v686_v17 = vadd.f32 %v685_v12, %v616_v15  ;;  %695 = sbr.rel (%p804_p7) target bundleno = 447 (0x1bf), region = 44 }
 0x123   : > { %v689_v19 = vadd.f32 %v686_v17, %v252_v16 }
 0x125   : > { %691 = vst.msk [vmem:[#allocation2] sm:$0x3] %vm690_vm2, %v689_v19 }
 0x126   : > { %v805_v20 = vld [vmem:[%s1241_s2] ss:$0 sm:$0xff]  ;;  %vm718_vm3 = vcmask 1024  }
 0x127   : > { %v806_v21 = vld [vmem:[%s1242_s3] ss:$0 sm:$0xff] }
 0x12c   : > { %v696_v18 = vld [vmem:[#allocation2] sm:$0x3] }
 0x12d   : > { %v704_v22 = vmul.f32 %v805_v20, %v696_v18 }
 0x12f   : > { %v712_v23 = vadd.f32 %v806_v21, %v704_v22 }
 0x131   : > { %v713_v24 = vsel %vm690_vm2, %v712_v23, 0.0 }
 0x132   : > { %714 = vadd.xlane.f32.xlu0 %v713_v24 }
 0x1bb   : > { %v715_v25 = vpop.xlane.xlu0 %714 }
 0x1bc   : > { %v717_v26 = vmul.f32 0.03125, %v715_v25 }
 0x1be   : > { %719 = vst.msk [vmem:[%s1243_s4] sm:$0x3] %vm718_vm3, %v717_v26 }
 0x1bf PF: > { %s14_s17 = sadd.s32 1, %s1019_s17   ;;  %s1244_s15 = smov %s1015_s16 }
 0x1c0   : > { %p11_p8 = scmp.ge.s32.totalorder %s14_s17, 9   ;;  %s1245_s16 = smov %s1247_s18 }
 0x1c2   :  { %13 = sbr.rel (!%p11_p8) target bundleno = 2 (0x2), region = 77 }

</bundles_post_ra>
